<compile_context>
chip_gen: v7x
topology: tpu7x:2x2x1
jax: 0.10.0
libtpu: 0.0.40
codegen_flags: <defaults>
</compile_context>

<pallas_src>
import functools

import jax
import jax.numpy as jnp
from jax import lax
from jax.experimental import pallas as pl
from jax.experimental.pallas import tpu as pltpu

_LANE = 128
# Safe on every generation: well below v5e/v6e 128 MiB and v7x 64 MiB physical.
_VMEM_LIMIT = 32 * 1024 * 1024


def _round_up(x, m):
    return ((x + m - 1) // m) * m


def _pad_axis(a, axis, target):
    if a.shape[axis] >= target:
        return a
    widths = [(0, 0)] * a.ndim
    widths[axis] = (0, target - a.shape[axis])
    return jnp.pad(a, widths)


def _compiler_params():
    # Every kernel below uses exactly one grid axis (over the batch).
    return pltpu.CompilerParams(
        dimension_semantics=("parallel",),
        vmem_limit_bytes=_VMEM_LIMIT,
    )


# ---------------------------------------------------------------------------
# In-kernel building blocks (values only: 2-D slices / concats, no reshapes)
# ---------------------------------------------------------------------------
def _maxpool_3x3_s2_p1_flat(h, oh, ow):
    """3x3 / stride-2 / pad-1 max pool on a row-major flattened activation.

    h: (oh*ow, C) f32 value.  Returns ((oh//2)*(ow//2), C) f32.
    Border handling clips the window (equivalent to -inf padding, which is
    what PyTorch MaxPool2d does).
    """
    ph, pw = oh // 2, ow // 2
    rows = [h[r * ow:(r + 1) * ow, :] for r in range(oh)]
    out_rows = []
    for R in range(ph):
        r0, r1 = max(2 * R - 1, 0), min(2 * R + 2, oh)
        rmax = rows[r0]
        for rr in range(r0 + 1, r1):
            rmax = jnp.maximum(rmax, rows[rr])                     # (ow, C)
        pieces = []
        for Cc in range(pw):
            c0, c1 = max(2 * Cc - 1, 0), min(2 * Cc + 2, ow)
            pieces.append(jnp.max(rmax[c0:c1, :], axis=0, keepdims=True))
        out_rows.append(jnp.concatenate(pieces, axis=0))           # (pw, C)
    return jnp.concatenate(out_rows, axis=0)                       # (ph*pw, C)


def _conv3x3_flat(h, w, oh, ow):
    """3x3 / stride-1 / pad-1 conv on a row-major flattened activation.

    h: (oh*ow, C) f32, w: (9*C, OC) bf16 with rows ordered (kh, kw, c).
    Builds the (oh*ow, 9*C) im2col patch in registers (f32, concats only) and
    issues ONE MXU dot.  Returns (oh*ow, OC) f32.
    """
    _, C = h.shape
    rows = [h[r * ow:(r + 1) * ow, :] for r in range(oh)]
    zrow = jnp.zeros((ow, C), h.dtype)
    zcol = jnp.zeros((1, C), h.dtype)
    prows = [zrow] + rows + [zrow]                                 # rows -1 .. oh

    def shifted(row, j):
        if j == 0:      # column c-1 (zero at c == 0)
            return jnp.concatenate([zcol, row[:ow - 1, :]], axis=0)
        if j == 2:      # column c+1 (zero at c == ow-1)
            return jnp.concatenate([row[1:, :], zcol], axis=0)
        return row      # column c

    shifted_rows = [[shifted(pr, j) for j in range(3)] for pr in prows]
    patch_rows = [
        jnp.concatenate(
            [shifted_rows[r + i][j] for i in range(3) for j in range(3)], axis=1)
        for r in range(oh)
    ]                                                              # oh x (ow, 9C)
    patches = jnp.concatenate(patch_rows, axis=0).astype(jnp.bfloat16)
    return jnp.dot(patches, w, preferred_element_type=jnp.float32)


# ---------------------------------------------------------------------------
# Fused stage kernels (one image per grid step)
# ---------------------------------------------------------------------------
def _stage1_kernel(cols_ref, w_ref, b_ref, s_ref, t_ref, o_ref, *, oh, ow):
    """conv1 (as im2col matmul) + bias + ReLU + folded BN1 + maxpool(3,2,1)."""
    acc = jnp.dot(cols_ref[0], w_ref[...], preferred_element_type=jnp.float32)
    acc = jnp.maximum(acc + b_ref[...], 0.0)
    acc = acc * s_ref[...] + t_ref[...]                            # (oh*ow, 128)
    o_ref[0] = _maxpool_3x3_s2_p1_flat(acc, oh, ow).astype(o_ref.dtype)


def _stage2_kernel(x_ref, w2_ref, b2_ref, w3_ref, b3_ref, w4_ref, b4_ref,
                   s_ref, t_ref, o_ref, *, oh, ow):
    """conv2(1x1)+ReLU -> conv3(3x3)+ReLU -> conv4(1x1)+ReLU+BN2 -> maxpool."""
    x = x_ref[0]                                                   # (oh*ow, 128) bf16
    h = jnp.dot(x, w2_ref[...], preferred_element_type=jnp.float32)
    h = jnp.maximum(h + b2_ref[...], 0.0)                          # f32
    h = _conv3x3_flat(h, w3_ref[...], oh, ow)
    h = jnp.maximum(h + b3_ref[...], 0.0).astype(jnp.bfloat16)
    h = jnp.dot(h, w4_ref[...], preferred_element_type=jnp.float32)
    h = jnp.maximum(h + b4_ref[...], 0.0)
    h = h * s_ref[...] + t_ref[...]                                # (oh*ow, 256) f32
    o_ref[0] = _maxpool_3x3_s2_p1_flat(h, oh, ow).astype(o_ref.dtype)


def _stage3_kernel(x_ref, w5_ref, b5_ref, w6_ref, b6_ref, w7_ref, b7_ref,
                   s_ref, t_ref, fw_ref, fb_ref, o_ref, *, oh, ow):
    """conv5(1x1)+ReLU -> conv6(3x3)+ReLU -> conv7(1x1)+ReLU+BN3
       -> global avg pool -> FC (lane-padded logits)."""
    x = x_ref[0]                                                   # (oh*ow, 256) bf16
    h = jnp.dot(x, w5_ref[...], preferred_element_type=jnp.float32)
    h = jnp.maximum(h + b5_ref[...], 0.0)                          # (oh*ow, 128) f32
    h = _conv3x3_flat(h, w6_ref[...], oh, ow)
    h = jnp.maximum(h + b6_ref[...], 0.0).astype(jnp.bfloat16)
    h = jnp.dot(h, w7_ref[...], preferred_element_type=jnp.float32)
    h = jnp.maximum(h + b7_ref[...], 0.0)
    h = h * s_ref[...] + t_ref[...]                                # (oh*ow, 512) f32
    pooled = (jnp.sum(h, axis=0, keepdims=True) * (1.0 / (oh * ow)))
    logits = jnp.dot(pooled.astype(jnp.bfloat16), fw_ref[...],
                     preferred_element_type=jnp.float32)
    o_ref[0] = (logits + fb_ref[...]).astype(o_ref.dtype)


# ---------------------------------------------------------------------------
# pallas_call wrappers
# ---------------------------------------------------------------------------
def _bcast2(shape):
    return pl.BlockSpec(shape, lambda n: (0, 0))


def run_stage1(cols, w, b, s, t, *, oh, ow):
    N, M, Kp = cols.shape
    OC = w.shape[1]
    Mo = (oh // 2) * (ow // 2)
    return pl.pallas_call(
        functools.partial(_stage1_kernel, oh=oh, ow=ow),
        out_shape=jax.ShapeDtypeStruct((N, Mo, OC), jnp.bfloat16),
        grid=(N,),
        in_specs=[
            pl.BlockSpec((1, M, Kp), lambda n: (n, 0, 0)),
            _bcast2(w.shape), _bcast2(b.shape), _bcast2(s.shape), _bcast2(t.shape),
        ],
        out_specs=pl.BlockSpec((1, Mo, OC), lambda n: (n, 0, 0)),
        compiler_params=_compiler_params(),
    )(cols, w, b, s, t)


def run_stage2(x, w2, b2, w3, b3, w4, b4, s, t, *, oh, ow):
    N, M, C = x.shape
    OC = w4.shape[1]
    Mo = (oh // 2) * (ow // 2)
    return pl.pallas_call(
        functools.partial(_stage2_kernel, oh=oh, ow=ow),
        out_shape=jax.ShapeDtypeStruct((N, Mo, OC), jnp.bfloat16),
        grid=(N,),
        in_specs=[
            pl.BlockSpec((1, M, C), lambda n: (n, 0, 0)),
            _bcast2(w2.shape), _bcast2(b2.shape),
            _bcast2(w3.shape), _bcast2(b3.shape),
            _bcast2(w4.shape), _bcast2(b4.shape),
            _bcast2(s.shape), _bcast2(t.shape),
        ],
        out_specs=pl.BlockSpec((1, Mo, OC), lambda n: (n, 0, 0)),
        compiler_params=_compiler_params(),
    )(x, w2, b2, w3, b3, w4, b4, s, t)


def run_stage3(x, w5, b5, w6, b6, w7, b7, s, t, fw, fb, *, oh, ow):
    N, M, C = x.shape
    OCF = fw.shape[1]
    out = pl.pallas_call(
        functools.partial(_stage3_kernel, oh=oh, ow=ow),
        out_shape=jax.ShapeDtypeStruct((N, 1, OCF), jnp.float32),
        grid=(N,),
        in_specs=[
            pl.BlockSpec((1, M, C), lambda n: (n, 0, 0)),
            _bcast2(w5.shape), _bcast2(b5.shape),
            _bcast2(w6.shape), _bcast2(b6.shape),
            _bcast2(w7.shape), _bcast2(b7.shape),
            _bcast2(s.shape), _bcast2(t.shape),
            _bcast2(fw.shape), _bcast2(fb.shape),
        ],
        out_specs=pl.BlockSpec((1, 1, OCF), lambda n: (n, 0, 0)),
        compiler_params=_compiler_params(),
    )(x, w5, b5, w6, b6, w7, b7, s, t, fw, fb)
    return out[:, 0, :]


# ---------------------------------------------------------------------------
# Host-side glue: conv1 im2col, BN folding, parameter prep
# ---------------------------------------------------------------------------
def im2col_conv1(x_nhwc, kh=7, kw=7, stride=2, pad=3, k_pad=256):
    """Per-image im2col for the 7x7/s2/p3 conv; K zero-padded to `k_pad`.

    TODO(synk): this patch extraction is still XLA glue (one-time, ~50 small
    ops); a strided in-kernel gather would remove the last HBM staging buffer.
    """
    N, H, W, C = x_nhwc.shape
    xp = jnp.pad(x_nhwc, ((0, 0), (pad, pad), (pad, pad), (0, 0)))
    OH = (H + 2 * pad - kh) // stride + 1
    OW = (W + 2 * pad - kw) // stride + 1
    patches = []
    for i in range(kh):
        for j in range(kw):
            patches.append(
                lax.slice(
                    xp,
                    (0, i, j, 0),
                    (N, i + (OH - 1) * stride + 1, j + (OW - 1) * stride + 1, C),
                    (1, stride, stride, 1),
                )
            )
    cols = jnp.stack(patches, axis=3)                  # (N, OH, OW, kh*kw, C)
    cols = cols.reshape(N, OH * OW, kh * kw * C)       # K ordered (kh, kw, c)
    if k_pad > kh * kw * C:
        cols = jnp.pad(cols, ((0, 0), (0, 0), (0, k_pad - kh * kw * C)))
    return cols, OH, OW


def bn_affine(gamma, beta, mean, var, eps=1e-5):
    scale = gamma / jnp.sqrt(var + eps)
    shift = beta - mean * scale
    return scale, shift


def init_params(key, num_classes=100):
    """PyTorch-layout parameters (OIHW conv weights, [out,in] Linear)."""
    conv_cfg = [
        ("conv1", 64, 3, 7),
        ("conv2", 64, 64, 1),
        ("conv3", 64, 64, 3),
        ("conv4", 256, 64, 1),
        ("conv5", 128, 256, 1),
        ("conv6", 128, 128, 3),
        ("conv7", 512, 128, 1),
    ]
    keys = jax.random.split(key, len(conv_cfg) * 2 + 2)
    params = {}
    for n, (name, oc, ic, k) in enumerate(conv_cfg):
        fan_out = oc * k * k
        std = (2.0 / fan_out) ** 0.5  # kaiming_normal_, mode='fan_out', relu
        params[name + "_w"] = (
            jax.random.normal(keys[2 * n], (oc, ic, k, k), jnp.float32) * std
        )
        params[name + "_b"] = (
            jax.random.normal(keys[2 * n + 1], (oc,), jnp.float32) * 0.01
        )
    # BatchNorm2d defaults: weight=1, bias=0, running_mean=0, running_var=1
    for name, c in [("bn1", 64), ("bn2", 256), ("bn3", 512)]:
        params[name] = (
            jnp.ones((c,), jnp.float32),
            jnp.zeros((c,), jnp.float32),
            jnp.zeros((c,), jnp.float32),
            jnp.ones((c,), jnp.float32),
        )
    fc_std = 1.0 / (512.0 ** 0.5)
    params["fc_w"] = jax.random.uniform(
        keys[-2], (num_classes, 512), jnp.float32, -fc_std, fc_std)
    params["fc_b"] = jax.random.uniform(
        keys[-1], (num_classes,), jnp.float32, -fc_std, fc_std)
    return params


def prepare_params(params, num_classes=100):
    """One-time conversion to inference layout: (kh*kw*ic, oc) bf16 conv
    weights with channels padded to 128 lanes, folded BN scale/shift, bf16 FC
    weight, conv1 K rows padded 147 -> 256.  All padded slots are inert."""
    def conv_as_matmul(w_oihw, ic_pad=None, oc_pad=None, k_rows_pad=None):
        w = jnp.transpose(w_oihw, (2, 3, 1, 0))          # (kh, kw, ic, oc)
        if ic_pad is not None:
            w = _pad_axis(w, 2, ic_pad)
        if oc_pad is not None:
            w = _pad_axis(w, 3, oc_pad)
        kh, kw, icp, ocp = w.shape
        w = w.reshape(kh * kw * icp, ocp)
        if k_rows_pad is not None:
            w = _pad_axis(w, 0, k_rows_pad)
        return w.astype(jnp.bfloat16)

    def row(v, n, fill=0.0):
        v = v.astype(jnp.float32)
        if v.shape[0] < n:
            v = jnp.concatenate([v, jnp.full((n - v.shape[0],), fill, jnp.float32)])
        return v.reshape(1, n)

    s1, t1 = bn_affine(*params["bn1"])
    s2, t2 = bn_affine(*params["bn2"])
    s3, t3 = bn_affine(*params["bn3"])
    ncp = _round_up(num_classes, _LANE)

    return {
        # conv1: 3 -> 64, K padded 147 -> 256, OC padded to 128; BN1 folded.
        "c1_w": conv_as_matmul(params["conv1_w"], oc_pad=128, k_rows_pad=256),
        "c1_b": row(params["conv1_b"], 128),
        "bn1_s": row(s1, 128, fill=1.0),
        "bn1_t": row(t1, 128, fill=0.0),
        # conv2: 64 -> 64 (1x1), both sides padded to 128.
        "c2_w": conv_as_matmul(params["conv2_w"], ic_pad=128, oc_pad=128),
        "c2_b": row(params["conv2_b"], 128),
        # conv3: 64 -> 64 (3x3), rows ordered (kh, kw, c) -> (1152, 128).
        "c3_w": conv_as_matmul(params["conv3_w"], ic_pad=128, oc_pad=128),
        "c3_b": row(params["conv3_b"], 128),
        # conv4: 64 -> 256 (1x1), IC padded to 128; BN2 folded.
        "c4_w": conv_as_matmul(params["conv4_w"], ic_pad=128),      # (128, 256)
        "c4_b": row(params["conv4_b"], 256),
        "bn2_s": row(s2, 256),
        "bn2_t": row(t2, 256),
        # conv5: 256 -> 128 (1x1).
        "c5_w": conv_as_matmul(params["conv5_w"]),                  # (256, 128)
        "c5_b": row(params["conv5_b"], 128),
        # conv6: 128 -> 128 (3x3) -> (1152, 128).
        "c6_w": conv_as_matmul(params["conv6_w"]),
        "c6_b": row(params["conv6_b"], 128),
        # conv7: 128 -> 512 (1x1); BN3 folded.
        "c7_w": conv_as_matmul(params["conv7_w"]),                  # (128, 512)
        "c7_b": row(params["conv7_b"], 512),
        "bn3_s": row(s3, 512),
        "bn3_t": row(t3, 512),
        # fc: pre-transposed to (512, 128) bf16, class dim padded to 128.
        "fc_w": _pad_axis(params["fc_w"].T, 1, ncp).astype(jnp.bfloat16),
        "fc_b": row(params["fc_b"], ncp),
    }


# ---------------------------------------------------------------------------
# Forward pass  (mirrors BetterNet.forward, eval mode)
# ---------------------------------------------------------------------------
def betternet_forward(p, x_nchw, num_classes=100):
    x = jnp.transpose(x_nchw, (0, 2, 3, 1)).astype(jnp.bfloat16)   # NCHW -> NHWC

    # Stage 1: Conv(3->64,k7,s2,p3) -> ReLU -> BN(64) -> MaxPool(3,s2,p1)
    cols, oh1, ow1 = im2col_conv1(x)
    # TODO(synk): odd post-conv spatial sizes would need a ceil-mode maxpool.
    assert oh1 % 2 == 0 and ow1 % 2 == 0, (oh1, ow1)
    h = run_stage1(cols, p["c1_w"], p["c1_b"], p["bn1_s"], p["bn1_t"],
                   oh=oh1, ow=ow1)                                 # (N, oh1*ow1/4, 128)

    # Stage 2: Conv(64->64,k1) -> ReLU -> Conv(64->64,k3,p1) -> ReLU
    #          -> Conv(64->256,k1) -> ReLU -> BN(256) -> MaxPool(3,s2,p1)
    oh2, ow2 = oh1 // 2, ow1 // 2
    assert oh2 % 2 == 0 and ow2 % 2 == 0, (oh2, ow2)
    h = run_stage2(h, p["c2_w"], p["c2_b"], p["c3_w"], p["c3_b"],
                   p["c4_w"], p["c4_b"], p["bn2_s"], p["bn2_t"],
                   oh=oh2, ow=ow2)                                 # (N, oh2*ow2/4, 256)

    # Stage 3: Conv(256->128,k1) -> ReLU -> Conv(128->128,k3,p1) -> ReLU
    #          -> Conv(128->512,k1) -> ReLU -> BN(512)
    #          -> AdaptiveAvgPool2d((1,1)) -> Linear(512, num_classes)
    oh3, ow3 = oh2 // 2, ow2 // 2
    logits = run_stage3(h, p["c5_w"], p["c5_b"], p["c6_w"], p["c6_b"],
                        p["c7_w"], p["c7_b"], p["bn3_s"], p["bn3_t"],
                        p["fc_w"], p["fc_b"], oh=oh3, ow=ow3)      # (N, 128)
    return logits[:, :num_classes]


if __name__ == "__main__":
    key = jax.random.PRNGKey(0)
    pkey, xkey = jax.random.split(key)
    params = init_params(pkey, num_classes=100)
    prep = prepare_params(params, num_classes=100)

    # Small input consistent with the module's NCHW forward: N=2, C=3, H=W=16.
    x = jax.random.normal(xkey, (2, 3, 16, 16), jnp.float32)

    logits = jax.jit(betternet_forward)(prep, x)
    jax.block_until_ready(logits)
    assert logits.shape == (2, 100), logits.shape
    assert bool(jnp.all(jnp.isfinite(logits)))
    print("KERNEL_OK")
</pallas_src>

<mosaic_0001>
module attributes {stable_mosaic.version = 11 : i64} {
  func.func @_stage1_kernel(%arg0: i32, %arg1: memref<1x64x256xbf16, #tpu.memory_space<vmem>>, %arg2: memref<256x128xbf16, #tpu.memory_space<vmem>>, %arg3: memref<1x128xf32, #tpu.memory_space<vmem>>, %arg4: memref<1x128xf32, #tpu.memory_space<vmem>>, %arg5: memref<1x128xf32, #tpu.memory_space<vmem>>, %arg6: memref<1x16x128xbf16, #tpu.memory_space<vmem>>) attributes {dimension_semantics = [#tpu.dimension_semantics<parallel>], iteration_bounds = array<i64: 2>, scalar_prefetch = 0 : i64, scratch_operands = 0 : i64, tpu.core_type = #tpu.core_type<tc>, window_params = [{transform_indices = @transform_0, window_bounds = array<i64: 1, 64, 256>}, {pipeline_mode = #tpu.pipeline_mode<synchronous>, transform_indices = @transform_1, window_bounds = array<i64: 256, 128>}, {pipeline_mode = #tpu.pipeline_mode<synchronous>, transform_indices = @transform_2, window_bounds = array<i64: 1, 128>}, {pipeline_mode = #tpu.pipeline_mode<synchronous>, transform_indices = @transform_3, window_bounds = array<i64: 1, 128>}, {pipeline_mode = #tpu.pipeline_mode<synchronous>, transform_indices = @transform_4, window_bounds = array<i64: 1, 128>}, {transform_indices = @transform_5, window_bounds = array<i64: 1, 16, 128>}]} {
    %c0 = arith.constant 0 : index
    %c0_0 = arith.constant 0 : index
    %c0_1 = arith.constant 0 : index
    %0 = vector.load %arg1[%c0, %c0_0, %c0_1] : memref<1x64x256xbf16, #tpu.memory_space<vmem>>, vector<1x64x256xbf16>
    %1 = vector.shape_cast %0 : vector<1x64x256xbf16> to vector<64x256xbf16>
    %c0_2 = arith.constant 0 : index
    %c0_3 = arith.constant 0 : index
    %2 = vector.load %arg2[%c0_2, %c0_3] : memref<256x128xbf16, #tpu.memory_space<vmem>>, vector<256x128xbf16>
    %cst = arith.constant dense<0.000000e+00> : vector<64x128xf32>
    %3 = tpu.matmul %1, %2, %cst {dimension_numbers = #tpu.dot_dimension_numbers<[1], [0], [0], [1], [0, 0, 1, 1], [], []>} : vector<64x256xbf16>, vector<256x128xbf16>, vector<64x128xf32> -> vector<64x128xf32>
    %c0_4 = arith.constant 0 : index
    %c0_5 = arith.constant 0 : index
    %4 = vector.load %arg3[%c0_4, %c0_5] : memref<1x128xf32, #tpu.memory_space<vmem>>, vector<1x128xf32>
    %5 = vector.broadcast %4 : vector<1x128xf32> to vector<64x128xf32>
    %6 = arith.addf %3, %5 : vector<64x128xf32>
    %cst_6 = arith.constant 0.000000e+00 : f32
    %7 = vector.broadcast %cst_6 : f32 to vector<64x128xf32>
    %8 = arith.maximumf %6, %7 : vector<64x128xf32>
    %c0_7 = arith.constant 0 : index
    %c0_8 = arith.constant 0 : index
    %9 = vector.load %arg4[%c0_7, %c0_8] : memref<1x128xf32, #tpu.memory_space<vmem>>, vector<1x128xf32>
    %10 = vector.broadcast %9 : vector<1x128xf32> to vector<64x128xf32>
    %11 = arith.mulf %8, %10 : vector<64x128xf32>
    %c0_9 = arith.constant 0 : index
    %c0_10 = arith.constant 0 : index
    %12 = vector.load %arg5[%c0_9, %c0_10] : memref<1x128xf32, #tpu.memory_space<vmem>>, vector<1x128xf32>
    %13 = vector.broadcast %12 : vector<1x128xf32> to vector<64x128xf32>
    %14 = arith.addf %11, %13 : vector<64x128xf32>
    %15 = vector.extract_strided_slice %14 {offsets = [0, 0], sizes = [8, 128], strides = [1, 1]} : vector<64x128xf32> to vector<8x128xf32>
    %16 = vector.extract_strided_slice %14 {offsets = [8, 0], sizes = [8, 128], strides = [1, 1]} : vector<64x128xf32> to vector<8x128xf32>
    %17 = vector.extract_strided_slice %14 {offsets = [16, 0], sizes = [8, 128], strides = [1, 1]} : vector<64x128xf32> to vector<8x128xf32>
    %18 = vector.extract_strided_slice %14 {offsets = [24, 0], sizes = [8, 128], strides = [1, 1]} : vector<64x128xf32> to vector<8x128xf32>
    %19 = vector.extract_strided_slice %14 {offsets = [32, 0], sizes = [8, 128], strides = [1, 1]} : vector<64x128xf32> to vector<8x128xf32>
    %20 = vector.extract_strided_slice %14 {offsets = [40, 0], sizes = [8, 128], strides = [1, 1]} : vector<64x128xf32> to vector<8x128xf32>
    %21 = vector.extract_strided_slice %14 {offsets = [48, 0], sizes = [8, 128], strides = [1, 1]} : vector<64x128xf32> to vector<8x128xf32>
    %22 = vector.extract_strided_slice %14 {offsets = [56, 0], sizes = [8, 128], strides = [1, 1]} : vector<64x128xf32> to vector<8x128xf32>
    %23 = arith.maximumf %15, %16 : vector<8x128xf32>
    %24 = vector.extract_strided_slice %23 {offsets = [0, 0], sizes = [2, 128], strides = [1, 1]} : vector<8x128xf32> to vector<2x128xf32>
    %cst_11 = arith.constant dense<0xFF800000> : vector<128xf32>
    %25 = vector.multi_reduction <maximumf>, %24, %cst_11 [0] : vector<2x128xf32> to vector<128xf32>
    %26 = vector.shape_cast %25 : vector<128xf32> to vector<1x128xf32>
    %27 = vector.extract_strided_slice %23 {offsets = [1, 0], sizes = [3, 128], strides = [1, 1]} : vector<8x128xf32> to vector<3x128xf32>
    %cst_12 = arith.constant dense<0xFF800000> : vector<128xf32>
    %28 = vector.multi_reduction <maximumf>, %27, %cst_12 [0] : vector<3x128xf32> to vector<128xf32>
    %29 = vector.shape_cast %28 : vector<128xf32> to vector<1x128xf32>
    %30 = vector.extract_strided_slice %23 {offsets = [3, 0], sizes = [3, 128], strides = [1, 1]} : vector<8x128xf32> to vector<3x128xf32>
    %cst_13 = arith.constant dense<0xFF800000> : vector<128xf32>
    %31 = vector.multi_reduction <maximumf>, %30, %cst_13 [0] : vector<3x128xf32> to vector<128xf32>
    %32 = vector.shape_cast %31 : vector<128xf32> to vector<1x128xf32>
    %33 = vector.extract_strided_slice %23 {offsets = [5, 0], sizes = [3, 128], strides = [1, 1]} : vector<8x128xf32> to vector<3x128xf32>
    %cst_14 = arith.constant dense<0xFF800000> : vector<128xf32>
    %34 = vector.multi_reduction <maximumf>, %33, %cst_14 [0] : vector<3x128xf32> to vector<128xf32>
    %35 = vector.shape_cast %34 : vector<128xf32> to vector<1x128xf32>
    %36 = tpu.concatenate %26, %29, %32, %35 in 0 : vector<1x128xf32>, vector<1x128xf32>, vector<1x128xf32>, vector<1x128xf32> -> vector<4x128xf32>
    %37 = arith.maximumf %16, %17 : vector<8x128xf32>
    %38 = arith.maximumf %37, %18 : vector<8x128xf32>
    %39 = vector.extract_strided_slice %38 {offsets = [0, 0], sizes = [2, 128], strides = [1, 1]} : vector<8x128xf32> to vector<2x128xf32>
    %cst_15 = arith.constant dense<0xFF800000> : vector<128xf32>
    %40 = vector.multi_reduction <maximumf>, %39, %cst_15 [0] : vector<2x128xf32> to vector<128xf32>
    %41 = vector.shape_cast %40 : vector<128xf32> to vector<1x128xf32>
    %42 = vector.extract_strided_slice %38 {offsets = [1, 0], sizes = [3, 128], strides = [1, 1]} : vector<8x128xf32> to vector<3x128xf32>
    %cst_16 = arith.constant dense<0xFF800000> : vector<128xf32>
    %43 = vector.multi_reduction <maximumf>, %42, %cst_16 [0] : vector<3x128xf32> to vector<128xf32>
    %44 = vector.shape_cast %43 : vector<128xf32> to vector<1x128xf32>
    %45 = vector.extract_strided_slice %38 {offsets = [3, 0], sizes = [3, 128], strides = [1, 1]} : vector<8x128xf32> to vector<3x128xf32>
    %cst_17 = arith.constant dense<0xFF800000> : vector<128xf32>
    %46 = vector.multi_reduction <maximumf>, %45, %cst_17 [0] : vector<3x128xf32> to vector<128xf32>
    %47 = vector.shape_cast %46 : vector<128xf32> to vector<1x128xf32>
    %48 = vector.extract_strided_slice %38 {offsets = [5, 0], sizes = [3, 128], strides = [1, 1]} : vector<8x128xf32> to vector<3x128xf32>
    %cst_18 = arith.constant dense<0xFF800000> : vector<128xf32>
    %49 = vector.multi_reduction <maximumf>, %48, %cst_18 [0] : vector<3x128xf32> to vector<128xf32>
    %50 = vector.shape_cast %49 : vector<128xf32> to vector<1x128xf32>
    %51 = tpu.concatenate %41, %44, %47, %50 in 0 : vector<1x128xf32>, vector<1x128xf32>, vector<1x128xf32>, vector<1x128xf32> -> vector<4x128xf32>
    %52 = arith.maximumf %18, %19 : vector<8x128xf32>
    %53 = arith.maximumf %52, %20 : vector<8x128xf32>
    %54 = vector.extract_strided_slice %53 {offsets = [0, 0], sizes = [2, 128], strides = [1, 1]} : vector<8x128xf32> to vector<2x128xf32>
    %cst_19 = arith.constant dense<0xFF800000> : vector<128xf32>
    %55 = vector.multi_reduction <maximumf>, %54, %cst_19 [0] : vector<2x128xf32> to vector<128xf32>
    %56 = vector.shape_cast %55 : vector<128xf32> to vector<1x128xf32>
    %57 = vector.extract_strided_slice %53 {offsets = [1, 0], sizes = [3, 128], strides = [1, 1]} : vector<8x128xf32> to vector<3x128xf32>
    %cst_20 = arith.constant dense<0xFF800000> : vector<128xf32>
    %58 = vector.multi_reduction <maximumf>, %57, %cst_20 [0] : vector<3x128xf32> to vector<128xf32>
    %59 = vector.shape_cast %58 : vector<128xf32> to vector<1x128xf32>
    %60 = vector.extract_strided_slice %53 {offsets = [3, 0], sizes = [3, 128], strides = [1, 1]} : vector<8x128xf32> to vector<3x128xf32>
    %cst_21 = arith.constant dense<0xFF800000> : vector<128xf32>
    %61 = vector.multi_reduction <maximumf>, %60, %cst_21 [0] : vector<3x128xf32> to vector<128xf32>
    %62 = vector.shape_cast %61 : vector<128xf32> to vector<1x128xf32>
    %63 = vector.extract_strided_slice %53 {offsets = [5, 0], sizes = [3, 128], strides = [1, 1]} : vector<8x128xf32> to vector<3x128xf32>
    %cst_22 = arith.constant dense<0xFF800000> : vector<128xf32>
    %64 = vector.multi_reduction <maximumf>, %63, %cst_22 [0] : vector<3x128xf32> to vector<128xf32>
    %65 = vector.shape_cast %64 : vector<128xf32> to vector<1x128xf32>
    %66 = tpu.concatenate %56, %59, %62, %65 in 0 : vector<1x128xf32>, vector<1x128xf32>, vector<1x128xf32>, vector<1x128xf32> -> vector<4x128xf32>
    %67 = arith.maximumf %20, %21 : vector<8x128xf32>
    %68 = arith.maximumf %67, %22 : vector<8x128xf32>
    %69 = vector.extract_strided_slice %68 {offsets = [0, 0], sizes = [2, 128], strides = [1, 1]} : vector<8x128xf32> to vector<2x128xf32>
    %cst_23 = arith.constant dense<0xFF800000> : vector<128xf32>
    %70 = vector.multi_reduction <maximumf>, %69, %cst_23 [0] : vector<2x128xf32> to vector<128xf32>
    %71 = vector.shape_cast %70 : vector<128xf32> to vector<1x128xf32>
    %72 = vector.extract_strided_slice %68 {offsets = [1, 0], sizes = [3, 128], strides = [1, 1]} : vector<8x128xf32> to vector<3x128xf32>
    %cst_24 = arith.constant dense<0xFF800000> : vector<128xf32>
    %73 = vector.multi_reduction <maximumf>, %72, %cst_24 [0] : vector<3x128xf32> to vector<128xf32>
    %74 = vector.shape_cast %73 : vector<128xf32> to vector<1x128xf32>
    %75 = vector.extract_strided_slice %68 {offsets = [3, 0], sizes = [3, 128], strides = [1, 1]} : vector<8x128xf32> to vector<3x128xf32>
    %cst_25 = arith.constant dense<0xFF800000> : vector<128xf32>
    %76 = vector.multi_reduction <maximumf>, %75, %cst_25 [0] : vector<3x128xf32> to vector<128xf32>
    %77 = vector.shape_cast %76 : vector<128xf32> to vector<1x128xf32>
    %78 = vector.extract_strided_slice %68 {offsets = [5, 0], sizes = [3, 128], strides = [1, 1]} : vector<8x128xf32> to vector<3x128xf32>
    %cst_26 = arith.constant dense<0xFF800000> : vector<128xf32>
    %79 = vector.multi_reduction <maximumf>, %78, %cst_26 [0] : vector<3x128xf32> to vector<128xf32>
    %80 = vector.shape_cast %79 : vector<128xf32> to vector<1x128xf32>
    %81 = tpu.concatenate %71, %74, %77, %80 in 0 : vector<1x128xf32>, vector<1x128xf32>, vector<1x128xf32>, vector<1x128xf32> -> vector<4x128xf32>
    %82 = tpu.concatenate %36, %51, %66, %81 in 0 : vector<4x128xf32>, vector<4x128xf32>, vector<4x128xf32>, vector<4x128xf32> -> vector<16x128xf32>
    %83 = arith.truncf %82 : vector<16x128xf32> to vector<16x128xbf16>
    %c0_27 = arith.constant 0 : index
    %c0_28 = arith.constant 0 : index
    %c0_29 = arith.constant 0 : index
    %84 = vector.load %arg6[%c0_27, %c0_28, %c0_29] : memref<1x16x128xbf16, #tpu.memory_space<vmem>>, vector<1x16x128xbf16>
    %85 = vector.shape_cast %84 : vector<1x16x128xbf16> to vector<16x128xbf16>
    %86 = vector.shape_cast %83 : vector<16x128xbf16> to vector<1x16x128xbf16>
    tpu.vector_store %arg6[%c0_27, %c0_28, %c0_29], %86 {strides = array<i32>} : memref<1x16x128xbf16, #tpu.memory_space<vmem>>, vector<1x16x128xbf16>,
    return
  }
  func.func @transform_0(%arg0: i32) -> (i32, i32, i32) {
    %c0_i32 = arith.constant 0 : i32
    %c0_i32_0 = arith.constant 0 : i32
    %c0_i32_1 = arith.constant 0 : i32
    return %arg0, %c0_i32, %c0_i32_0 : i32, i32, i32
  }
  func.func @transform_1(%arg0: i32) -> (i32, i32) {
    %c0_i32 = arith.constant 0 : i32
    %c0_i32_0 = arith.constant 0 : i32
    %c0_i32_1 = arith.constant 0 : i32
    return %c0_i32, %c0_i32_0 : i32, i32
  }
  func.func @transform_2(%arg0: i32) -> (i32, i32) {
    %c0_i32 = arith.constant 0 : i32
    %c0_i32_0 = arith.constant 0 : i32
    %c0_i32_1 = arith.constant 0 : i32
    return %c0_i32, %c0_i32_0 : i32, i32
  }
  func.func @transform_3(%arg0: i32) -> (i32, i32) {
    %c0_i32 = arith.constant 0 : i32
    %c0_i32_0 = arith.constant 0 : i32
    %c0_i32_1 = arith.constant 0 : i32
    return %c0_i32, %c0_i32_0 : i32, i32
  }
  func.func @transform_4(%arg0: i32) -> (i32, i32) {
    %c0_i32 = arith.constant 0 : i32
    %c0_i32_0 = arith.constant 0 : i32
    %c0_i32_1 = arith.constant 0 : i32
    return %c0_i32, %c0_i32_0 : i32, i32
  }
  func.func @transform_5(%arg0: i32) -> (i32, i32, i32) {
    %c0_i32 = arith.constant 0 : i32
    %c0_i32_0 = arith.constant 0 : i32
    %c0_i32_1 = arith.constant 0 : i32
    return %arg0, %c0_i32, %c0_i32_0 : i32, i32, i32
  }
}

module attributes {stable_mosaic.version = 11 : i64} {
  func.func @_stage2_kernel(%arg0: i32, %arg1: memref<1x16x128xbf16, #tpu.memory_space<vmem>>, %arg2: memref<128x128xbf16, #tpu.memory_space<vmem>>, %arg3: memref<1x128xf32, #tpu.memory_space<vmem>>, %arg4: memref<1152x128xbf16, #tpu.memory_space<vmem>>, %arg5: memref<1x128xf32, #tpu.memory_space<vmem>>, %arg6: memref<128x256xbf16, #tpu.memory_space<vmem>>, %arg7: memref<1x256xf32, #tpu.memory_space<vmem>>, %arg8: memref<1x256xf32, #tpu.memory_space<vmem>>, %arg9: memref<1x256xf32, #tpu.memory_space<vmem>>, %arg10: memref<1x4x256xbf16, #tpu.memory_space<vmem>>) attributes {dimension_semantics = [#tpu.dimension_semantics<parallel>], iteration_bounds = array<i64: 2>, scalar_prefetch = 0 : i64, scratch_operands = 0 : i64, tpu.core_type = #tpu.core_type<tc>, window_params = [{transform_indices = @transform_0, window_bounds = array<i64: 1, 16, 128>}, {pipeline_mode = #tpu.pipeline_mode<synchronous>, transform_indices = @transform_1, window_bounds = array<i64: 128, 128>}, {pipeline_mode = #tpu.pipeline_mode<synchronous>, transform_indices = @transform_2, window_bounds = array<i64: 1, 128>}, {pipeline_mode = #tpu.pipeline_mode<synchronous>, transform_indices = @transform_3, window_bounds = array<i64: 1152, 128>}, {pipeline_mode = #tpu.pipeline_mode<synchronous>, transform_indices = @transform_4, window_bounds = array<i64: 1, 128>}, {pipeline_mode = #tpu.pipeline_mode<synchronous>, transform_indices = @transform_5, window_bounds = array<i64: 128, 256>}, {pipeline_mode = #tpu.pipeline_mode<synchronous>, transform_indices = @transform_6, window_bounds = array<i64: 1, 256>}, {pipeline_mode = #tpu.pipeline_mode<synchronous>, transform_indices = @transform_7, window_bounds = array<i64: 1, 256>}, {pipeline_mode = #tpu.pipeline_mode<synchronous>, transform_indices = @transform_8, window_bounds = array<i64: 1, 256>}, {transform_indices = @transform_9, window_bounds = array<i64: 1, 4, 256>}]} {
    %c0 = arith.constant 0 : index
    %c0_0 = arith.constant 0 : index
    %c0_1 = arith.constant 0 : index
    %0 = vector.load %arg1[%c0, %c0_0, %c0_1] : memref<1x16x128xbf16, #tpu.memory_space<vmem>>, vector<1x16x128xbf16>
    %1 = vector.shape_cast %0 : vector<1x16x128xbf16> to vector<16x128xbf16>
    %c0_2 = arith.constant 0 : index
    %c0_3 = arith.constant 0 : index
    %2 = vector.load %arg2[%c0_2, %c0_3] : memref<128x128xbf16, #tpu.memory_space<vmem>>, vector<128x128xbf16>
    %cst = arith.constant dense<0.000000e+00> : vector<16x128xf32>
    %3 = tpu.matmul %1, %2, %cst {dimension_numbers = #tpu.dot_dimension_numbers<[1], [0], [0], [1], [0, 0, 1, 1], [], []>} : vector<16x128xbf16>, vector<128x128xbf16>, vector<16x128xf32> -> vector<16x128xf32>
    %c0_4 = arith.constant 0 : index
    %c0_5 = arith.constant 0 : index
    %4 = vector.load %arg3[%c0_4, %c0_5] : memref<1x128xf32, #tpu.memory_space<vmem>>, vector<1x128xf32>
    %5 = vector.broadcast %4 : vector<1x128xf32> to vector<16x128xf32>
    %6 = arith.addf %3, %5 : vector<16x128xf32>
    %cst_6 = arith.constant 0.000000e+00 : f32
    %7 = vector.broadcast %cst_6 : f32 to vector<16x128xf32>
    %8 = arith.maximumf %6, %7 : vector<16x128xf32>
    %c0_7 = arith.constant 0 : index
    %c0_8 = arith.constant 0 : index
    %9 = vector.load %arg4[%c0_7, %c0_8] : memref<1152x128xbf16, #tpu.memory_space<vmem>>, vector<1152x128xbf16>
    %10 = vector.extract_strided_slice %8 {offsets = [0, 0], sizes = [4, 128], strides = [1, 1]} : vector<16x128xf32> to vector<4x128xf32>
    %11 = vector.extract_strided_slice %8 {offsets = [4, 0], sizes = [4, 128], strides = [1, 1]} : vector<16x128xf32> to vector<4x128xf32>
    %12 = vector.extract_strided_slice %8 {offsets = [8, 0], sizes = [4, 128], strides = [1, 1]} : vector<16x128xf32> to vector<4x128xf32>
    %13 = vector.extract_strided_slice %8 {offsets = [12, 0], sizes = [4, 128], strides = [1, 1]} : vector<16x128xf32> to vector<4x128xf32>
    %cst_9 = arith.constant 0.000000e+00 : f32
    %14 = vector.broadcast %cst_9 : f32 to vector<4x128xf32>
    %cst_10 = arith.constant 0.000000e+00 : f32
    %15 = vector.broadcast %cst_10 : f32 to vector<1x128xf32>
    %16 = vector.extract_strided_slice %14 {offsets = [0, 0], sizes = [3, 128], strides = [1, 1]} : vector<4x128xf32> to vector<3x128xf32>
    %17 = tpu.concatenate %15, %16 in 0 : vector<1x128xf32>, vector<3x128xf32> -> vector<4x128xf32>
    %18 = vector.extract_strided_slice %14 {offsets = [1, 0], sizes = [3, 128], strides = [1, 1]} : vector<4x128xf32> to vector<3x128xf32>
    %19 = tpu.concatenate %18, %15 in 0 : vector<3x128xf32>, vector<1x128xf32> -> vector<4x128xf32>
    %20 = vector.extract_strided_slice %10 {offsets = [0, 0], sizes = [3, 128], strides = [1, 1]} : vector<4x128xf32> to vector<3x128xf32>
    %21 = tpu.concatenate %15, %20 in 0 : vector<1x128xf32>, vector<3x128xf32> -> vector<4x128xf32>
    %22 = vector.extract_strided_slice %10 {offsets = [1, 0], sizes = [3, 128], strides = [1, 1]} : vector<4x128xf32> to vector<3x128xf32>
    %23 = tpu.concatenate %22, %15 in 0 : vector<3x128xf32>, vector<1x128xf32> -> vector<4x128xf32>
    %24 = vector.extract_strided_slice %11 {offsets = [0, 0], sizes = [3, 128], strides = [1, 1]} : vector<4x128xf32> to vector<3x128xf32>
    %25 = tpu.concatenate %15, %24 in 0 : vector<1x128xf32>, vector<3x128xf32> -> vector<4x128xf32>
    %26 = vector.extract_strided_slice %11 {offsets = [1, 0], sizes = [3, 128], strides = [1, 1]} : vector<4x128xf32> to vector<3x128xf32>
    %27 = tpu.concatenate %26, %15 in 0 : vector<3x128xf32>, vector<1x128xf32> -> vector<4x128xf32>
    %28 = vector.extract_strided_slice %12 {offsets = [0, 0], sizes = [3, 128], strides = [1, 1]} : vector<4x128xf32> to vector<3x128xf32>
    %29 = tpu.concatenate %15, %28 in 0 : vector<1x128xf32>, vector<3x128xf32> -> vector<4x128xf32>
    %30 = vector.extract_strided_slice %12 {offsets = [1, 0], sizes = [3, 128], strides = [1, 1]} : vector<4x128xf32> to vector<3x128xf32>
    %31 = tpu.concatenate %30, %15 in 0 : vector<3x128xf32>, vector<1x128xf32> -> vector<4x128xf32>
    %32 = vector.extract_strided_slice %13 {offsets = [0, 0], sizes = [3, 128], strides = [1, 1]} : vector<4x128xf32> to vector<3x128xf32>
    %33 = tpu.concatenate %15, %32 in 0 : vector<1x128xf32>, vector<3x128xf32> -> vector<4x128xf32>
    %34 = vector.extract_strided_slice %13 {offsets = [1, 0], sizes = [3, 128], strides = [1, 1]} : vector<4x128xf32> to vector<3x128xf32>
    %35 = tpu.concatenate %34, %15 in 0 : vector<3x128xf32>, vector<1x128xf32> -> vector<4x128xf32>
    %36 = vector.extract_strided_slice %14 {offsets = [0, 0], sizes = [3, 128], strides = [1, 1]} : vector<4x128xf32> to vector<3x128xf32>
    %37 = tpu.concatenate %15, %36 in 0 : vector<1x128xf32>, vector<3x128xf32> -> vector<4x128xf32>
    %38 = vector.extract_strided_slice %14 {offsets = [1, 0], sizes = [3, 128], strides = [1, 1]} : vector<4x128xf32> to vector<3x128xf32>
    %39 = tpu.concatenate %38, %15 in 0 : vector<3x128xf32>, vector<1x128xf32> -> vector<4x128xf32>
    %40 = tpu.concatenate %17, %14, %19, %21, %10, %23, %25, %11, %27 in 1 : vector<4x128xf32>, vector<4x128xf32>, vector<4x128xf32>, vector<4x128xf32>, vector<4x128xf32>, vector<4x128xf32>, vector<4x128xf32>, vector<4x128xf32>, vector<4x128xf32> -> vector<4x1152xf32>
    %41 = tpu.concatenate %21, %10, %23, %25, %11, %27, %29, %12, %31 in 1 : vector<4x128xf32>, vector<4x128xf32>, vector<4x128xf32>, vector<4x128xf32>, vector<4x128xf32>, vector<4x128xf32>, vector<4x128xf32>, vector<4x128xf32>, vector<4x128xf32> -> vector<4x1152xf32>
    %42 = tpu.concatenate %25, %11, %27, %29, %12, %31, %33, %13, %35 in 1 : vector<4x128xf32>, vector<4x128xf32>, vector<4x128xf32>, vector<4x128xf32>, vector<4x128xf32>, vector<4x128xf32>, vector<4x128xf32>, vector<4x128xf32>, vector<4x128xf32> -> vector<4x1152xf32>
    %43 = tpu.concatenate %29, %12, %31, %33, %13, %35, %37, %14, %39 in 1 : vector<4x128xf32>, vector<4x128xf32>, vector<4x128xf32>, vector<4x128xf32>, vector<4x128xf32>, vector<4x128xf32>, vector<4x128xf32>, vector<4x128xf32>, vector<4x128xf32> -> vector<4x1152xf32>
    %44 = tpu.concatenate %40, %41, %42, %43 in 0 : vector<4x1152xf32>, vector<4x1152xf32>, vector<4x1152xf32>, vector<4x1152xf32> -> vector<16x1152xf32>
    %45 = arith.truncf %44 : vector<16x1152xf32> to vector<16x1152xbf16>
    %cst_11 = arith.constant dense<0.000000e+00> : vector<16x128xf32>
    %46 = tpu.matmul %45, %9, %cst_11 {dimension_numbers = #tpu.dot_dimension_numbers<[1], [0], [0], [1], [0, 0, 1, 1], [], []>} : vector<16x1152xbf16>, vector<1152x128xbf16>, vector<16x128xf32> -> vector<16x128xf32>
    %c0_12 = arith.constant 0 : index
    %c0_13 = arith.constant 0 : index
    %47 = vector.load %arg5[%c0_12, %c0_13] : memref<1x128xf32, #tpu.memory_space<vmem>>, vector<1x128xf32>
    %48 = vector.broadcast %47 : vector<1x128xf32> to vector<16x128xf32>
    %49 = arith.addf %46, %48 : vector<16x128xf32>
    %cst_14 = arith.constant 0.000000e+00 : f32
    %50 = vector.broadcast %cst_14 : f32 to vector<16x128xf32>
    %51 = arith.maximumf %49, %50 : vector<16x128xf32>
    %52 = arith.truncf %51 : vector<16x128xf32> to vector<16x128xbf16>
    %c0_15 = arith.constant 0 : index
    %c0_16 = arith.constant 0 : index
    %53 = vector.load %arg6[%c0_15, %c0_16] : memref<128x256xbf16, #tpu.memory_space<vmem>>, vector<128x256xbf16>
    %cst_17 = arith.constant dense<0.000000e+00> : vector<16x256xf32>
    %54 = tpu.matmul %52, %53, %cst_17 {dimension_numbers = #tpu.dot_dimension_numbers<[1], [0], [0], [1], [0, 0, 1, 1], [], []>} : vector<16x128xbf16>, vector<128x256xbf16>, vector<16x256xf32> -> vector<16x256xf32>
    %c0_18 = arith.constant 0 : index
    %c0_19 = arith.constant 0 : index
    %55 = vector.load %arg7[%c0_18, %c0_19] : memref<1x256xf32, #tpu.memory_space<vmem>>, vector<1x256xf32>
    %56 = vector.broadcast %55 : vector<1x256xf32> to vector<16x256xf32>
    %57 = arith.addf %54, %56 : vector<16x256xf32>
    %cst_20 = arith.constant 0.000000e+00 : f32
    %58 = vector.broadcast %cst_20 : f32 to vector<16x256xf32>
    %59 = arith.maximumf %57, %58 : vector<16x256xf32>
    %c0_21 = arith.constant 0 : index
    %c0_22 = arith.constant 0 : index
    %60 = vector.load %arg8[%c0_21, %c0_22] : memref<1x256xf32, #tpu.memory_space<vmem>>, vector<1x256xf32>
    %61 = vector.broadcast %60 : vector<1x256xf32> to vector<16x256xf32>
    %62 = arith.mulf %59, %61 : vector<16x256xf32>
    %c0_23 = arith.constant 0 : index
    %c0_24 = arith.constant 0 : index
    %63 = vector.load %arg9[%c0_23, %c0_24] : memref<1x256xf32, #tpu.memory_space<vmem>>, vector<1x256xf32>
    %64 = vector.broadcast %63 : vector<1x256xf32> to vector<16x256xf32>
    %65 = arith.addf %62, %64 : vector<16x256xf32>
    %66 = vector.extract_strided_slice %65 {offsets = [0, 0], sizes = [4, 256], strides = [1, 1]} : vector<16x256xf32> to vector<4x256xf32>
    %67 = vector.extract_strided_slice %65 {offsets = [4, 0], sizes = [4, 256], strides = [1, 1]} : vector<16x256xf32> to vector<4x256xf32>
    %68 = vector.extract_strided_slice %65 {offsets = [8, 0], sizes = [4, 256], strides = [1, 1]} : vector<16x256xf32> to vector<4x256xf32>
    %69 = vector.extract_strided_slice %65 {offsets = [12, 0], sizes = [4, 256], strides = [1, 1]} : vector<16x256xf32> to vector<4x256xf32>
    %70 = arith.maximumf %66, %67 : vector<4x256xf32>
    %71 = vector.extract_strided_slice %70 {offsets = [0, 0], sizes = [2, 256], strides = [1, 1]} : vector<4x256xf32> to vector<2x256xf32>
    %cst_25 = arith.constant dense<0xFF800000> : vector<256xf32>
    %72 = vector.multi_reduction <maximumf>, %71, %cst_25 [0] : vector<2x256xf32> to vector<256xf32>
    %73 = vector.shape_cast %72 : vector<256xf32> to vector<1x256xf32>
    %74 = vector.extract_strided_slice %70 {offsets = [1, 0], sizes = [3, 256], strides = [1, 1]} : vector<4x256xf32> to vector<3x256xf32>
    %cst_26 = arith.constant dense<0xFF800000> : vector<256xf32>
    %75 = vector.multi_reduction <maximumf>, %74, %cst_26 [0] : vector<3x256xf32> to vector<256xf32>
    %76 = vector.shape_cast %75 : vector<256xf32> to vector<1x256xf32>
    %77 = tpu.concatenate %73, %76 in 0 : vector<1x256xf32>, vector<1x256xf32> -> vector<2x256xf32>
    %78 = arith.maximumf %67, %68 : vector<4x256xf32>
    %79 = arith.maximumf %78, %69 : vector<4x256xf32>
    %80 = vector.extract_strided_slice %79 {offsets = [0, 0], sizes = [2, 256], strides = [1, 1]} : vector<4x256xf32> to vector<2x256xf32>
    %cst_27 = arith.constant dense<0xFF800000> : vector<256xf32>
    %81 = vector.multi_reduction <maximumf>, %80, %cst_27 [0] : vector<2x256xf32> to vector<256xf32>
    %82 = vector.shape_cast %81 : vector<256xf32> to vector<1x256xf32>
    %83 = vector.extract_strided_slice %79 {offsets = [1, 0], sizes = [3, 256], strides = [1, 1]} : vector<4x256xf32> to vector<3x256xf32>
    %cst_28 = arith.constant dense<0xFF800000> : vector<256xf32>
    %84 = vector.multi_reduction <maximumf>, %83, %cst_28 [0] : vector<3x256xf32> to vector<256xf32>
    %85 = vector.shape_cast %84 : vector<256xf32> to vector<1x256xf32>
    %86 = tpu.concatenate %82, %85 in 0 : vector<1x256xf32>, vector<1x256xf32> -> vector<2x256xf32>
    %87 = tpu.concatenate %77, %86 in 0 : vector<2x256xf32>, vector<2x256xf32> -> vector<4x256xf32>
    %88 = arith.truncf %87 : vector<4x256xf32> to vector<4x256xbf16>
    %c0_29 = arith.constant 0 : index
    %c0_30 = arith.constant 0 : index
    %c0_31 = arith.constant 0 : index
    %89 = vector.load %arg10[%c0_29, %c0_30, %c0_31] : memref<1x4x256xbf16, #tpu.memory_space<vmem>>, vector<1x4x256xbf16>
    %90 = vector.shape_cast %89 : vector<1x4x256xbf16> to vector<4x256xbf16>
    %91 = vector.shape_cast %88 : vector<4x256xbf16> to vector<1x4x256xbf16>
    tpu.vector_store %arg10[%c0_29, %c0_30, %c0_31], %91 {strides = array<i32>} : memref<1x4x256xbf16, #tpu.memory_space<vmem>>, vector<1x4x256xbf16>,
    return
  }
  func.func @transform_0(%arg0: i32) -> (i32, i32, i32) {
    %c0_i32 = arith.constant 0 : i32
    %c0_i32_0 = arith.constant 0 : i32
    %c0_i32_1 = arith.constant 0 : i32
    return %arg0, %c0_i32, %c0_i32_0 : i32, i32, i32
  }
  func.func @transform_1(%arg0: i32) -> (i32, i32) {
    %c0_i32 = arith.constant 0 : i32
    %c0_i32_0 = arith.constant 0 : i32
    %c0_i32_1 = arith.constant 0 : i32
    return %c0_i32, %c0_i32_0 : i32, i32
  }
  func.func @transform_2(%arg0: i32) -> (i32, i32) {
    %c0_i32 = arith.constant 0 : i32
    %c0_i32_0 = arith.constant 0 : i32
    %c0_i32_1 = arith.constant 0 : i32
    return %c0_i32, %c0_i32_0 : i32, i32
  }
  func.func @transform_3(%arg0: i32) -> (i32, i32) {
    %c0_i32 = arith.constant 0 : i32
    %c0_i32_0 = arith.constant 0 : i32
    %c0_i32_1 = arith.constant 0 : i32
    return %c0_i32, %c0_i32_0 : i32, i32
  }
  func.func @transform_4(%arg0: i32) -> (i32, i32) {
    %c0_i32 = arith.constant 0 : i32
    %c0_i32_0 = arith.constant 0 : i32
    %c0_i32_1 = arith.constant 0 : i32
    return %c0_i32, %c0_i32_0 : i32, i32
  }
  func.func @transform_5(%arg0: i32) -> (i32, i32) {
    %c0_i32 = arith.constant 0 : i32
    %c0_i32_0 = arith.constant 0 : i32
    %c0_i32_1 = arith.constant 0 : i32
    return %c0_i32, %c0_i32_0 : i32, i32
  }
  func.func @transform_6(%arg0: i32) -> (i32, i32) {
    %c0_i32 = arith.constant 0 : i32
    %c0_i32_0 = arith.constant 0 : i32
    %c0_i32_1 = arith.constant 0 : i32
    return %c0_i32, %c0_i32_0 : i32, i32
  }
  func.func @transform_7(%arg0: i32) -> (i32, i32) {
    %c0_i32 = arith.constant 0 : i32
    %c0_i32_0 = arith.constant 0 : i32
    %c0_i32_1 = arith.constant 0 : i32
    return %c0_i32, %c0_i32_0 : i32, i32
  }
  func.func @transform_8(%arg0: i32) -> (i32, i32) {
    %c0_i32 = arith.constant 0 : i32
    %c0_i32_0 = arith.constant 0 : i32
    %c0_i32_1 = arith.constant 0 : i32
    return %c0_i32, %c0_i32_0 : i32, i32
  }
  func.func @transform_9(%arg0: i32) -> (i32, i32, i32) {
    %c0_i32 = arith.constant 0 : i32
    %c0_i32_0 = arith.constant 0 : i32
    %c0_i32_1 = arith.constant 0 : i32
    return %arg0, %c0_i32, %c0_i32_0 : i32, i32, i32
  }
}

module attributes {stable_mosaic.version = 11 : i64} {
  func.func @_stage3_kernel(%arg0: i32, %arg1: memref<1x4x256xbf16, #tpu.memory_space<vmem>>, %arg2: memref<256x128xbf16, #tpu.memory_space<vmem>>, %arg3: memref<1x128xf32, #tpu.memory_space<vmem>>, %arg4: memref<1152x128xbf16, #tpu.memory_space<vmem>>, %arg5: memref<1x128xf32, #tpu.memory_space<vmem>>, %arg6: memref<128x512xbf16, #tpu.memory_space<vmem>>, %arg7: memref<1x512xf32, #tpu.memory_space<vmem>>, %arg8: memref<1x512xf32, #tpu.memory_space<vmem>>, %arg9: memref<1x512xf32, #tpu.memory_space<vmem>>, %arg10: memref<512x128xbf16, #tpu.memory_space<vmem>>, %arg11: memref<1x128xf32, #tpu.memory_space<vmem>>, %arg12: memref<1x1x128xf32, #tpu.memory_space<vmem>>) attributes {dimension_semantics = [#tpu.dimension_semantics<parallel>], iteration_bounds = array<i64: 2>, scalar_prefetch = 0 : i64, scratch_operands = 0 : i64, tpu.core_type = #tpu.core_type<tc>, window_params = [{transform_indices = @transform_0, window_bounds = array<i64: 1, 4, 256>}, {pipeline_mode = #tpu.pipeline_mode<synchronous>, transform_indices = @transform_1, window_bounds = array<i64: 256, 128>}, {pipeline_mode = #tpu.pipeline_mode<synchronous>, transform_indices = @transform_2, window_bounds = array<i64: 1, 128>}, {pipeline_mode = #tpu.pipeline_mode<synchronous>, transform_indices = @transform_3, window_bounds = array<i64: 1152, 128>}, {pipeline_mode = #tpu.pipeline_mode<synchronous>, transform_indices = @transform_4, window_bounds = array<i64: 1, 128>}, {pipeline_mode = #tpu.pipeline_mode<synchronous>, transform_indices = @transform_5, window_bounds = array<i64: 128, 512>}, {pipeline_mode = #tpu.pipeline_mode<synchronous>, transform_indices = @transform_6, window_bounds = array<i64: 1, 512>}, {pipeline_mode = #tpu.pipeline_mode<synchronous>, transform_indices = @transform_7, window_bounds = array<i64: 1, 512>}, {pipeline_mode = #tpu.pipeline_mode<synchronous>, transform_indices = @transform_8, window_bounds = array<i64: 1, 512>}, {pipeline_mode = #tpu.pipeline_mode<synchronous>, transform_indices = @transform_9, window_bounds = array<i64: 512, 128>}, {pipeline_mode = #tpu.pipeline_mode<synchronous>, transform_indices = @transform_10, window_bounds = array<i64: 1, 128>}, {transform_indices = @transform_11, window_bounds = array<i64: 1, 1, 128>}]} {
    %c0 = arith.constant 0 : index
    %c0_0 = arith.constant 0 : index
    %c0_1 = arith.constant 0 : index
    %0 = vector.load %arg1[%c0, %c0_0, %c0_1] : memref<1x4x256xbf16, #tpu.memory_space<vmem>>, vector<1x4x256xbf16>
    %1 = vector.shape_cast %0 : vector<1x4x256xbf16> to vector<4x256xbf16>
    %c0_2 = arith.constant 0 : index
    %c0_3 = arith.constant 0 : index
    %2 = vector.load %arg2[%c0_2, %c0_3] : memref<256x128xbf16, #tpu.memory_space<vmem>>, vector<256x128xbf16>
    %cst = arith.constant dense<0.000000e+00> : vector<4x128xf32>
    %3 = tpu.matmul %1, %2, %cst {dimension_numbers = #tpu.dot_dimension_numbers<[1], [0], [0], [1], [0, 0, 1, 1], [], []>} : vector<4x256xbf16>, vector<256x128xbf16>, vector<4x128xf32> -> vector<4x128xf32>
    %c0_4 = arith.constant 0 : index
    %c0_5 = arith.constant 0 : index
    %4 = vector.load %arg3[%c0_4, %c0_5] : memref<1x128xf32, #tpu.memory_space<vmem>>, vector<1x128xf32>
    %5 = vector.broadcast %4 : vector<1x128xf32> to vector<4x128xf32>
    %6 = arith.addf %3, %5 : vector<4x128xf32>
    %cst_6 = arith.constant 0.000000e+00 : f32
    %7 = vector.broadcast %cst_6 : f32 to vector<4x128xf32>
    %8 = arith.maximumf %6, %7 : vector<4x128xf32>
    %c0_7 = arith.constant 0 : index
    %c0_8 = arith.constant 0 : index
    %9 = vector.load %arg4[%c0_7, %c0_8] : memref<1152x128xbf16, #tpu.memory_space<vmem>>, vector<1152x128xbf16>
    %10 = vector.extract_strided_slice %8 {offsets = [0, 0], sizes = [2, 128], strides = [1, 1]} : vector<4x128xf32> to vector<2x128xf32>
    %11 = vector.extract_strided_slice %8 {offsets = [2, 0], sizes = [2, 128], strides = [1, 1]} : vector<4x128xf32> to vector<2x128xf32>
    %cst_9 = arith.constant 0.000000e+00 : f32
    %12 = vector.broadcast %cst_9 : f32 to vector<2x128xf32>
    %cst_10 = arith.constant 0.000000e+00 : f32
    %13 = vector.broadcast %cst_10 : f32 to vector<1x128xf32>
    %14 = vector.extract_strided_slice %12 {offsets = [0, 0], sizes = [1, 128], strides = [1, 1]} : vector<2x128xf32> to vector<1x128xf32>
    %15 = tpu.concatenate %13, %14 in 0 : vector<1x128xf32>, vector<1x128xf32> -> vector<2x128xf32>
    %16 = vector.extract_strided_slice %12 {offsets = [1, 0], sizes = [1, 128], strides = [1, 1]} : vector<2x128xf32> to vector<1x128xf32>
    %17 = tpu.concatenate %16, %13 in 0 : vector<1x128xf32>, vector<1x128xf32> -> vector<2x128xf32>
    %18 = vector.extract_strided_slice %10 {offsets = [0, 0], sizes = [1, 128], strides = [1, 1]} : vector<2x128xf32> to vector<1x128xf32>
    %19 = tpu.concatenate %13, %18 in 0 : vector<1x128xf32>, vector<1x128xf32> -> vector<2x128xf32>
    %20 = vector.extract_strided_slice %10 {offsets = [1, 0], sizes = [1, 128], strides = [1, 1]} : vector<2x128xf32> to vector<1x128xf32>
    %21 = tpu.concatenate %20, %13 in 0 : vector<1x128xf32>, vector<1x128xf32> -> vector<2x128xf32>
    %22 = vector.extract_strided_slice %11 {offsets = [0, 0], sizes = [1, 128], strides = [1, 1]} : vector<2x128xf32> to vector<1x128xf32>
    %23 = tpu.concatenate %13, %22 in 0 : vector<1x128xf32>, vector<1x128xf32> -> vector<2x128xf32>
    %24 = vector.extract_strided_slice %11 {offsets = [1, 0], sizes = [1, 128], strides = [1, 1]} : vector<2x128xf32> to vector<1x128xf32>
    %25 = tpu.concatenate %24, %13 in 0 : vector<1x128xf32>, vector<1x128xf32> -> vector<2x128xf32>
    %26 = vector.extract_strided_slice %12 {offsets = [0, 0], sizes = [1, 128], strides = [1, 1]} : vector<2x128xf32> to vector<1x128xf32>
    %27 = tpu.concatenate %13, %26 in 0 : vector<1x128xf32>, vector<1x128xf32> -> vector<2x128xf32>
    %28 = vector.extract_strided_slice %12 {offsets = [1, 0], sizes = [1, 128], strides = [1, 1]} : vector<2x128xf32> to vector<1x128xf32>
    %29 = tpu.concatenate %28, %13 in 0 : vector<1x128xf32>, vector<1x128xf32> -> vector<2x128xf32>
    %30 = tpu.concatenate %15, %12, %17, %19, %10, %21, %23, %11, %25 in 1 : vector<2x128xf32>, vector<2x128xf32>, vector<2x128xf32>, vector<2x128xf32>, vector<2x128xf32>, vector<2x128xf32>, vector<2x128xf32>, vector<2x128xf32>, vector<2x128xf32> -> vector<2x1152xf32>
    %31 = tpu.concatenate %19, %10, %21, %23, %11, %25, %27, %12, %29 in 1 : vector<2x128xf32>, vector<2x128xf32>, vector<2x128xf32>, vector<2x128xf32>, vector<2x128xf32>, vector<2x128xf32>, vector<2x128xf32>, vector<2x128xf32>, vector<2x128xf32> -> vector<2x1152xf32>
    %32 = tpu.concatenate %30, %31 in 0 : vector<2x1152xf32>, vector<2x1152xf32> -> vector<4x1152xf32>
    %33 = arith.truncf %32 : vector<4x1152xf32> to vector<4x1152xbf16>
    %cst_11 = arith.constant dense<0.000000e+00> : vector<4x128xf32>
    %34 = tpu.matmul %33, %9, %cst_11 {dimension_numbers = #tpu.dot_dimension_numbers<[1], [0], [0], [1], [0, 0, 1, 1], [], []>} : vector<4x1152xbf16>, vector<1152x128xbf16>, vector<4x128xf32> -> vector<4x128xf32>
    %c0_12 = arith.constant 0 : index
    %c0_13 = arith.constant 0 : index
    %35 = vector.load %arg5[%c0_12, %c0_13] : memref<1x128xf32, #tpu.memory_space<vmem>>, vector<1x128xf32>
    %36 = vector.broadcast %35 : vector<1x128xf32> to vector<4x128xf32>
    %37 = arith.addf %34, %36 : vector<4x128xf32>
    %cst_14 = arith.constant 0.000000e+00 : f32
    %38 = vector.broadcast %cst_14 : f32 to vector<4x128xf32>
    %39 = arith.maximumf %37, %38 : vector<4x128xf32>
    %40 = arith.truncf %39 : vector<4x128xf32> to vector<4x128xbf16>
    %c0_15 = arith.constant 0 : index
    %c0_16 = arith.constant 0 : index
    %41 = vector.load %arg6[%c0_15, %c0_16] : memref<128x512xbf16, #tpu.memory_space<vmem>>, vector<128x512xbf16>
    %cst_17 = arith.constant dense<0.000000e+00> : vector<4x512xf32>
    %42 = tpu.matmul %40, %41, %cst_17 {dimension_numbers = #tpu.dot_dimension_numbers<[1], [0], [0], [1], [0, 0, 1, 1], [], []>} : vector<4x128xbf16>, vector<128x512xbf16>, vector<4x512xf32> -> vector<4x512xf32>
    %c0_18 = arith.constant 0 : index
    %c0_19 = arith.constant 0 : index
    %43 = vector.load %arg7[%c0_18, %c0_19] : memref<1x512xf32, #tpu.memory_space<vmem>>, vector<1x512xf32>
    %44 = vector.broadcast %43 : vector<1x512xf32> to vector<4x512xf32>
    %45 = arith.addf %42, %44 : vector<4x512xf32>
    %cst_20 = arith.constant 0.000000e+00 : f32
    %46 = vector.broadcast %cst_20 : f32 to vector<4x512xf32>
    %47 = arith.maximumf %45, %46 : vector<4x512xf32>
    %c0_21 = arith.constant 0 : index
    %c0_22 = arith.constant 0 : index
    %48 = vector.load %arg8[%c0_21, %c0_22] : memref<1x512xf32, #tpu.memory_space<vmem>>, vector<1x512xf32>
    %49 = vector.broadcast %48 : vector<1x512xf32> to vector<4x512xf32>
    %50 = arith.mulf %47, %49 : vector<4x512xf32>
    %c0_23 = arith.constant 0 : index
    %c0_24 = arith.constant 0 : index
    %51 = vector.load %arg9[%c0_23, %c0_24] : memref<1x512xf32, #tpu.memory_space<vmem>>, vector<1x512xf32>
    %52 = vector.broadcast %51 : vector<1x512xf32> to vector<4x512xf32>
    %53 = arith.addf %50, %52 : vector<4x512xf32>
    %cst_25 = arith.constant dense<0.000000e+00> : vector<512xf32>
    %54 = vector.multi_reduction <add>, %53, %cst_25 [0] : vector<4x512xf32> to vector<512xf32>
    %55 = vector.shape_cast %54 : vector<512xf32> to vector<1x512xf32>
    %cst_26 = arith.constant 2.500000e-01 : f32
    %56 = vector.broadcast %cst_26 : f32 to vector<1x512xf32>
    %57 = arith.mulf %55, %56 : vector<1x512xf32>
    %58 = arith.truncf %57 : vector<1x512xf32> to vector<1x512xbf16>
    %c0_27 = arith.constant 0 : index
    %c0_28 = arith.constant 0 : index
    %59 = vector.load %arg10[%c0_27, %c0_28] : memref<512x128xbf16, #tpu.memory_space<vmem>>, vector<512x128xbf16>
    %cst_29 = arith.constant dense<0.000000e+00> : vector<1x128xf32>
    %60 = tpu.matmul %58, %59, %cst_29 {dimension_numbers = #tpu.dot_dimension_numbers<[1], [0], [0], [1], [0, 0, 1, 1], [], []>} : vector<1x512xbf16>, vector<512x128xbf16>, vector<1x128xf32> -> vector<1x128xf32>
    %c0_30 = arith.constant 0 : index
    %c0_31 = arith.constant 0 : index
    %61 = vector.load %arg11[%c0_30, %c0_31] : memref<1x128xf32, #tpu.memory_space<vmem>>, vector<1x128xf32>
    %62 = arith.addf %60, %61 : vector<1x128xf32>
    %c0_32 = arith.constant 0 : index
    %c0_33 = arith.constant 0 : index
    %c0_34 = arith.constant 0 : index
    %63 = vector.load %arg12[%c0_32, %c0_33, %c0_34] : memref<1x1x128xf32, #tpu.memory_space<vmem>>, vector<1x1x128xf32>
    %64 = vector.shape_cast %63 : vector<1x1x128xf32> to vector<1x128xf32>
    %65 = vector.shape_cast %62 : vector<1x128xf32> to vector<1x1x128xf32>
    tpu.vector_store %arg12[%c0_32, %c0_33, %c0_34], %65 {strides = array<i32>} : memref<1x1x128xf32, #tpu.memory_space<vmem>>, vector<1x1x128xf32>,
    return
  }
  func.func @transform_0(%arg0: i32) -> (i32, i32, i32) {
    %c0_i32 = arith.constant 0 : i32
    %c0_i32_0 = arith.constant 0 : i32
    %c0_i32_1 = arith.constant 0 : i32
    return %arg0, %c0_i32, %c0_i32_0 : i32, i32, i32
  }
  func.func @transform_1(%arg0: i32) -> (i32, i32) {
    %c0_i32 = arith.constant 0 : i32
    %c0_i32_0 = arith.constant 0 : i32
    %c0_i32_1 = arith.constant 0 : i32
    return %c0_i32, %c0_i32_0 : i32, i32
  }
  func.func @transform_2(%arg0: i32) -> (i32, i32) {
    %c0_i32 = arith.constant 0 : i32
    %c0_i32_0 = arith.constant 0 : i32
    %c0_i32_1 = arith.constant 0 : i32
    return %c0_i32, %c0_i32_0 : i32, i32
  }
  func.func @transform_3(%arg0: i32) -> (i32, i32) {
    %c0_i32 = arith.constant 0 : i32
    %c0_i32_0 = arith.constant 0 : i32
    %c0_i32_1 = arith.constant 0 : i32
    return %c0_i32, %c0_i32_0 : i32, i32
  }
  func.func @transform_4(%arg0: i32) -> (i32, i32) {
    %c0_i32 = arith.constant 0 : i32
    %c0_i32_0 = arith.constant 0 : i32
    %c0_i32_1 = arith.constant 0 : i32
    return %c0_i32, %c0_i32_0 : i32, i32
  }
  func.func @transform_5(%arg0: i32) -> (i32, i32) {
    %c0_i32 = arith.constant 0 : i32
    %c0_i32_0 = arith.constant 0 : i32
    %c0_i32_1 = arith.constant 0 : i32
    return %c0_i32, %c0_i32_0 : i32, i32
  }
  func.func @transform_6(%arg0: i32) -> (i32, i32) {
    %c0_i32 = arith.constant 0 : i32
    %c0_i32_0 = arith.constant 0 : i32
    %c0_i32_1 = arith.constant 0 : i32
    return %c0_i32, %c0_i32_0 : i32, i32
  }
  func.func @transform_7(%arg0: i32) -> (i32, i32) {
    %c0_i32 = arith.constant 0 : i32
    %c0_i32_0 = arith.constant 0 : i32
    %c0_i32_1 = arith.constant 0 : i32
    return %c0_i32, %c0_i32_0 : i32, i32
  }
  func.func @transform_8(%arg0: i32) -> (i32, i32) {
    %c0_i32 = arith.constant 0 : i32
    %c0_i32_0 = arith.constant 0 : i32
    %c0_i32_1 = arith.constant 0 : i32
    return %c0_i32, %c0_i32_0 : i32, i32
  }
  func.func @transform_9(%arg0: i32) -> (i32, i32) {
    %c0_i32 = arith.constant 0 : i32
    %c0_i32_0 = arith.constant 0 : i32
    %c0_i32_1 = arith.constant 0 : i32
    return %c0_i32, %c0_i32_0 : i32, i32
  }
  func.func @transform_10(%arg0: i32) -> (i32, i32) {
    %c0_i32 = arith.constant 0 : i32
    %c0_i32_0 = arith.constant 0 : i32
    %c0_i32_1 = arith.constant 0 : i32
    return %c0_i32, %c0_i32_0 : i32, i32
  }
  func.func @transform_11(%arg0: i32) -> (i32, i32, i32) {
    %c0_i32 = arith.constant 0 : i32
    %c0_i32_0 = arith.constant 0 : i32
    %c0_i32_1 = arith.constant 0 : i32
    return %arg0, %c0_i32, %c0_i32_0 : i32, i32, i32
  }
}

</mosaic_0001>

<bundles_post_ra>
// kernel: betternet_forward.3
= control target key start
LH: loop header
LB: loop body
LE: loop exit
PB: predicated region body
PF: predicated region fallthrough
CT: control target
= control target key end

     0   :  { %s902_s18 = smov 0   ;;  %s1026_s0 = inlined_call_operand.vmem [shape: bf16[2,64,256], index: 0, kind: input, shape index: {}]   ;;  %s1027_s1 = inlined_call_operand.vmem [shape: bf16[256,128], index: 1, kind: input, shape index: {}]   ;;  %s1028_s2 = inlined_call_operand.vmem [shape: f32[1,128], index: 2, kind: input, shape index: {}]   ;;  %s1029_s3 = inlined_call_operand.vmem [shape: f32[1,128], index: 3, kind: input, shape index: {}]   ;;  %s1030_s4 = inlined_call_operand.vmem [shape: f32[1,128], index: 4, kind: input, shape index: {}]   ;;  %s1031_s5 = inlined_call_operand.vmem [shape: bf16[2,16,128], index: 5, kind: output, shape index: {}]  }
   0x1 LB: > { %s723_s19 = sadd.s32 4294967295, %s870_s18   ;;  %p727_p0 = scmp.ge.s32.totalorder %s870_s18, 1  ;;  %s870_s18 = sphi %s902_s18, %s15_s18  }
   0x2   : > { %p187_p1 = scmp.lt.s32.totalorder %s870_s18, 3 }
   0x4   : > { %p188_p2 = pnand %p727_p0, %p187_p1 }
   0x5   : > { %v836_v0 = vld [vmem:[%s1027_s1 + $0x40] sm:$0xff] (!%p188_p2)   ;;  %v838_v2 = vld [vmem:[%s1027_s1 + $0x48] sm:$0xff] (!%p188_p2)   ;;  %p215_p3 = scmp.lt.s32.totalorder (!%p188_p2), %s723_s19, 1  ;;  %v840_v4 = vld [vmem:[%s1027_s1 + $0x50] sm:$0xff] (!%p188_p2)   ;;  %vm513_vm0 = vcmask (!%p188_p2), 1041408   ;;  %vm521_vm1 = vcmask (!%p188_p2), 1043457  }
   0x6   : > { %191 = sbr.rel (%p188_p2) target bundleno = 312 (0x138), region = 40  ;;  %v837_v1 = vld [vmem:[%s1027_s1] sm:$0xff] (!%p188_p2)   ;;  %772 = vmatprep.subr.bf16.mxu0 (!%p188_p2), %v836_v0  ;;  %812 = vmatprep.subr.bf16.mxu1 (!%p188_p2), %v836_v0  ;;  %v839_v3 = vld [vmem:[%s1027_s1 + $0x8] sm:$0xff] (!%p188_p2)   ;;  %v841_v5 = vld [vmem:[%s1027_s1 + $0x10] sm:$0xff] (!%p188_p2)   ;;  %vm529_vm2 = vcmask (!%p188_p2), 1045507   ;;  %vm537_vm3 = vcmask (!%p188_p2), 1047557  }
   0x7   : > { %773 = vmatpush3.bf16.msra.mxu0 (!%p188_p2), %v837_v1  ;;  %820 = vmatpush3.bf16.msra.mxu1 (!%p188_p2), %v837_v1  ;;  %v842_v6 = vld [vmem:[%s1027_s1 + $0x58] sm:$0xff] (!%p188_p2)   ;;  %v844_v8 = vld [vmem:[%s1027_s1 + $0x60] sm:$0xff] (!%p188_p2)   ;;  %v846_v10 = vld [vmem:[%s1027_s1 + $0x68] sm:$0xff] (!%p188_p2)   ;;  %vm545_vm4 = vcmask (!%p188_p2), 1040384   ;;  %vm548_vm5 = vcmask (!%p188_p2), 1042432   ;;  %vm655_vm6 = vcmask (!%p188_p2), 1043456  }
   0x8   : > { %774 = vmatprep.subr.bf16.mxu0 (!%p188_p2), %v838_v2  ;;  %813 = vmatprep.subr.bf16.mxu1 (!%p188_p2), %v838_v2  ;;  %v843_v7 = vld [vmem:[%s1027_s1 + $0x18] sm:$0xff] (!%p188_p2)   ;;  %v845_v9 = vld [vmem:[%s1027_s1 + $0x20] sm:$0xff] (!%p188_p2)   ;;  %v847_v13 = vld [vmem:[%s1027_s1 + $0x28] sm:$0xff] (!%p188_p2)  }
   0x9   : > { %v848_v14 = vld [vmem:[%s1027_s1 + $0x70] sm:$0xff] (!%p188_p2)   ;;  %v850_v16 = vld [vmem:[%s1027_s1 + $0x78] sm:$0xff] (!%p188_p2)   ;;  %v732_v26 = vld [vmem:[%s1028_s2] ss:$0 sm:$0xff] (!%p188_p2) }
   0xa   : > { %v849_v15 = vld [vmem:[%s1027_s1 + $0x30] sm:$0xff] (!%p188_p2)   ;;  %v851_v17 = vld [vmem:[%s1027_s1 + $0x38] sm:$0xff] (!%p188_p2)   ;;  %v757_v39 = vld [vmem:[%s1029_s3] ss:$0 sm:$0xff] (!%p188_p2) }
   0xb   : > { %775 = vmatpush3.bf16.msra.mxu0 (!%p188_p2), %v839_v3  ;;  %821 = vmatpush3.bf16.msra.mxu1 (!%p188_p2), %v839_v3  ;;  %v758_v49 = vld [vmem:[%s1030_s4] ss:$0 sm:$0xff] (!%p188_p2) }
   0xc   : > { %776 = vmatprep.subr.bf16.mxu0 (!%p188_p2), %v840_v4  ;;  %814 = vmatprep.subr.bf16.mxu1 (!%p188_p2), %v840_v4 }
   0xd   : > { %s1033_s19 = smov (!%p215_p3, %s723_s19), 1 }
   0xe   : > { %s763_s11 = sshll.u32 %s1033_s19, 6  ;;  %s764_s14 = sshll.u32 %s1033_s19, 3 }
   0xf   : > { %777 = vmatpush3.bf16.msra.mxu0 %v841_v5  ;;  %822 = vmatpush3.bf16.msra.mxu1 %v841_v5  ;;  %s943_s16 = scalar_lea.vmem %s1026_s0, %s763_s11  ;;  %s224_s17 = scalar_lea.vmem %s1031_s5, %s764_s14 }
  0x10   : > { %778 = vmatprep.subr.bf16.mxu0 %v842_v6  ;;  %815 = vmatprep.subr.bf16.mxu1 %v842_v6  ;;  %v854_v11 = vld [vmem:[%s943_s16 + $0x4] ss:$8 sps:$4 sm:$0xff]   ;;  %v852_v18 = vld [vmem:[%s943_s16] ss:$8 sps:$4 sm:$0xff]   ;;  %v858_v20 = vld [vmem:[%s943_s16 + $0x14] ss:$8 sps:$4 sm:$0xff]  }
  0x11   : > { %v857_v12 = vld [vmem:[%s943_s16 + $0x24] ss:$8 sps:$4 sm:$0xff]   ;;  %441 = vmatprep.mubr.bf16.mxu0 %v854_v11  ;;  %v855_v19 = vld [vmem:[%s943_s16 + $0x20] ss:$8 sps:$4 sm:$0xff]   ;;  %v860_v21 = vld [vmem:[%s943_s16 + $0x34] ss:$8 sps:$4 sm:$0xff]  }
  0x12   : > { %457 = vmatprep.mubr.bf16.mxu1 %v857_v12  ;;  %v862_v22 = vld [vmem:[%s943_s16 + $0x10] ss:$8 sps:$4 sm:$0xff]  }
  0x13   : > { %779 = vmatpush3.bf16.msra.mxu0 %v843_v7  ;;  %823 = vmatpush3.bf16.msra.mxu1 %v843_v7  ;;  %v863_v23 = vld [vmem:[%s943_s16 + $0x30] ss:$8 sps:$4 sm:$0xff]  }
  0x14   : > { %780 = vmatprep.subr.bf16.mxu0 %v844_v8  ;;  %816 = vmatprep.subr.bf16.mxu1 %v844_v8 }
  0x17   : > { %781 = vmatpush3.bf16.msra.mxu0 %v845_v9  ;;  %824 = vmatpush3.bf16.msra.mxu1 %v845_v9 }
  0x18   : > { %782 = vmatprep.subr.bf16.mxu0 %v846_v10  ;;  %817 = vmatprep.subr.bf16.mxu1 %v846_v10 }
  0x1b   : > { %783 = vmatpush3.bf16.msra.mxu0 %v847_v13  ;;  %825 = vmatpush3.bf16.msra.mxu1 %v847_v13 }
  0x1c   : > { %784 = vmatprep.subr.bf16.mxu0 %v848_v14  ;;  %818 = vmatprep.subr.bf16.mxu1 %v848_v14 }
  0x1f   : > { %785 = vmatpush3.bf16.msra.mxu0 %v849_v15  ;;  %826 = vmatpush3.bf16.msra.mxu1 %v849_v15 }
  0x20   : > { %786 = vmatprep.subr.bf16.mxu0 %v850_v16  ;;  %819 = vmatprep.subr.bf16.mxu1 %v850_v16 }
  0x23   : > { %787 = vmatpush3.bf16.msra.mxu0 %v851_v17  ;;  %827 = vmatpush3.bf16.msra.mxu1 %v851_v17 }
  0x26   : > { %442 = vmatmul.mubr.bf16.vlgmr.msra.gmra.mrb[0].mxu0 %v852_v18  ;;  %458 = vmatmul.mubr.bf16.vlgmr.msra.gmra.mrb[0].mxu1 %v855_v19 }
  0x27   : > { %449 = vmatprep.mubr.bf16.mxu0 %v858_v20  ;;  %465 = vmatprep.mubr.bf16.mxu1 %v860_v21 }
  0x2e   : > { %450 = vmatmul.mubr.bf16.gmra.mrb[4].mxu0 %v862_v22  ;;  %466 = vmatmul.mubr.bf16.gmra.mrb[4].mxu1 %v863_v23 }
  0xf9   : > { %v788_v24 = vpop.f32.mrb[0].mxu0  ;;  %v800_v25 = vpop.f32.mrb[0].mxu1 }
  0xfa   : > { %v789_v27 = vpop.f32.mrb[1].mxu0  ;;  %v801_v28 = vpop.f32.mrb[1].mxu1 }
  0xfb   : > { %v790_v29 = vadd.f32 %v789_v27, %v788_v24  ;;  %v802_v30 = vadd.f32 %v801_v28, %v800_v25  ;;  %v791_v31 = vpop.f32.mrb[2].mxu0  ;;  %v803_v32 = vpop.f32.mrb[2].mxu1 }
  0xfc   : > { %v792_v33 = vpop.f32.mrb[3].mxu0  ;;  %v804_v34 = vpop.f32.mrb[3].mxu1 }
  0xfd   : > { %v444_v35 = vadd.f32 %v790_v29, %v732_v26  ;;  %v460_v36 = vadd.f32 %v802_v30, %v732_v26  ;;  %v793_v37 = vadd.f32 %v792_v33, %v791_v31  ;;  %v805_v38 = vadd.f32 %v804_v34, %v803_v32 }
  0xff   : > { %v474_v40 = vmax.f32 %v444_v35, 0.0  ;;  %v447_v41 = vadd.f32 %v793_v37, %v732_v26  ;;  %v463_v42 = vadd.f32 %v805_v38, %v732_v26  ;;  %v478_v43 = vmax.f32 %v460_v36, 0.0 }
 0x101   : > { %v489_v44 = vmul.f32 %v757_v39, %v474_v40  ;;  %v475_v45 = vmax.f32 %v447_v41, 0.0  ;;  %v479_v46 = vmax.f32 %v463_v42, 0.0  ;;  %v794_v47 = vpop.f32.mrb[4].mxu0  ;;  %v806_v48 = vpop.f32.mrb[4].mxu1  ;;  %v493_v55 = vmul.f32 %v757_v39, %v478_v43 }
 0x102   : > { %v795_v50 = vpop.f32.mrb[5].mxu0  ;;  %v807_v51 = vpop.f32.mrb[5].mxu1 }
 0x103   : > { %v490_v52 = vmul.f32 %v757_v39, %v475_v45  ;;  %v797_v53 = vpop.f32.mrb[6].mxu0  ;;  %v809_v54 = vpop.f32.mrb[6].mxu1  ;;  %v494_v56 = vmul.f32 %v757_v39, %v479_v46  ;;  %v796_v57 = vadd.f32 %v795_v50, %v794_v47  ;;  %v808_v58 = vadd.f32 %v807_v51, %v806_v48 }
 0x104   : > { %v798_v59 = vpop.f32.mrb[7].mxu0  ;;  %v810_v60 = vpop.f32.mrb[7].mxu1  ;;  %v504_v61 = vadd.f32 %v758_v49, %v489_v44  ;;  %v508_v6 = vadd.f32 %v758_v49, %v493_v55 }
 0x105   : > { %v505_v62 = vadd.f32 %v758_v49, %v490_v52  ;;  %v799_v63 = vadd.f32 %v798_v59, %v797_v53  ;;  %v811_v0 = vadd.f32 %v810_v60, %v809_v54  ;;  %v452_v1 = vadd.f32 %v796_v57, %v732_v26 }
 0x106   : > { %v468_v2 = vadd.f32 %v808_v58, %v732_v26  ;;  %v509_v7 = vadd.f32 %v758_v49, %v494_v56 }
 0x107   : > { %v512_v3 = vmax.f32 %v504_v61, %v505_v62  ;;  %v455_v4 = vadd.f32 %v799_v63, %v732_v26  ;;  %v471_v5 = vadd.f32 %v811_v0, %v732_v26  ;;  %v476_v8 = vmax.f32 %v452_v1, 0.0 }
 0x108   : > { %v480_v9 = vmax.f32 %v468_v2, 0.0 }
 0x109   : > { %v514_v10 = vsel %vm513_vm0, %v512_v3, -inf  ;;  %v522_v11 = vsel %vm521_vm1, %v512_v3, -inf  ;;  %v530_v12 = vsel %vm529_vm2, %v512_v3, -inf  ;;  %v538_v13 = vsel %vm537_vm3, %v512_v3, -inf }
 0x10a   : > { %v515_v14 = vrot.slane %v514_v10, 4  ;;  %v523_v15 = vrot.slane %v522_v11, 4  ;;  %v531_v16 = vrot.slane %v530_v12, 4  ;;  %v539_v17 = vrot.slane %v538_v13, 4 }
 0x10b   : > { %v491_v18 = vmul.f32 %v757_v39, %v476_v8  ;;  %v495_v19 = vmul.f32 %v757_v39, %v480_v9  ;;  %v477_v20 = vmax.f32 %v455_v4, 0.0  ;;  %v481_v21 = vmax.f32 %v471_v5, 0.0 }
 0x10c   : > { %v516_v22 = vmax.f32 %v514_v10, %v515_v14  ;;  %v524_v23 = vmax.f32 %v522_v11, %v523_v15  ;;  %v532_v24 = vmax.f32 %v530_v12, %v531_v16  ;;  %v540_v25 = vmax.f32 %v538_v13, %v539_v17 }
 0x10d   : > { %v506_v26 = vadd.f32 %v758_v49, %v491_v18  ;;  %v510_v27 = vadd.f32 %v758_v49, %v495_v19  ;;  %v492_v28 = vmul.f32 %v757_v39, %v477_v20  ;;  %v496_v29 = vmul.f32 %v757_v39, %v481_v21 }
 0x10e   : > { %v517_v30 = vrot.slane %v516_v22, 2  ;;  %v525_v31 = vrot.slane %v524_v23, 2  ;;  %v533_v32 = vrot.slane %v532_v24, 2  ;;  %v541_v33 = vrot.slane %v540_v25, 2 }
 0x10f   : > { %v550_v34 = vmax.f32 %v505_v62, %v506_v26  ;;  %v616_v35 = vmax.f32 %v509_v7, %v510_v27  ;;  %v507_v36 = vadd.f32 %v758_v49, %v492_v28  ;;  %v511_v37 = vadd.f32 %v758_v49, %v496_v29 }
 0x110   : > { %v518_v38 = vmax.f32 %v516_v22, %v517_v30  ;;  %v526_v40 = vmax.f32 %v524_v23, %v525_v31  ;;  %v534_v41 = vmax.f32 %v532_v24, %v533_v32  ;;  %v542_v48 = vmax.f32 %v540_v25, %v541_v33 }
 0x111   : > { %v551_v42 = vmax.f32 %v550_v34, %v507_v36  ;;  %v583_v43 = vmax.f32 %v507_v36, %v508_v6  ;;  %v987_v44 = vmax.f32 %v616_v35, %v511_v37 }
 0x112   : > { %v519_v45 = vrot.slane %v518_v38, 1  ;;  %v527_v46 = vrot.slane %v526_v40, 1  ;;  %v535_v47 = vrot.slane %v534_v41, 1  ;;  %v543_v59 = vrot.slane %v542_v48, 1 }
 0x113   : > { %v552_v39 = vsel %vm513_vm0, %v551_v42, -inf  ;;  %v559_v50 = vsel %vm521_vm1, %v551_v42, -inf  ;;  %v566_v51 = vsel %vm529_vm2, %v551_v42, -inf  ;;  %v573_v52 = vsel %vm537_vm3, %v551_v42, -inf }
 0x114   : > { %v520_v49 = vmax.f32 %v518_v38, %v519_v45  ;;  %v528_v53 = vmax.f32 %v526_v40, %v527_v46  ;;  %v553_v54 = vrot.slane %v552_v39, 4  ;;  %v560_v55 = vrot.slane %v559_v50, 4 }
 0x115   : > { %v567_v56 = vrot.slane %v566_v51, 4  ;;  %v574_v57 = vrot.slane %v573_v52, 4  ;;  %v536_v58 = vmax.f32 %v534_v41, %v535_v47  ;;  %v584_v60 = vmax.f32 %v583_v43, %v509_v7 }
 0x116   : > { %v546_v61 = vsel %vm545_vm4, %v520_v49, %v528_v53  ;;  %v554_v62 = vmax.f32 %v552_v39, %v553_v54  ;;  %v561_v63 = vmax.f32 %v559_v50, %v560_v55  ;;  %v618_v4 = vsel %vm513_vm0, %v987_v44, -inf }
 0x117   : > { %v568_v0 = vmax.f32 %v566_v51, %v567_v56  ;;  %v575_v1 = vmax.f32 %v573_v52, %v574_v57  ;;  %v585_v2 = vsel %vm513_vm0, %v584_v60, -inf  ;;  %v592_v3 = vsel %vm521_vm1, %v584_v60, -inf }
 0x118   : > { %v555_v5 = vrot.slane %v554_v62, 2  ;;  %v562_v6 = vrot.slane %v561_v63, 2  ;;  %v586_v9 = vrot.slane %v585_v2, 4  ;;  %v593_v11 = vrot.slane %v592_v3, 4 }
 0x119   : > { %v569_v8 = vrot.slane %v568_v0, 2  ;;  %v576_v10 = vrot.slane %v575_v1, 2  ;;  %v599_v7 = vsel %vm529_vm2, %v584_v60, -inf  ;;  %v606_v12 = vsel %vm537_vm3, %v584_v60, -inf }
 0x11a   : > { %v556_v13 = vmax.f32 %v554_v62, %v555_v5  ;;  %v563_v14 = vmax.f32 %v561_v63, %v562_v6  ;;  %v587_v16 = vmax.f32 %v585_v2, %v586_v9  ;;  %v594_v18 = vmax.f32 %v592_v3, %v593_v11 }
 0x11b   : > { %v570_v15 = vmax.f32 %v568_v0, %v569_v8  ;;  %v577_v17 = vmax.f32 %v575_v1, %v576_v10  ;;  %v600_v19 = vrot.slane %v599_v7, 4  ;;  %v625_v20 = vsel %vm521_vm1, %v987_v44, -inf }
 0x11c   : > { %v557_v21 = vrot.slane %v556_v13, 1  ;;  %v564_v22 = vrot.slane %v563_v14, 1  ;;  %v607_v24 = vrot.slane %v606_v12, 4  ;;  %v588_v26 = vrot.slane %v587_v16, 2 }
 0x11d   : > { %v571_v23 = vrot.slane %v570_v15, 1  ;;  %v578_v25 = vrot.slane %v577_v17, 1  ;;  %v595_v27 = vrot.slane %v594_v18, 2  ;;  %v601_v28 = vmax.f32 %v599_v7, %v600_v19 }
 0x11e   : > { %v558_v29 = vmax.f32 %v556_v13, %v557_v21  ;;  %v565_v30 = vmax.f32 %v563_v14, %v564_v22  ;;  %v544_v32 = vmax.f32 %v542_v48, %v543_v59  ;;  %v547_v33 = vsel %vm513_vm0, %v546_v61, %v536_v58 }
 0x11f   : > { %v572_v31 = vmax.f32 %v570_v15, %v571_v23  ;;  %v602_v34 = vrot.slane %v601_v28, 2  ;;  %v579_v35 = vmax.f32 %v577_v17, %v578_v25  ;;  %v619_v37 = vrot.slane %v618_v4, 4 }
 0x120   : > { %v580_v36 = vsel %vm545_vm4, %v558_v29, %v565_v30  ;;  %v626_v38 = vrot.slane %v625_v20, 4  ;;  %v589_v41 = vmax.f32 %v587_v16, %v588_v26  ;;  %v596_v42 = vmax.f32 %v594_v18, %v595_v27 }
 0x121   : > { %v581_v40 = vsel %vm513_vm0, %v580_v36, %v572_v31  ;;  %v608_v43 = vmax.f32 %v606_v12, %v607_v24  ;;  %v620_v46 = vmax.f32 %v618_v4, %v619_v37  ;;  %v549_v48 = vsel %vm548_vm5, %v547_v33, %v544_v32 }
 0x122   : > { %v582_v45 = vsel %vm548_vm5, %v581_v40, %v579_v35  ;;  %v627_v47 = vmax.f32 %v625_v20, %v626_v38  ;;  %v603_v39 = vmax.f32 %v601_v28, %v602_v34  ;;  %v632_v49 = vsel %vm529_vm2, %v987_v44, -inf }
 0x123   : > { %v650_v50 = vrot.slane %v582_v45, 4  ;;  %v621_v51 = vrot.slane %v620_v46, 2  ;;  %v639_v53 = vsel %vm537_vm3, %v987_v44, -inf  ;;  %v590_v54 = vrot.slane %v589_v41, 1 }
 0x124   : > { %v628_v52 = vrot.slane %v627_v47, 2  ;;  %v597_v55 = vrot.slane %v596_v42, 1  ;;  %v609_v56 = vrot.slane %v608_v43, 2  ;;  %v633_v60 = vrot.slane %v632_v49, 4 }
 0x125   : > { %v656_v57 = vsel %vm655_vm6, %v549_v48, %v650_v50  ;;  %v622_v58 = vmax.f32 %v620_v46, %v621_v51  ;;  %v640_v61 = vrot.slane %v639_v53, 4  ;;  %v604_v62 = vrot.slane %v603_v39, 1 }
 0x126   : > { %v629_v59 = vmax.f32 %v627_v47, %v628_v52  ;;  %v634_v1 = vmax.f32 %v632_v49, %v633_v60  ;;  %v591_v2 = vmax.f32 %v589_v41, %v590_v54  ;;  %v598_v3 = vmax.f32 %v596_v42, %v597_v55 }
 0x127   : > { %v623_v63 = vrot.slane %v622_v58, 1  ;;  %v610_v4 = vmax.f32 %v608_v43, %v609_v56  ;;  %v641_v5 = vmax.f32 %v639_v53, %v640_v61  ;;  %v605_v10 = vmax.f32 %v603_v39, %v604_v62 }
 0x128   : > { %v630_v0 = vrot.slane %v629_v59, 1  ;;  %v635_v6 = vrot.slane %v634_v1, 2  ;;  %v613_v12 = vsel %vm545_vm4, %v591_v2, %v598_v3 }
 0x129   : > { %v624_v8 = vmax.f32 %v622_v58, %v623_v63  ;;  %v642_v9 = vrot.slane %v641_v5, 2  ;;  %v611_v7 = vrot.slane %v610_v4, 1  ;;  %v614_v17 = vsel %vm513_vm0, %v613_v12, %v605_v10 }
 0x12a   : > { %v631_v44 = vmax.f32 %v629_v59, %v630_v0  ;;  %v636_v11 = vmax.f32 %v634_v1, %v635_v6 }
 0x12b   : > { %v643_v13 = vmax.f32 %v641_v5, %v642_v9  ;;  %v612_v19 = vmax.f32 %v610_v4, %v611_v7 }
 0x12c   : > { %v637_v14 = vrot.slane %v636_v11, 1  ;;  %v646_v16 = vsel %vm545_vm4, %v624_v8, %v631_v44 }
 0x12d   : > { %v644_v15 = vrot.slane %v643_v13, 1  ;;  %v615_v22 = vsel %vm548_vm5, %v614_v17, %v612_v19 }
 0x12e   : > { %v638_v18 = vmax.f32 %v636_v11, %v637_v14 }
 0x12f   : > { %v645_v20 = vmax.f32 %v643_v13, %v644_v15 }
 0x130   : > { %v647_v21 = vsel %vm513_vm0, %v646_v16, %v638_v18 }
 0x131   : > { %v648_v23 = vsel %vm548_vm5, %v647_v21, %v645_v20 }
 0x132   : > { %v653_v24 = vrot.slane %v648_v23, 4 }
 0x134   : > { %v657_v25 = vsel %vm655_vm6, %v615_v22, %v653_v24 }
 0x135   : > { %v770_v26 = vpack.c.bf16 %v657_v25, %v656_v57 }
 0x137   : > { %771 = vst [vmem:[%s224_s17] sm:$0xff] %v770_v26  }
 0x138 PF: > { %s15_s18 = sadd.s32 1, %s870_s18  }
 0x139   : > { %p12_p4 = scmp.ge.s32.totalorder %s15_s18, 4  }
 0x13b   :  { %14 = sbr.rel (!%p12_p4) target bundleno = 1 (0x1), region = 70 }

// kernel: betternet_forward.4
= control target key start
LH: loop header
LB: loop body
LE: loop exit
PB: predicated region body
PF: predicated region fallthrough
CT: control target
= control target key end

     0   :  { %s2132_s30 = smov 0   ;;  %s2557_s0 = inlined_call_operand.vmem [shape: bf16[2,16,128], index: 0, kind: input, shape index: {}]   ;;  %s2558_s1 = inlined_call_operand.vmem [shape: bf16[128,128], index: 1, kind: input, shape index: {}]   ;;  %s2559_s2 = inlined_call_operand.vmem [shape: f32[1,128], index: 2, kind: input, shape index: {}]   ;;  %s2560_s3 = inlined_call_operand.vmem [shape: bf16[1152,128], index: 3, kind: input, shape index: {}]   ;;  %s2561_s4 = inlined_call_operand.vmem [shape: f32[1,128], index: 4, kind: input, shape index: {}]   ;;  %s2562_s5 = inlined_call_operand.vmem [shape: bf16[128,256], index: 5, kind: input, shape index: {}]   ;;  %s2563_s6 = inlined_call_operand.vmem [shape: f32[1,256], index: 6, kind: input, shape index: {}]   ;;  %s2564_s7 = inlined_call_operand.vmem [shape: f32[1,256], index: 7, kind: input, shape index: {}]   ;;  %s2565_s8 = inlined_call_operand.vmem [shape: f32[1,256], index: 8, kind: input, shape index: {}]   ;;  %s2566_s9 = inlined_call_operand.vmem [shape: bf16[2,4,256], index: 9, kind: output, shape index: {}]  }
   0x1 LB: > { %s1681_s10 = sadd.s32 4294967295, %s2076_s30   ;;  %p1685_p0 = scmp.ge.s32.totalorder %s2076_s30, 1  ;;  %s2076_s30 = sphi %s2132_s30, %s19_s30  }
   0x2   : > { %p287_p1 = scmp.lt.s32.totalorder %s2076_s30, 3 }
   0x4   : > { %p288_p2 = pnand %p1685_p0, %p287_p1 }
   0x5   : > { %v1965_v0 = vld [vmem:[%s2558_s1] sm:$0xff] (!%p288_p2)   ;;  %v2078_v1 = vmov (!%p288_p2), 0.0   ;;  %v1966_v2 = vld [vmem:[%s2558_s1 + $0x8] sm:$0xff] (!%p288_p2)   ;;  %vm2079_vm0 = vmmov (!%p288_p2), 0   ;;  %p323_p3 = scmp.lt.s32.totalorder (!%p288_p2), %s1681_s10, 1  ;;  %v1967_v3 = vld [vmem:[%s2558_s1 + $0x10] sm:$0xff] (!%p288_p2)  }
   0x6   : > { %291 = sbr.rel (%p288_p2) target bundleno = 801 (0x321), region = 56  ;;  %1913 = vmatprep.subr.bf16.mxu0 (!%p288_p2), %v2078_v1  ;;  %1929 = vmatprep.mubr.msk.bf16.mxu0 (!%p288_p2), %vm2079_vm0, %v2078_v1  ;;  %v1968_v4 = vld [vmem:[%s2558_s1 + $0x18] sm:$0xff] (!%p288_p2)   ;;  %v1974_v5 = vld [vmem:[%s2560_s3 + $0x40] sm:$0xff] (!%p288_p2)   ;;  %v1978_v8 = vld [vmem:[%s2560_s3 + $0x48] sm:$0xff] (!%p288_p2)   ;;  %vm663_vm1 = vcmask (!%p288_p2), 1043456   ;;  %v2289_v52 = vrot.slane (!%p288_p2), %v2078_v1, 4 }
   0x7   : > { %1914 = vmatpush3.bf16.msra.mxu0 (!%p288_p2), %v1965_v0  ;;  %v1975_v6 = vld [vmem:[%s2560_s3] sm:$0xff] (!%p288_p2)   ;;  %1816 = vmatprep.subr.bf16.mxu1 (!%p288_p2), %v1974_v5  ;;  %v1979_v9 = vld [vmem:[%s2560_s3 + $0x8] sm:$0xff] (!%p288_p2)   ;;  %v1982_v11 = vld [vmem:[%s2560_s3 + $0x50] sm:$0xff] (!%p288_p2)   ;;  %vm603_vm2 = vcmask (!%p288_p2), 1040384   ;;  %vm607_vm4 = vcmask (!%p288_p2), 1042432   ;;  %vm2080_vm5 = vmmov (!%p288_p2), 1  }
   0x8   : > { %1915 = vmatprep.subr.bf16.mxu0 (!%p288_p2), %v2078_v1  ;;  %v1969_v7 = vld [vmem:[%s2558_s1 + $0x20] sm:$0xff] (!%p288_p2)   ;;  %1817 = vmatpush3.bf16.msra.mxu1 (!%p288_p2), %v1975_v6  ;;  %v1970_v10 = vld [vmem:[%s2558_s1 + $0x28] sm:$0xff] (!%p288_p2)   ;;  %v1983_v12 = vld [vmem:[%s2560_s3 + $0x10] sm:$0xff] (!%p288_p2)   ;;  %vm1530_vm7 = vcmask (!%p288_p2), 1041408   ;;  %vm1545_vm8 = vcmask (!%p288_p2), 1043457   ;;  %vm1572_vm9 = vcmask (!%p288_p2), 1045508  }
   0x9   : > { %1818 = vmatprep.subr.bf16.mxu1 (!%p288_p2), %v1978_v8  ;;  %v1971_v13 = vld [vmem:[%s2558_s1 + $0x30] sm:$0xff] (!%p288_p2)   ;;  %v1986_v14 = vld [vmem:[%s2560_s3 + $0x58] sm:$0xff] (!%p288_p2)   ;;  %v1990_v17 = vld [vmem:[%s2560_s3 + $0x60] sm:$0xff] (!%p288_p2)   ;;  %vm1587_vm10 = vcmask (!%p288_p2), 1047557  }
   0xa   : > { %v1987_v15 = vld [vmem:[%s2560_s3 + $0x18] sm:$0xff] (!%p288_p2)   ;;  %v1991_v18 = vld [vmem:[%s2560_s3 + $0x20] sm:$0xff] (!%p288_p2)   ;;  %v1980_v22 = vld [vmem:[%s2560_s3 + $0xc8] sm:$0xff] (!%p288_p2)  }
   0xb   : > { %1916 = vmatpush3.bf16.msra.mxu0 (!%p288_p2), %v1966_v2  ;;  %v1972_v16 = vld [vmem:[%s2558_s1 + $0x38] sm:$0xff] (!%p288_p2)   ;;  %v1976_v20 = vld [vmem:[%s2560_s3 + $0xc0] sm:$0xff] (!%p288_p2)   ;;  %v1981_v23 = vld [vmem:[%s2560_s3 + $0x88] sm:$0xff] (!%p288_p2)  }
   0xc   : > { %1917 = vmatprep.subr.bf16.mxu0 (!%p288_p2), %v2078_v1  ;;  %1819 = vmatpush3.bf16.msra.mxu1 (!%p288_p2), %v1979_v9  ;;  %v1977_v21 = vld [vmem:[%s2560_s3 + $0x80] sm:$0xff] (!%p288_p2)   ;;  %v1984_v24 = vld [vmem:[%s2560_s3 + $0xd0] sm:$0xff] (!%p288_p2)   ;;  %v1988_v26 = vld [vmem:[%s2560_s3 + $0xd8] sm:$0xff] (!%p288_p2)  }
   0xd   : > { %s2570_s10 = smov (!%p323_p3, %s1681_s10), 1  ;;  %1820 = vmatprep.subr.bf16.mxu1 %v1982_v11  ;;  %v1985_v25 = vld [vmem:[%s2560_s3 + $0x90] sm:$0xff]   ;;  %v1989_v27 = vld [vmem:[%s2560_s3 + $0x98] sm:$0xff]   ;;  %v1992_v28 = vld [vmem:[%s2560_s3 + $0xe0] sm:$0xff]  }
   0xe   : > { %s1805_s17 = sshll.u32 %s2570_s10, 3  ;;  %v1993_v29 = vld [vmem:[%s2560_s3 + $0xa0] sm:$0xff]   ;;  %v1994_v30 = vld [vmem:[%s2560_s3 + $0x68] sm:$0xff]   ;;  %v1998_v34 = vld [vmem:[%s2560_s3 + $0x70] sm:$0xff]   ;;  %s1806_s28 = sshll.u32 %s2570_s10, 2 }
   0xf   : > { %s2160_s20 = scalar_lea.vmem %s2557_s0, %s1805_s17  ;;  %1918 = vmatpush3.bf16.msra.mxu0 %v1967_v3  ;;  %v1995_v31 = vld [vmem:[%s2560_s3 + $0x28] sm:$0xff]   ;;  %v1999_v35 = vld [vmem:[%s2560_s3 + $0x30] sm:$0xff]   ;;  %v2002_v38 = vld [vmem:[%s2560_s3 + $0x78] sm:$0xff]   ;;  %s332_s12 = scalar_lea.vmem %s2566_s9, %s1806_s28 }
  0x10   : > { %1919 = vmatprep.subr.bf16.mxu0 %v2078_v1  ;;  %1821 = vmatpush3.bf16.msra.mxu1 %v1983_v12  ;;  %v1973_v19 = vld [vmem:[%s2160_s20] sm:$0xff]   ;;  %v1996_v32 = vld [vmem:[%s2560_s3 + $0xe8] sm:$0xff]   ;;  %v2000_v36 = vld [vmem:[%s2560_s3 + $0xf0] sm:$0xff]  }
  0x11   : > { %1822 = vmatprep.subr.bf16.mxu1 %v1986_v14  ;;  %v1997_v33 = vld [vmem:[%s2560_s3 + $0xa8] sm:$0xff]   ;;  %v2001_v37 = vld [vmem:[%s2560_s3 + $0xb0] sm:$0xff]   ;;  %v2003_v39 = vld [vmem:[%s2560_s3 + $0x38] sm:$0xff]  }
  0x12   : > { %v2004_v40 = vld [vmem:[%s2560_s3 + $0xf8] sm:$0xff]   ;;  %v2006_v42 = vld [vmem:[%s2560_s3 + $0x140] sm:$0xff]   ;;  %vm1773_vm3 = vmneg %vm663_vm1 }
  0x13   : > { %1920 = vmatpush3.bf16.msra.mxu0 %v1968_v4  ;;  %v2005_v41 = vld [vmem:[%s2560_s3 + $0xb8] sm:$0xff]   ;;  %v2008_v43 = vld [vmem:[%s2560_s3 + $0x1c0] sm:$0xff]   ;;  %vm2297_vm6 = vmpackc.low %vm2080_vm5, %vm1773_vm3 }
  0x14   : > { %1921 = vmatprep.subr.bf16.mxu0 %v2078_v1  ;;  %1823 = vmatpush3.bf16.msra.mxu1 %v1987_v15  ;;  %v1690_v44 = vld [vmem:[%s2559_s2] ss:$0 sm:$0xff]  ;;  %v2036_v5 = vld [vmem:[%s2560_s3 + $0x1f8] sm:$0xff]  }
  0x15   : > { %1824 = vmatprep.subr.bf16.mxu1 %v1990_v17 }
  0x17   : > { %1922 = vmatpush3.bf16.msra.mxu0 %v1969_v7 }
  0x18   : > { %1923 = vmatprep.subr.bf16.mxu0 %v2078_v1  ;;  %1825 = vmatpush3.bf16.msra.mxu1 %v1991_v18 }
  0x19   : > { %1826 = vmatprep.subr.bf16.mxu1 %v1994_v30 }
  0x1b   : > { %1924 = vmatpush3.bf16.msra.mxu0 %v1970_v10 }
  0x1c   : > { %1925 = vmatprep.subr.bf16.mxu0 %v2078_v1  ;;  %1827 = vmatpush3.bf16.msra.mxu1 %v1995_v31 }
  0x1d   : > { %1828 = vmatprep.subr.bf16.mxu1 %v1998_v34 }
  0x1f   : > { %1926 = vmatpush3.bf16.msra.mxu0 %v1971_v13 }
  0x20   : > { %1927 = vmatprep.subr.bf16.mxu0 %v2078_v1  ;;  %1829 = vmatpush3.bf16.msra.mxu1 %v1999_v35 }
  0x21   : > { %1830 = vmatprep.subr.bf16.mxu1 %v2002_v38 }
  0x23   : > { %1928 = vmatpush3.bf16.msra.mxu0 %v1972_v16 }
  0x24   : > { %1838 = vmatprep.subr.bf16.mxu0 %v1976_v20  ;;  %1831 = vmatpush3.bf16.msra.mxu1 %v2003_v39 }
  0x25   : > { %1860 = vmatprep.subr.bf16.mxu1 %v2006_v42 }
  0x26   : > { %1930 = vmatmul.mubr.bf16.vlgmr.msra.gmra.mrb[0].mxu0 %v1973_v19 }
  0x27   : > { %1839 = vmatpush3.bf16.msra.mxu0 %v1977_v21 }
  0x28   : > { %1840 = vmatprep.subr.bf16.mxu0 %v1980_v22  ;;  %v2007_v22 = vld [vmem:[%s2560_s3 + $0x100] sm:$0xff]  }
  0x2b   : > { %1841 = vmatpush3.bf16.msra.mxu0 %v1981_v23 }
  0x2c   : > { %1842 = vmatprep.subr.bf16.mxu0 %v1984_v24 }
  0x2f   : > { %1843 = vmatpush3.bf16.msra.mxu0 %v1985_v25 }
  0x30   : > { %1844 = vmatprep.subr.bf16.mxu0 %v1988_v26 }
  0x33   : > { %1845 = vmatpush3.bf16.msra.mxu0 %v1989_v27 }
  0x34   : > { %1846 = vmatprep.subr.bf16.mxu0 %v1992_v28 }
  0x37   : > { %1847 = vmatpush3.bf16.msra.mxu0 %v1993_v29  ;;  %v2010_v29 = vld [vmem:[%s2560_s3 + $0x148] sm:$0xff]  }
  0x38   : > { %1848 = vmatprep.subr.bf16.mxu0 %v1996_v32  ;;  %v2009_v32 = vld [vmem:[%s2560_s3 + $0x180] sm:$0xff]  }
  0x3b   : > { %1849 = vmatpush3.bf16.msra.mxu0 %v1997_v33 }
  0x3c   : > { %1850 = vmatprep.subr.bf16.mxu0 %v2000_v36  ;;  %v2012_v36 = vld [vmem:[%s2560_s3 + $0x1c8] sm:$0xff]  }
  0x3f   : > { %1851 = vmatpush3.bf16.msra.mxu0 %v2001_v37 }
  0x40   : > { %1852 = vmatprep.subr.bf16.mxu0 %v2004_v40 }
  0x43   : > { %1853 = vmatpush3.bf16.msra.mxu0 %v2005_v41  ;;  %v2011_v41 = vld [vmem:[%s2560_s3 + $0x108] sm:$0xff]  }
  0x44   : > { %1882 = vmatprep.subr.bf16.mxu0 %v2008_v43 }
  0xf9   : > { %v447_v45 = vpop.f32.mrb[0].mxu0 }
  0xfa   : > { %v448_v46 = vadd.f32 %v1690_v44, %v447_v45  ;;  %v1931_v47 = vpop.f32.mrb[1].mxu0  ;;  %v2014_v45 = vld [vmem:[%s2560_s3 + $0x150] sm:$0xff]  }
  0xfb   : > { %v450_v48 = vpop.f32.mrb[2].mxu0  ;;  %v2013_v47 = vld [vmem:[%s2560_s3 + $0x188] sm:$0xff]  }
  0xfc   : > { %v454_v49 = vmax.f32 %v448_v46, 0.0  ;;  %v451_v50 = vadd.f32 %v1690_v44, %v450_v48  ;;  %v1932_v51 = vpop.f32.mrb[3].mxu0  ;;  %v2016_v48 = vld [vmem:[%s2560_s3 + $0x1d0] sm:$0xff]  }
  0xfd   : > { %v2017_v51 = vld [vmem:[%s2560_s3 + $0x190] sm:$0xff]  }
  0xfe   : > { %v455_v53 = vmax.f32 %v451_v50, 0.0  ;;  %v628_v54 = vrot.slane %v454_v49, 4  ;;  %v601_v55 = vrot.slane %v454_v49, 7  ;;  %v609_v56 = vrot.slane %v454_v49, 3  ;;  %v2018_v50 = vld [vmem:[%s2560_s3 + $0x158] sm:$0xff]  }
  0xff   : > { %v605_v57 = vrot.slane %v454_v49, 1  ;;  %v612_v61 = vrot.slane %v454_v49, 5 }
 0x100   : > { %v619_v58 = vrot.slane %v455_v53, 1  ;;  %v630_v59 = vrot.slane %v455_v53, 4  ;;  %v604_v60 = vsel %vm603_vm2, 0.0, %v601_v55  ;;  %v641_v62 = vrot.slane %v628_v54, 4  ;;  %v2021_v55 = vld [vmem:[%s2560_s3 + $0x198] sm:$0xff]  }
 0x101   : > { %v611_v63 = vsel %vm603_vm2, 0.0, %v609_v56  ;;  %v616_v0 = vrot.slane %v455_v53, 7  ;;  %v622_v2 = vrot.slane %v455_v53, 3  ;;  %v638_v6 = vrot.slane %v604_v60, 4  ;;  %v2024_v56 = vld [vmem:[%s2560_s3 + $0x1e0] sm:$0xff]  }
 0x102   : > { %v671_v3 = vsel %vm663_vm1, %v628_v54, %v630_v59  ;;  %v677_v4 = vsel %vm663_vm1, %v630_v59, %v2289_v52  ;;  %v640_v7 = vrot.slane %v611_v63, 4  ;;  %v656_v12 = vrot.slane %v630_v59, 4  ;;  %v2025_v59 = vld [vmem:[%s2560_s3 + $0x1a0] sm:$0xff]  }
 0x103   : > { %v686_v8 = vpack.c.bf16 %v677_v4, %v671_v3  ;;  %v1775_v9 = vpack.c.bf16 %v671_v3, %v628_v54  ;;  %v618_v10 = vsel %vm603_vm2, 0.0, %v616_v0  ;;  %v624_v11 = vsel %vm603_vm2, 0.0, %v622_v2  ;;  %v2022_v54 = vld [vmem:[%s2560_s3 + $0x160] sm:$0xff]   ;;  %v2032_v0 = vld [vmem:[%s2560_s3 + $0x1f0] sm:$0xff]   ;;  %v2034_v3 = vld [vmem:[%s2560_s3 + $0x178] sm:$0xff]  }
 0x104   : > { %v643_v13 = vrot.slane %v618_v10, 4  ;;  %v655_v14 = vrot.slane %v624_v11, 4  ;;  %v608_v15 = vsel %vm607_vm4, %v605_v57, 0.0  ;;  %v667_v16 = vsel %vm663_vm1, %v604_v60, %v640_v7  ;;  %v2023_v57 = vld [vmem:[%s2560_s3 + $0x120] sm:$0xff]   ;;  %v2028_v60 = vld [vmem:[%s2560_s3 + $0x1e8] sm:$0xff]   ;;  %v2031_v2 = vld [vmem:[%s2560_s3 + $0x130] sm:$0xff]  }
 0x105   : > { %1776 = vmatprep.mubr.msk.bf16.mxu1 %vm2297_vm6, %v1775_v9  ;;  %v614_v17 = vsel %vm607_vm4, %v612_v61, 0.0  ;;  %v621_v18 = vsel %vm607_vm4, %v619_v58, 0.0  ;;  %v625_v19 = vrot.slane %v455_v53, 5  ;;  %v639_v27 = vrot.slane %v608_v15, 4  ;;  %v2026_v58 = vld [vmem:[%s2560_s3 + $0x168] sm:$0xff]   ;;  %v2033_v4 = vld [vmem:[%s2560_s3 + $0x1b0] sm:$0xff]  }
 0x106   : > { %v2310_v20 = vsel %vm663_vm1, %v611_v63, %v643_v13  ;;  %v673_v21 = vsel %vm663_vm1, %v618_v10, %v655_v14  ;;  %v644_v23 = vrot.slane %v621_v18, 4  ;;  %v642_v24 = vrot.slane %v614_v17, 4  ;;  %v2027_v61 = vld [vmem:[%s2560_s3 + $0x128] sm:$0xff]   ;;  %v2037_v7 = vld [vmem:[%s2560_s3 + $0x1b8] sm:$0xff]   ;;  %v2040_v10 = vld [vmem:[%s2560_s3 + $0x210] sm:$0xff]  }
 0x107   : > { %v1779_v25 = vpack.c.bf16 %v2310_v20, %v638_v6  ;;  %v682_v26 = vpack.c.bf16 %v673_v21, %v667_v16  ;;  %v627_v28 = vsel %vm607_vm4, %v625_v19, 0.0  ;;  %v2328_v33 = vsel %vm663_vm1, %v454_v49, %v641_v62  ;;  %v2015_v49 = vld [vmem:[%s2560_s3 + $0x110] sm:$0xff]   ;;  %v2029_v63 = vld [vmem:[%s2560_s3 + $0x1a8] sm:$0xff]   ;;  %v2035_v6 = vld [vmem:[%s2560_s3 + $0x138] sm:$0xff]  }
 0x108   : > { %v2322_v30 = vsel %vm663_vm1, %v614_v17, %v644_v23  ;;  %v657_v31 = vrot.slane %v627_v28, 4  ;;  %v2331_v34 = vsel %vm663_vm1, %v455_v53, %v656_v12  ;;  %v2343_v38 = vsel %vm663_vm1, %v624_v11, %v2289_v52  ;;  %v2019_v53 = vld [vmem:[%s2560_s3 + $0x118] sm:$0xff]   ;;  %v2030_v62 = vld [vmem:[%s2560_s3 + $0x170] sm:$0xff]   ;;  %v2039_v9 = vld [vmem:[%s2560_s3 + $0x208] sm:$0xff]  }
 0x109   : > { %1780 = vmatmul.mubr.msk.bf16.vlgmr.msra.gmra.mrb[0].mxu1 %vm2297_vm6, %v1779_v25  ;;  %1200 = vmatprep.mubr.bf16.mxu0 %v682_v26  ;;  %v1783_v35 = vpack.c.bf16 %v2322_v30, %v639_v27  ;;  %v683_v37 = vpack.c.bf16 %v2331_v34, %v2328_v33  ;;  %v669_v39 = vsel %vm663_vm1, %v608_v15, %v642_v24  ;;  %v2041_v11 = vld [vmem:[%s2560_s3 + $0x218] sm:$0xff]   ;;  %v2042_v12 = vld [vmem:[%s2560_s3 + $0x220] sm:$0xff]   ;;  %v2043_v13 = vld [vmem:[%s2560_s3 + $0x228] sm:$0xff]  }
 0x10a   : > { %1861 = vmatpush3.bf16.msra.mxu1 %v2007_v22  ;;  %v675_v40 = vsel %vm663_vm1, %v621_v18, %v657_v31  ;;  %v685_v42 = vpack.c.bf16 %v2343_v38, %v2310_v20  ;;  %v2354_v43 = vsel %vm663_vm1, %v627_v28, %v2289_v52  ;;  %v2020_v52 = vld [vmem:[%s2560_s3 + $0x1d8] sm:$0xff]   ;;  %v2044_v14 = vld [vmem:[%s2560_s3 + $0x230] sm:$0xff]   ;;  %v2046_v16 = vld [vmem:[%s2562_s5] ss:$8 sps:$4 sm:$0xff]   ;;  %v2081_v31 = vmov 0  }
 0x10b   : > { %1784 = vmatmul.mubr.msk.bf16.vlgmr.msra.gmra.mrb[4].mxu0 %vm2297_vm6, %v1783_v35  ;;  %v684_v44 = vpack.c.bf16 %v675_v40, %v669_v39  ;;  %1862 = vmatprep.subr.bf16.mxu1 %v2010_v29  ;;  %v687_v46 = vpack.c.bf16 %v2354_v43, %v2322_v30  ;;  %v2045_v15 = vld [vmem:[%s2560_s3 + $0x238] sm:$0xff]   ;;  %v2048_v17 = vld [vmem:[%s2562_s5 + $0x4] ss:$8 sps:$4 sm:$0xff]   ;;  %v2052_v20 = vld [vmem:[%s2562_s5 + $0x20] ss:$8 sps:$4 sm:$0xff]  }
 0x10c   : > { %1883 = vmatpush3.bf16.msra.mxu0 %v2009_v32  ;;  %1282 = vmatprep.mubr.bf16.mxu0 %v686_v8  ;;  %v2038_v8 = vld [vmem:[%s2560_s3 + $0x200] sm:$0xff]   ;;  %v2051_v18 = vld [vmem:[%s2562_s5 + $0x14] ss:$8 sps:$4 sm:$0xff]   ;;  %v2055_v22 = vld [vmem:[%s2562_s5 + $0x30] ss:$8 sps:$4 sm:$0xff]  }
 0x10d   : > { %1241 = vmatprep.mubr.bf16.mxu1 %v684_v44  ;;  %1884 = vmatprep.subr.bf16.mxu0 %v2012_v36  ;;  %v2054_v19 = vld [vmem:[%s2562_s5 + $0x24] ss:$8 sps:$4 sm:$0xff]   ;;  %v2057_v21 = vld [vmem:[%s2562_s5 + $0x34] ss:$8 sps:$4 sm:$0xff]   ;;  %v2058_v24 = vld [vmem:[%s2562_s5 + $0x40] ss:$8 sps:$4 sm:$0xff]  }
 0x10e   : > { %1863 = vmatpush3.bf16.msra.mxu1 %v2011_v41  ;;  %v2060_v23 = vld [vmem:[%s2562_s5 + $0x44] ss:$8 sps:$4 sm:$0xff]   ;;  %v2063_v25 = vld [vmem:[%s2562_s5 + $0x54] ss:$8 sps:$4 sm:$0xff]   ;;  %v2061_v26 = vld [vmem:[%s2562_s5 + $0x50] ss:$8 sps:$4 sm:$0xff]  }
 0x10f   : > { %1864 = vmatprep.subr.bf16.mxu1 %v2014_v45  ;;  %v2064_v27 = vld [vmem:[%s2562_s5 + $0x60] ss:$8 sps:$4 sm:$0xff]   ;;  %v2066_v28 = vld [vmem:[%s2562_s5 + $0x64] ss:$8 sps:$4 sm:$0xff]   ;;  %v2067_v29 = vld [vmem:[%s2562_s5 + $0x70] ss:$8 sps:$4 sm:$0xff]  }
 0x110   : > { %1885 = vmatpush3.bf16.msra.mxu0 %v2013_v47  ;;  %v2069_v30 = vld [vmem:[%s2562_s5 + $0x74] ss:$8 sps:$4 sm:$0xff]   ;;  %v1700_v33 = vld [vmem:[%s2561_s4] ss:$0 sm:$0xff] }
 0x111   : > { %1886 = vmatprep.subr.bf16.mxu0 %v2016_v48 }
 0x112   : > { %1865 = vmatpush3.bf16.msra.mxu1 %v2015_v49 }
 0x113   : > { %1866 = vmatprep.subr.bf16.mxu1 %v2018_v50 }
 0x114   : > { %1887 = vmatpush3.bf16.msra.mxu0 %v2017_v51 }
 0x115   : > { %1888 = vmatprep.subr.bf16.mxu0 %v2020_v52 }
 0x116   : > { %1867 = vmatpush3.bf16.msra.mxu1 %v2019_v53 }
 0x117   : > { %1868 = vmatprep.subr.bf16.mxu1 %v2022_v54 }
 0x118   : > { %1889 = vmatpush3.bf16.msra.mxu0 %v2021_v55 }
 0x119   : > { %1890 = vmatprep.subr.bf16.mxu0 %v2024_v56 }
 0x11a   : > { %1869 = vmatpush3.bf16.msra.mxu1 %v2023_v57 }
 0x11b   : > { %1870 = vmatprep.subr.bf16.mxu1 %v2026_v58 }
 0x11c   : > { %1891 = vmatpush3.bf16.msra.mxu0 %v2025_v59 }
 0x11d   : > { %1892 = vmatprep.subr.bf16.mxu0 %v2028_v60 }
 0x11e   : > { %1871 = vmatpush3.bf16.msra.mxu1 %v2027_v61 }
 0x11f   : > { %1872 = vmatprep.subr.bf16.mxu1 %v2030_v62 }
 0x120   : > { %1893 = vmatpush3.bf16.msra.mxu0 %v2029_v63 }
 0x121   : > { %1894 = vmatprep.subr.bf16.mxu0 %v2032_v0 }
 0x122   : > { %1873 = vmatpush3.bf16.msra.mxu1 %v2031_v2 }
 0x123   : > { %1874 = vmatprep.subr.bf16.mxu1 %v2034_v3 }
 0x124   : > { %1895 = vmatpush3.bf16.msra.mxu0 %v2033_v4 }
 0x125   : > { %1896 = vmatprep.subr.bf16.mxu0 %v2036_v5 }
 0x126   : > { %1875 = vmatpush3.bf16.msra.mxu1 %v2035_v6 }
 0x127   : > { %1933 = vmatprep.subr.bf16.mxu1 %v2078_v1 }
 0x128   : > { %1897 = vmatpush3.bf16.msra.mxu0 %v2037_v7 }
 0x129   : > { %1242 = vmatmul.mubr.bf16.vlgmr.msra.gmra.mrb[4].mxu1 %v683_v37  ;;  %1443 = vmatprep.subr.bf16.mxu0 %v2048_v17  ;;  %v1490_v17 = vld [vmem:[%s2564_s7] sm:$0x3] }
 0x12a   : > { %1934 = vmatpush3.bf16.msra.mxu1 %v2038_v8  ;;  %1949 = vmatprep.mubr.msk.bf16.mxu1 %vm2079_vm0, %v2078_v1 }
 0x12b   : > { %1283 = vmatmul.mubr.bf16.vlgmr.msra.gmra.mrb[8].mxu0 %v685_v42  ;;  %1935 = vmatprep.subr.bf16.mxu1 %v2078_v1 }
 0x12c   : > { %1444 = vmatpush1.bf16.msra.mxu0 %v2046_v16  ;;  %1475 = vmatprep.mubr.bf16.mxu0 %v2081_v31 }
 0x12d   : > { %1445 = vmatprep.subr.bf16.mxu0 %v2051_v18 }
 0x12e   : > { %1936 = vmatpush3.bf16.msra.mxu1 %v2039_v9 }
 0x12f   : > { %1937 = vmatprep.subr.bf16.mxu1 %v2078_v1 }
 0x132   : > { %1938 = vmatpush3.bf16.msra.mxu1 %v2040_v10 }
 0x133   : > { %1939 = vmatprep.subr.bf16.mxu1 %v2078_v1 }
 0x136   : > { %1940 = vmatpush3.bf16.msra.mxu1 %v2041_v11  ;;  %v1353_v11 = vlaneseq }
 0x137   : > { %1941 = vmatprep.subr.bf16.mxu1 %v2078_v1 }
 0x13a   : > { %1942 = vmatpush3.bf16.msra.mxu1 %v2042_v12  ;;  %v1354_v12 = vshrl.u32 %v1353_v11, 7 }
 0x13b   : > { %1943 = vmatprep.subr.bf16.mxu1 %v2078_v1 }
 0x13e   : > { %1944 = vmatpush3.bf16.msra.mxu1 %v2043_v13  ;;  %v1355_v13 = vsub.s32 0, %v1354_v12 }
 0x13f   : > { %1945 = vmatprep.subr.bf16.mxu1 %v2078_v1 }
 0x142   : > { %1946 = vmatpush3.bf16.msra.mxu1 %v2044_v14  ;;  %v1351_v14 = vld [vmem:[%s2563_s6] sm:$0x3] }
 0x143   : > { %1947 = vmatprep.subr.bf16.mxu1 %v2078_v1  ;;  %v2049_v1 = vld [vmem:[%s2562_s5 + $0x10] ss:$8 sps:$4 sm:$0xff]   ;;  %v1356_v16 = vrot.slane %v1351_v14, %v1355_v13 }
 0x144   : > { %1446 = vmatpush1.bf16.msra.mxu0 %v2049_v1 }
 0x145   : > { %1447 = vmatprep.subr.bf16.mxu0 %v2054_v19  ;;  %v1506_v19 = vld [vmem:[%s2565_s8] sm:$0x3] }
 0x146   : > { %1948 = vmatpush3.bf16.msra.mxu1 %v2045_v15  ;;  %v1359_v15 = vsub.s32 1, %v1354_v12 }
 0x148   : > { %1448 = vmatpush1.bf16.msra.mxu0 %v2052_v20  ;;  %v1360_v18 = vrot.slane %v1351_v14, %v1359_v15  ;;  %v1515_v31 = vrot.slane %v1506_v19, %v1359_v15 }
 0x149   : > { %1950 = vmatmul.mubr.bf16.vlgmr.msra.gmra.mrb[8].mxu1 %v687_v46  ;;  %1449 = vmatprep.subr.bf16.mxu0 %v2057_v21  ;;  %v1495_v21 = vrot.slane %v1490_v17, %v1355_v13 }
 0x14c   : > { %1450 = vmatpush1.bf16.msra.mxu0 %v2055_v22 }
 0x14d   : > { %1451 = vmatprep.subr.bf16.mxu0 %v2060_v23 }
 0x150   : > { %1452 = vmatpush1.bf16.msra.mxu0 %v2058_v24  ;;  %v1499_v24 = vrot.slane %v1490_v17, %v1359_v15 }
 0x151   : > { %1453 = vmatprep.subr.bf16.mxu0 %v2063_v25 }
 0x154   : > { %1454 = vmatpush1.bf16.msra.mxu0 %v2061_v26 }
 0x155   : > { %1455 = vmatprep.subr.bf16.mxu0 %v2066_v28 }
 0x158   : > { %1456 = vmatpush1.bf16.msra.mxu0 %v2064_v27  ;;  %v1511_v27 = vrot.slane %v1506_v19, %v1355_v13 }
 0x159   : > { %1457 = vmatprep.subr.bf16.mxu0 %v2069_v30 }
 0x15c   : > { %1458 = vmatpush1.bf16.msra.mxu0 %v2067_v29 }
 0x1dc   : > { %v1832_v32 = vpop.f32.mrb[0].mxu1 }
 0x1dd   : > { %v1833_v34 = vpop.f32.mrb[1].mxu1 }
 0x1de   : > { %v1834_v35 = vadd.f32 %v1833_v34, %v1832_v32  ;;  %v1854_v36 = vpop.f32.mrb[4].mxu0  ;;  %v1835_v37 = vpop.f32.mrb[2].mxu1 }
 0x1df   : > { %v1855_v38 = vpop.f32.mrb[5].mxu0  ;;  %v1836_v39 = vpop.f32.mrb[3].mxu1 }
 0x1e0   : > { %v1162_v40 = vadd.f32 %v1834_v35, %v1700_v33  ;;  %v1856_v41 = vadd.f32 %v1855_v38, %v1854_v36  ;;  %v1837_v42 = vadd.f32 %v1836_v39, %v1835_v37  ;;  %v1857_v43 = vpop.f32.mrb[6].mxu0 }
 0x1e1   : > { %v1858_v44 = vpop.f32.mrb[7].mxu0 }
 0x1e2   : > { %v1203_v45 = vadd.f32 %v1856_v41, %v1162_v40  ;;  %v1165_v46 = vadd.f32 %v1837_v42, %v1700_v33  ;;  %v1859_v47 = vadd.f32 %v1858_v44, %v1857_v43 }
 0x1e4   : > { %v1206_v48 = vadd.f32 %v1859_v47, %v1165_v46 }
 0x1fc   : > { %v1876_v49 = vpop.f32.mrb[4].mxu1 }
 0x1fd   : > { %v1877_v50 = vpop.f32.mrb[5].mxu1 }
 0x1fe   : > { %v1878_v51 = vadd.f32 %v1877_v50, %v1876_v49  ;;  %v1898_v52 = vpop.f32.mrb[8].mxu0  ;;  %v1879_v53 = vpop.f32.mrb[6].mxu1 }
 0x1ff   : > { %v1899_v54 = vpop.f32.mrb[9].mxu0  ;;  %v1880_v55 = vpop.f32.mrb[7].mxu1 }
 0x200   : > { %v1244_v56 = vadd.f32 %v1878_v51, %v1203_v45  ;;  %v1900_v57 = vadd.f32 %v1899_v54, %v1898_v52  ;;  %v1881_v58 = vadd.f32 %v1880_v55, %v1879_v53  ;;  %v1901_v59 = vpop.f32.mrb[10].mxu0 }
 0x201   : > { %v1902_v60 = vpop.f32.mrb[11].mxu0 }
 0x202   : > { %v1247_v61 = vadd.f32 %v1881_v58, %v1206_v48  ;;  %v1903_v62 = vadd.f32 %v1902_v60, %v1901_v59  ;;  %v1285_v63 = vadd.f32 %v1900_v57, %v1244_v56 }
 0x204   : > { %v1288_v0 = vadd.f32 %v1903_v62, %v1247_v61 }
 0x21c   : > { %v1325_v2 = vpop.f32.mrb[8].mxu1 }
 0x21d   : > { %v1326_v3 = vadd.f32 %v1325_v2, %v1285_v63  ;;  %v1951_v4 = vpop.f32.mrb[9].mxu1 }
 0x21e   : > { %v1328_v5 = vpop.f32.mrb[10].mxu1 }
 0x21f   : > { %v1329_v6 = vadd.f32 %v1328_v5, %v1288_v0  ;;  %v1952_v7 = vpop.f32.mrb[11].mxu1  ;;  %v1332_v8 = vmax.f32 %v1326_v3, 0.0 }
 0x221   : > { %v1333_v9 = vmax.f32 %v1329_v6, 0.0 }
 0x223   : > { %v1334_v10 = vpack.c.bf16 %v1333_v9, %v1332_v8 }
 0x225   : > { %1476 = vmatmul.mubr.bf16.vlgmr.msra.gmra.mrb[12].mxu0 %v1334_v10 }
 0x2f8   : > { %v1477_v1 = vpop.f32.mrb[12].mxu0 }
 0x2f9   : > { %v1478_v20 = vadd.f32 %v1477_v1, %v1356_v16  ;;  %v1479_v22 = vpop.f32.mrb[13].mxu0 }
 0x2fa   : > { %v1480_v23 = vadd.f32 %v1479_v22, %v1360_v18  ;;  %v1481_v25 = vpop.f32.mrb[14].mxu0 }
 0x2fb   : > { %v1486_v26 = vmax.f32 %v1478_v20, 0.0  ;;  %v1482_v28 = vadd.f32 %v1481_v25, %v1356_v16  ;;  %v1483_v29 = vpop.f32.mrb[15].mxu0 }
 0x2fc   : > { %v1487_v30 = vmax.f32 %v1480_v23, 0.0  ;;  %v1484_v32 = vadd.f32 %v1483_v29, %v1360_v18 }
 0x2fd   : > { %v1502_v33 = vmul.f32 %v1495_v21, %v1486_v26  ;;  %v1488_v34 = vmax.f32 %v1482_v28, 0.0 }
 0x2fe   : > { %v1503_v35 = vmul.f32 %v1499_v24, %v1487_v30  ;;  %v1489_v36 = vmax.f32 %v1484_v32, 0.0 }
 0x2ff   : > { %v1518_v37 = vadd.f32 %v1511_v27, %v1502_v33  ;;  %v1504_v38 = vmul.f32 %v1495_v21, %v1488_v34 }
 0x300   : > { %v1519_v39 = vadd.f32 %v1515_v31, %v1503_v35  ;;  %v1505_v40 = vmul.f32 %v1499_v24, %v1489_v36 }
 0x301   : > { %v1524_v41 = vrot.slane %v1518_v37, 4  ;;  %v1520_v42 = vadd.f32 %v1511_v27, %v1504_v38 }
 0x302   : > { %v1525_v43 = vrot.slane %v1519_v39, 4  ;;  %v1521_v44 = vadd.f32 %v1515_v31, %v1505_v40 }
 0x303   : > { %v1528_v45 = vmax.f32 %v1518_v37, %v1524_v41  ;;  %v1564_v46 = vrot.slane %v1520_v42, 4 }
 0x304   : > { %v1529_v47 = vmax.f32 %v1519_v39, %v1525_v43  ;;  %v1565_v48 = vrot.slane %v1521_v44, 4 }
 0x305   : > { %v1531_v49 = vsel %vm1530_vm7, %v1528_v45, -inf  ;;  %v1546_v50 = vsel %vm1545_vm8, %v1528_v45, -inf  ;;  %v1568_v51 = vmax.f32 %v1518_v37, %v1564_v46 }
 0x306   : > { %v1532_v52 = vrot.slane %v1531_v49, 4  ;;  %v1547_v53 = vrot.slane %v1546_v50, 4  ;;  %v1538_v54 = vsel %vm1530_vm7, %v1529_v47, -inf  ;;  %v1553_v55 = vsel %vm1545_vm8, %v1529_v47, -inf }
 0x307   : > { %v1539_v56 = vrot.slane %v1538_v54, 4  ;;  %v1554_v57 = vrot.slane %v1553_v55, 4  ;;  %v1570_v58 = vmax.f32 %v1568_v51, %v1520_v42  ;;  %v1569_v59 = vmax.f32 %v1519_v39, %v1565_v48 }
 0x308   : > { %v1533_v60 = vmax.f32 %v1531_v49, %v1532_v52  ;;  %v1548_v61 = vmax.f32 %v1546_v50, %v1547_v53 }
 0x309   : > { %v1540_v62 = vmax.f32 %v1538_v54, %v1539_v56  ;;  %v1555_v63 = vmax.f32 %v1553_v55, %v1554_v57  ;;  %v1573_v0 = vsel %vm1572_vm9, %v1570_v58, -inf  ;;  %v1588_v2 = vsel %vm1587_vm10, %v1570_v58, -inf }
 0x30a   : > { %v1534_v3 = vrot.slane %v1533_v60, 2  ;;  %v1549_v4 = vrot.slane %v1548_v61, 2  ;;  %v1574_v5 = vrot.slane %v1573_v0, 4  ;;  %v1589_v6 = vrot.slane %v1588_v2, 4 }
 0x30b   : > { %v1541_v7 = vrot.slane %v1540_v62, 2  ;;  %v1571_v8 = vmax.f32 %v1569_v59, %v1521_v44  ;;  %v1556_v13 = vrot.slane %v1555_v63, 2 }
 0x30c   : > { %v1535_v9 = vmax.f32 %v1533_v60, %v1534_v3  ;;  %v1550_v10 = vmax.f32 %v1548_v61, %v1549_v4  ;;  %v1575_v11 = vmax.f32 %v1573_v0, %v1574_v5  ;;  %v1590_v12 = vmax.f32 %v1588_v2, %v1589_v6 }
 0x30d   : > { %v1580_v14 = vsel %vm1572_vm9, %v1571_v8, -inf  ;;  %v1595_v15 = vsel %vm1587_vm10, %v1571_v8, -inf  ;;  %v1542_v18 = vmax.f32 %v1540_v62, %v1541_v7  ;;  %v1557_v24 = vmax.f32 %v1555_v63, %v1556_v13 }
 0x30e   : > { %v1576_v16 = vrot.slane %v1575_v11, 2  ;;  %v1591_v17 = vrot.slane %v1590_v12, 2  ;;  %v1581_v1 = vrot.slane %v1580_v14, 4  ;;  %v1596_v19 = vrot.slane %v1595_v15, 4 }
 0x30f   : > { %v1536_v20 = vrot.slane %v1535_v9, 1  ;;  %v1551_v21 = vrot.slane %v1550_v10, 1  ;;  %v1543_v29 = vrot.slane %v1542_v18, 1  ;;  %v1558_v36 = vrot.slane %v1557_v24, 1 }
 0x310   : > { %v1577_v22 = vmax.f32 %v1575_v11, %v1576_v16  ;;  %v1592_v23 = vmax.f32 %v1590_v12, %v1591_v17  ;;  %v1582_v25 = vmax.f32 %v1580_v14, %v1581_v1  ;;  %v1597_v26 = vmax.f32 %v1595_v15, %v1596_v19 }
 0x311   : > { %v1537_v32 = vmax.f32 %v1535_v9, %v1536_v20  ;;  %v1552_v33 = vmax.f32 %v1550_v10, %v1551_v21  ;;  %v1544_v44 = vmax.f32 %v1542_v18, %v1543_v29  ;;  %v1559_v45 = vmax.f32 %v1557_v24, %v1558_v36 }
 0x312   : > { %v1578_v27 = vrot.slane %v1577_v22, 1  ;;  %v1593_v28 = vrot.slane %v1592_v23, 1  ;;  %v1583_v30 = vrot.slane %v1582_v25, 2  ;;  %v1598_v31 = vrot.slane %v1597_v26, 2 }
 0x313   : > { %v1560_v43 = vsel %vm603_vm2, %v1537_v32, %v1552_v33  ;;  %v1561_v51 = vsel %vm603_vm2, %v1544_v44, %v1559_v45 }
 0x314   : > { %v1579_v34 = vmax.f32 %v1577_v22, %v1578_v27  ;;  %v1594_v35 = vmax.f32 %v1592_v23, %v1593_v28  ;;  %v1584_v37 = vmax.f32 %v1582_v25, %v1583_v30  ;;  %v1599_v38 = vmax.f32 %v1597_v26, %v1598_v31 }
 0x316   : > { %v1602_v39 = vsel %vm603_vm2, %v1579_v34, %v1594_v35  ;;  %v1585_v41 = vrot.slane %v1584_v37, 1  ;;  %v1600_v42 = vrot.slane %v1599_v38, 1 }
 0x317   : > { %v1606_v40 = vrot.slane %v1602_v39, 6 }
 0x318   : > { %v1586_v47 = vmax.f32 %v1584_v37, %v1585_v41  ;;  %v1601_v48 = vmax.f32 %v1599_v38, %v1600_v42 }
 0x319   : > { %v1610_v46 = vsel %vm1530_vm7, %v1560_v43, %v1606_v40 }
 0x31a   : > { %v1603_v49 = vsel %vm603_vm2, %v1586_v47, %v1601_v48 }
 0x31b   : > { %v1607_v50 = vrot.slane %v1603_v49, 6 }
 0x31d   : > { %v1611_v52 = vsel %vm1530_vm7, %v1561_v51, %v1607_v50 }
 0x31e   : > { %v1801_v53 = vpack.c.bf16 %v1611_v52, %v1610_v46 }
 0x320   : > { %1802 = vst.sshfl [vmem:[%s332_s12] sm:$0x33 pattern:$0x76325410] %v1801_v53 }
 0x321 PF: > { %s19_s30 = sadd.s32 1, %s2076_s30  }
 0x322   : > { %p16_p4 = scmp.ge.s32.totalorder %s19_s30, 4  }
 0x324   :  { %18 = sbr.rel (!%p16_p4) target bundleno = 1 (0x1), region = 86 }

// kernel: betternet_forward.5
= control target key start
LH: loop header
LB: loop body
LE: loop exit
PB: predicated region body
PF: predicated region fallthrough
CT: control target
= control target key end

     0   :  { %16 = vsyncpa [#allocation3], 0  ;;  %s3532_s0 = inlined_call_operand.vmem [shape: bf16[2,4,256], index: 0, kind: input, shape index: {}]   ;;  %s3533_s1 = inlined_call_operand.vmem [shape: bf16[256,128], index: 1, kind: input, shape index: {}]   ;;  %s3534_s2 = inlined_call_operand.vmem [shape: f32[1,128], index: 2, kind: input, shape index: {}]   ;;  %s3535_s3 = inlined_call_operand.vmem [shape: bf16[1152,128], index: 3, kind: input, shape index: {}]   ;;  %s3536_s4 = inlined_call_operand.vmem [shape: f32[1,128], index: 4, kind: input, shape index: {}]   ;;  %s3537_s5 = inlined_call_operand.vmem [shape: bf16[128,512], index: 5, kind: input, shape index: {}]   ;;  %s3538_s6 = inlined_call_operand.vmem [shape: f32[1,512], index: 6, kind: input, shape index: {}]   ;;  %s3539_s7 = inlined_call_operand.vmem [shape: f32[1,512], index: 7, kind: input, shape index: {}]   ;;  %s3540_s8 = inlined_call_operand.vmem [shape: f32[1,512], index: 8, kind: input, shape index: {}]   ;;  %s3541_s9 = inlined_call_operand.vmem [shape: bf16[512,128], index: 9, kind: input, shape index: {}]   ;;  %s3542_s10 = inlined_call_operand.vmem [shape: f32[1,128], index: 10, kind: input, shape index: {}]   ;;  %s3543_s11 = inlined_call_operand.hbm [shape: f32[2,1,128], index: 11, kind: output, shape index: {}]  }
   0x1   :  { %18 = vsyncpa [#allocation3 + $0x1], 0  ;;  %s2906_s17 = smov 0   ;;  %s2908_s18 = smov 0  }
   0x2   :  { %s2910_s19 = smov 0   ;;  %s2912_s20 = smov 0  }
   0x3 LB: > { %3547 = sst [smem:[#allocation5_spill]] %s2836_s19  ;;  %s2927_s21 = sadd.s32 4294967295, %s2840_s20   ;;  %s2840_s20 = sphi %s2912_s20, %s3554_s20   ;;  %s2836_s19 = sphi %s2910_s19, %s3556_s19   ;;  %s2832_s18 = sphi %s2908_s18, %s3558_s18   ;;  %s2828_s17 = sphi %s2906_s17, %s3557_s17  }
   0x4   : > { %s2205_s22 = sadd.s32 4294967294, %s2840_s20   ;;  %s2931_s23 = sadd.s32 1, %s2840_s20  }
   0x5   : > { %3548 = sst [smem:[#allocation6_spill]] %s2931_s23  ;;  %s267_s24 = sadd.s32 1, %s2836_s19 }
   0x6   : > { %s264_s25 = ssub.s32 %s2840_s20, %s2931_s23  ;;  %p277_p0 = scmp.ne.s32.totalorder %s2836_s19, %s2832_s18 }
   0x7   : > { %p265_p1 = scmp.eq.s32.totalorder %s264_s25, 0  ;;  %p278_p2 = scmp.eq.s32.totalorder %s2927_s21, 1 }
   0x8   : > { %p283_p3 = scmp.ne.s32.totalorder %s2832_s18, %s2828_s17  ;;  %p284_p4 = scmp.eq.s32.totalorder %s2205_s22, 1 }
   0x9   : > { %s2942_s26 = scalar_select %p265_p1, %s2836_s19, %s267_s24  }
   0xa   : > { %p2944_p5 = por %p278_p2, %p277_p0  ;;  %p2948_p6 = por %p284_p4, %p283_p3 }
   0xb   : > { %3549 = sst [smem:[#allocation7_spill]] %s2942_s26  ;;  %p2208_p7 = scmp.ge.s32.totalorder %s2840_s20, 1 }
   0xc   : > { %p340_p8 = scmp.lt.s32.totalorder %s2840_s20, 3 }
   0xe   : > { %p341_p9 = pnand %p2208_p7, %p340_p8 }
   0xf   : > { %v2610_v0 = vld [vmem:[%s3533_s1 + $0x40] sm:$0xff] (!%p341_p9)   ;;  %v2612_v2 = vld [vmem:[%s3533_s1 + $0x48] sm:$0xff] (!%p341_p9)   ;;  %p379_p10 = scmp.lt.s32.totalorder (!%p341_p9), %s2927_s21, 1  ;;  %v2614_v4 = vld [vmem:[%s3533_s1 + $0x50] sm:$0xff] (!%p341_p9)   ;;  %vm750_vm0 = vcmask (!%p341_p9), 1041408   ;;  %vm720_vm2 = vcmask (!%p341_p9), 1040384  }
  0x10   : > { %344 = sbr.rel (%p341_p9) target bundleno = 1028 (0x404), region = 64  ;;  %v2611_v1 = vld [vmem:[%s3533_s1] sm:$0xff] (!%p341_p9)   ;;  %2385 = vmatprep.subr.bf16.mxu0 (!%p341_p9), %v2610_v0  ;;  %v2613_v3 = vld [vmem:[%s3533_s1 + $0x8] sm:$0xff] (!%p341_p9)   ;;  %v2615_v5 = vld [vmem:[%s3533_s1 + $0x10] sm:$0xff] (!%p341_p9)   ;;  %vm2843_vm4 = vmmov (!%p341_p9), 0   ;;  %vm1762_vm5 = vcmask (!%p341_p9), 1043456  }
  0x11   : > { %2386 = vmatpush3.bf16.msra.mxu0 (!%p341_p9), %v2611_v1  ;;  %v2616_v6 = vld [vmem:[%s3533_s1 + $0x58] sm:$0xff] (!%p341_p9)   ;;  %v2618_v8 = vld [vmem:[%s3533_s1 + $0x60] sm:$0xff] (!%p341_p9)   ;;  %v2620_v10 = vld [vmem:[%s3533_s1 + $0x68] sm:$0xff] (!%p341_p9)   ;;  %s377_s26 = sand.u32 (!%p341_p9), 1, %s2832_s18  }
  0x12   : > { %2387 = vmatprep.subr.bf16.mxu0 (!%p341_p9), %v2612_v2  ;;  %v2617_v7 = vld [vmem:[%s3533_s1 + $0x18] sm:$0xff] (!%p341_p9)   ;;  %v2619_v9 = vld [vmem:[%s3533_s1 + $0x20] sm:$0xff] (!%p341_p9)   ;;  %v2621_v15 = vld [vmem:[%s3533_s1 + $0x28] sm:$0xff] (!%p341_p9)   ;;  %v2842_v2 = vmov (!%p341_p9), 0.0   ;;  %s378_s12 = scalar_lea.vmem (!%p341_p9), [#allocation2], %s377_s26  ;;  %s2138_s22 = scalar_lea.sflag (!%p341_p9), [#allocation3], %s377_s26 }
  0x13   : > { %v2626_v13 = vld [vmem:[%s3535_s3 + $0x40] sm:$0xff] (!%p341_p9)   ;;  %v2622_v16 = vld [vmem:[%s3533_s1 + $0x70] sm:$0xff] (!%p341_p9)   ;;  %v2630_v17 = vld [vmem:[%s3535_s3 + $0x48] sm:$0xff] (!%p341_p9)  }
  0x14   : > { %v2627_v14 = vld [vmem:[%s3535_s3] sm:$0xff] (!%p341_p9)   ;;  %2407 = vmatprep.subr.bf16.mxu1 (!%p341_p9), %v2626_v13  ;;  %v2631_v18 = vld [vmem:[%s3535_s3 + $0x8] sm:$0xff] (!%p341_p9)   ;;  %v2623_v19 = vld [vmem:[%s3533_s1 + $0x30] sm:$0xff] (!%p341_p9)  }
  0x15   : > { %2388 = vmatpush3.bf16.msra.mxu0 (!%p341_p9), %v2613_v3  ;;  %2408 = vmatpush3.bf16.msra.mxu1 (!%p341_p9), %v2627_v14  ;;  %v2624_v20 = vld [vmem:[%s3533_s1 + $0x78] sm:$0xff] (!%p341_p9)   ;;  %v2634_v21 = vld [vmem:[%s3535_s3 + $0x50] sm:$0xff] (!%p341_p9)   ;;  %v2628_v24 = vld [vmem:[%s3535_s3 + $0xc0] sm:$0xff] (!%p341_p9)   ;;  %v3125_v3 = vrot.slane (!%p341_p9), %v2842_v2, 6 }
  0x16   : > { %2389 = vmatprep.subr.bf16.mxu0 (!%p341_p9), %v2614_v4  ;;  %2409 = vmatprep.subr.bf16.mxu1 (!%p341_p9), %v2630_v17  ;;  %v2635_v22 = vld [vmem:[%s3535_s3 + $0x10] sm:$0xff] (!%p341_p9)   ;;  %v2625_v23 = vld [vmem:[%s3533_s1 + $0x38] sm:$0xff] (!%p341_p9)   ;;  %v2629_v27 = vld [vmem:[%s3535_s3 + $0x80] sm:$0xff] (!%p341_p9)  }
  0x17   : > { %s380_s29 = scalar_select %p379_p10, %s2927_s21, 1  ;;  %v2638_v25 = vld [vmem:[%s3535_s3 + $0x58] sm:$0xff]   ;;  %v2632_v28 = vld [vmem:[%s3535_s3 + $0xc8] sm:$0xff]   ;;  %v2642_v30 = vld [vmem:[%s3535_s3 + $0x60] sm:$0xff]  }
  0x18   : > { %v2639_v26 = vld [vmem:[%s3535_s3 + $0x18] sm:$0xff]   ;;  %v2633_v29 = vld [vmem:[%s3535_s3 + $0x88] sm:$0xff]   ;;  %v2636_v31 = vld [vmem:[%s3535_s3 + $0xd0] sm:$0xff]  }
  0x19   : > { %s2384_s15 = sshll.u32 %s380_s29, 2  ;;  %2390 = vmatpush3.bf16.msra.mxu0 %v2615_v5  ;;  %2410 = vmatpush3.bf16.msra.mxu1 %v2631_v18  ;;  %v2643_v32 = vld [vmem:[%s3535_s3 + $0x20] sm:$0xff]   ;;  %v2637_v33 = vld [vmem:[%s3535_s3 + $0x90] sm:$0xff]   ;;  %v2640_v34 = vld [vmem:[%s3535_s3 + $0xd8] sm:$0xff]   ;;  %s2150_s29 = sshll.u32 %s378_s12, 4  ;;  %s3492_s29 = int_to_ptr.vmem [resolvable:$true] %s2150_s29 }
  0x1a   : > { %2391 = vmatprep.subr.bf16.mxu0 %v2616_v6  ;;  %s383_s30 = scalar_lea.vmem %s3532_s0, %s2384_s15  ;;  %2411 = vmatprep.subr.bf16.mxu1 %v2634_v21  ;;  %v2641_v35 = vld [vmem:[%s3535_s3 + $0x98] sm:$0xff]   ;;  %v2644_v36 = vld [vmem:[%s3535_s3 + $0xe0] sm:$0xff]   ;;  %v2646_v38 = vld [vmem:[%s3535_s3 + $0x68] sm:$0xff]   ;;  %s2778_s24 = scalar_lea.vmem %s3492_s29, 16 }
  0x1b   : > { %v2212_v11 = vld.sshfl [vmem:[%s383_s30] sm:$0x33 pattern:$0x76325410]  ;;  %v2647_v39 = vld [vmem:[%s3535_s3 + $0x28] sm:$0xff]   ;;  %v2650_v42 = vld [vmem:[%s3535_s3 + $0x70] sm:$0xff]   ;;  %p2779_p11 = scmp.ne.s32.totalorder %s3492_s29, %s2778_s24 }
  0x1c   : > { %v433_v12 = vcombine.high %v2212_v11, %v2212_v11  ;;  %v2645_v37 = vld [vmem:[%s3535_s3 + $0xa0] sm:$0xff]   ;;  %v2648_v40 = vld [vmem:[%s3535_s3 + $0xe8] sm:$0xff]   ;;  %v2651_v43 = vld [vmem:[%s3535_s3 + $0x30] sm:$0xff]   ;;  %s2381_s30 = sshll.u32 %s2927_s21, 4  ;;  %s2845_s21 = smov [#allocation2]  }
  0x1d   : > { %2392 = vmatpush3.bf16.msra.mxu0 %v2617_v7  ;;  %2412 = vmatpush3.bf16.msra.mxu1 %v2635_v22  ;;  %v2649_v41 = vld [vmem:[%s3535_s3 + $0xa8] sm:$0xff]   ;;  %v2652_v44 = vld [vmem:[%s3535_s3 + $0xf0] sm:$0xff]   ;;  %v2654_v46 = vld [vmem:[%s3535_s3 + $0x78] sm:$0xff]   ;;  %s3490_s16 = scalar_lea.hbm %s3543_s11, %s2381_s30  ;;  %p2780_p12 = pnand %p2779_p11, %p2944_p5 }
  0x1e   : > { %2393 = vmatprep.subr.bf16.mxu0 %v2618_v8  ;;  %564 = vmatprep.mubr.bf16.mxu0 %v433_v12  ;;  %v2653_v45 = vld [vmem:[%s3535_s3 + $0xb0] sm:$0xff]   ;;  %v2655_v47 = vld [vmem:[%s3535_s3 + $0x38] sm:$0xff]   ;;  %v2658_v50 = vld [vmem:[%s3535_s3 + $0x140] sm:$0xff]   ;;  %s2782_s19 = sshll.u32 %s2845_s21, 4  ;;  %s2783_s19 = int_to_ptr.vmem [resolvable:$false] %s2782_s19 }
  0x1f   : > { %2413 = vmatprep.subr.bf16.mxu1 %v2638_v25  ;;  %v2656_v48 = vld [vmem:[%s3535_s3 + $0xf8] sm:$0xff]   ;;  %v2660_v51 = vld [vmem:[%s3535_s3 + $0x1c0] sm:$0xff]   ;;  %vm2302_vm1 = vmneg %vm750_vm0  ;;  %p2781_p13 = pneg %p2780_p12  ;;  %s2784_s23 = scalar_lea.vmem %s2783_s19, 32 }
  0x20   : > { %v2657_v49 = vld [vmem:[%s3535_s3 + $0xb8] sm:$0xff]   ;;  %v2211_v53 = vld [vmem:[%s3534_s2] ss:$0 sm:$0xff]  ;;  %vm3119_vm3 = vmpackc.low %vm2302_vm1, %vm2302_vm1  ;;  %p2785_p0 = scmp.lt.s32.totalorder %s3492_s29, %s2783_s19  ;;  %p2786_p1 = scmp.lt.s32.totalorder %s2784_s23, %s2778_s24 }
  0x21   : > { %2394 = vmatpush3.bf16.msra.mxu0 %v2619_v9  ;;  %2414 = vmatpush3.bf16.msra.mxu1 %v2639_v26  ;;  %v2659_v12 = vld [vmem:[%s3535_s3 + $0x100] sm:$0xff]   ;;  %v2666_v26 = vld [vmem:[%s3535_s3 + $0x150] sm:$0xff]  }
  0x22   : > { %2395 = vmatprep.subr.bf16.mxu0 %v2620_v10  ;;  %2415 = vmatprep.subr.bf16.mxu1 %v2642_v30  ;;  %v2661_v18 = vld [vmem:[%s3535_s3 + $0x180] sm:$0xff]   ;;  %v2670_v30 = vld [vmem:[%s3535_s3 + $0x158] sm:$0xff]   ;;  %p2787_p2 = por %p2786_p1, %p2785_p0 }
  0x24   : > { %p2788_p3 = pnand %p2787_p2, %p2781_p13 }
  0x25   : > { %2396 = vmatpush3.bf16.msra.mxu0 %v2621_v15  ;;  %2416 = vmatpush3.bf16.msra.mxu1 %v2643_v32  ;;  %v2672_v32 = vld [vmem:[%s3535_s3 + $0x1d8] sm:$0xff]  }
  0x26   : > { %2397 = vmatprep.subr.bf16.mxu0 %v2622_v16  ;;  %2417 = vmatprep.subr.bf16.mxu1 %v2646_v38  ;;  %v2678_v38 = vld [vmem:[%s3535_s3 + $0x168] sm:$0xff]  }
  0x29   : > { %2398 = vmatpush3.bf16.msra.mxu0 %v2623_v19  ;;  %2418 = vmatpush3.bf16.msra.mxu1 %v2647_v39  ;;  %v2662_v19 = vld [vmem:[%s3535_s3 + $0x148] sm:$0xff]   ;;  %v2677_v39 = vld [vmem:[%s3535_s3 + $0x1a0] sm:$0xff]  }
  0x2a   : > { %2399 = vmatprep.subr.bf16.mxu0 %v2624_v20  ;;  %2419 = vmatprep.subr.bf16.mxu1 %v2650_v42  ;;  %v2682_v42 = vld [vmem:[%s3535_s3 + $0x170] sm:$0xff]  }
  0x2d   : > { %2400 = vmatpush3.bf16.msra.mxu0 %v2625_v23  ;;  %2420 = vmatpush3.bf16.msra.mxu1 %v2651_v43  ;;  %v2664_v23 = vld [vmem:[%s3535_s3 + $0x1c8] sm:$0xff]  }
  0x2e   : > { %2429 = vmatprep.subr.bf16.mxu0 %v2628_v24  ;;  %2421 = vmatprep.subr.bf16.mxu1 %v2654_v46  ;;  %v2663_v24 = vld [vmem:[%s3535_s3 + $0x108] sm:$0xff]   ;;  %v2686_v46 = vld [vmem:[%s3535_s3 + $0x178] sm:$0xff]  }
  0x2f   : > { %v2681_v43 = vld [vmem:[%s3535_s3 + $0x1a8] sm:$0xff]  }
  0x30   : > { %565 = vmatmul.mubr.bf16.vlgmr.msra.gmra.mrb[0].mxu0 %v2212_v11 }
  0x31   : > { %2430 = vmatpush3.bf16.msra.mxu0 %v2629_v27  ;;  %2422 = vmatpush3.bf16.msra.mxu1 %v2655_v47  ;;  %v2665_v27 = vld [vmem:[%s3535_s3 + $0x188] sm:$0xff]  }
  0x32   : > { %2431 = vmatprep.subr.bf16.mxu0 %v2632_v28  ;;  %2451 = vmatprep.subr.bf16.mxu1 %v2658_v50  ;;  %v2668_v28 = vld [vmem:[%s3535_s3 + $0x1d0] sm:$0xff]   ;;  %v2687_v50 = vld [vmem:[%s3535_s3 + $0x138] sm:$0xff]  }
  0x35   : > { %2432 = vmatpush3.bf16.msra.mxu0 %v2633_v29  ;;  %v2667_v29 = vld [vmem:[%s3535_s3 + $0x110] sm:$0xff]  }
  0x36   : > { %2433 = vmatprep.subr.bf16.mxu0 %v2636_v31  ;;  %v2669_v31 = vld [vmem:[%s3535_s3 + $0x190] sm:$0xff]  }
  0x39   : > { %2434 = vmatpush3.bf16.msra.mxu0 %v2637_v33  ;;  %v2671_v33 = vld [vmem:[%s3535_s3 + $0x118] sm:$0xff]  }
  0x3a   : > { %2435 = vmatprep.subr.bf16.mxu0 %v2640_v34  ;;  %v2674_v34 = vld [vmem:[%s3535_s3 + $0x160] sm:$0xff]  }
  0x3d   : > { %2436 = vmatpush3.bf16.msra.mxu0 %v2641_v35  ;;  %v2673_v35 = vld [vmem:[%s3535_s3 + $0x198] sm:$0xff]  }
  0x3e   : > { %2437 = vmatprep.subr.bf16.mxu0 %v2644_v36  ;;  %v2676_v36 = vld [vmem:[%s3535_s3 + $0x1e0] sm:$0xff]  }
  0x41   : > { %2438 = vmatpush3.bf16.msra.mxu0 %v2645_v37  ;;  %v2675_v37 = vld [vmem:[%s3535_s3 + $0x120] sm:$0xff]  }
  0x42   : > { %2439 = vmatprep.subr.bf16.mxu0 %v2648_v40  ;;  %v2680_v40 = vld [vmem:[%s3535_s3 + $0x1e8] sm:$0xff]  }
  0x45   : > { %2440 = vmatpush3.bf16.msra.mxu0 %v2649_v41  ;;  %v2679_v41 = vld [vmem:[%s3535_s3 + $0x128] sm:$0xff]  }
  0x46   : > { %2441 = vmatprep.subr.bf16.mxu0 %v2652_v44  ;;  %v2684_v44 = vld [vmem:[%s3535_s3 + $0x1f0] sm:$0xff]  }
  0x49   : > { %2442 = vmatpush3.bf16.msra.mxu0 %v2653_v45  ;;  %v2683_v45 = vld [vmem:[%s3535_s3 + $0x130] sm:$0xff]  }
  0x4a   : > { %2443 = vmatprep.subr.bf16.mxu0 %v2656_v48  ;;  %v2685_v48 = vld [vmem:[%s3535_s3 + $0x1b0] sm:$0xff]  }
  0x4d   : > { %2444 = vmatpush3.bf16.msra.mxu0 %v2657_v49  ;;  %v2688_v49 = vld [vmem:[%s3535_s3 + $0x1f8] sm:$0xff]  }
  0x4e   : > { %2473 = vmatprep.subr.bf16.mxu0 %v2660_v51  ;;  %v2689_v51 = vld [vmem:[%s3535_s3 + $0x1b8] sm:$0xff]  }
 0x103   : > { %v2401_v52 = vpop.f32.mrb[0].mxu0 }
 0x104   : > { %v2402_v54 = vpop.f32.mrb[1].mxu0 }
 0x105   : > { %v2403_v55 = vadd.f32 %v2402_v54, %v2401_v52  ;;  %v2404_v56 = vpop.f32.mrb[2].mxu0 }
 0x106   : > { %v2405_v57 = vpop.f32.mrb[3].mxu0 }
 0x107   : > { %v567_v58 = vadd.f32 %v2403_v55, %v2211_v53  ;;  %v2690_v53 = vld [vmem:[%s3535_s3 + $0x200] sm:$0xff]   ;;  %v2691_v57 = vld [vmem:[%s3535_s3 + $0x208] sm:$0xff]  }
 0x109   : > { %v3112_v59 = vmax.f32 %v567_v58, 0.0  ;;  %v2692_v58 = vld [vmem:[%s3535_s3 + $0x210] sm:$0xff]  }
 0x10b   : > { %v737_v60 = vrot.slane %v3112_v59, 6  ;;  %v718_v61 = vrot.slane %v3112_v59, 7  ;;  %v722_v62 = vrot.slane %v3112_v59, 1  ;;  %v726_v63 = vrot.slane %v3112_v59, 3 }
 0x10c   : > { %v729_v1 = vrot.slane %v3112_v59, 2 }
 0x10d   : > { %v2305_v4 = vpack.c.bf16 %v737_v60, %v737_v60  ;;  %v721_v5 = vsel %vm720_vm2, 0.0, %v718_v61  ;;  %v3127_v6 = vsel %vm720_vm2, 0.0, %v722_v62  ;;  %v724_v7 = vsel %vm720_vm2, %v722_v62, 0.0  ;;  %v2694_v60 = vld [vmem:[%s3535_s3 + $0x220] sm:$0xff]   ;;  %v2695_v61 = vld [vmem:[%s3535_s3 + $0x228] sm:$0xff]   ;;  %v2696_v62 = vld [vmem:[%s3535_s3 + $0x230] sm:$0xff]  }
 0x10e   : > { %v736_v8 = vrot.slane %v721_v5, 6  ;;  %v739_v9 = vrot.slane %v3127_v6, 6  ;;  %v3130_v10 = vsel %vm720_vm2, %v726_v63, 0.0  ;;  %v738_v11 = vrot.slane %v724_v7, 6  ;;  %v2697_v63 = vld [vmem:[%s3535_s3 + $0x238] sm:$0xff]  }
 0x10f   : > { %2306 = vmatprep.mubr.msk.bf16.mxu1 %vm3119_vm3, %v2305_v4  ;;  %v741_v13 = vrot.slane %v3130_v10, 6  ;;  %v758_v20 = vsel %vm750_vm0, %v729_v1, %v3125_v3  ;;  %v740_v47 = vrot.slane %v729_v1, 6  ;;  %v757_v54 = vsel %vm750_vm0, %v3127_v6, %v3125_v3  ;;  %v2698_v4 = vld [vmem:[%s3537_s5] ss:$16 sps:$4 sm:$0xff]   ;;  %v2701_v6 = vld [vmem:[%s3537_s5 + $0x8] ss:$16 sps:$4 sm:$0xff]  }
 0x110   : > { %v2310_v14 = vpack.c.bf16 %v736_v8, %v736_v8  ;;  %v754_v15 = vsel %vm750_vm0, %v721_v5, %v739_v9  ;;  %v2315_v22 = vpack.c.bf16 %v738_v11, %v738_v11  ;;  %v767_v25 = vpack.c.bf16 %v758_v20, %v758_v20  ;;  %v2700_v5 = vld [vmem:[%s3537_s5 + $0x4] ss:$16 sps:$4 sm:$0xff]   ;;  %v2704_v8 = vld [vmem:[%s3537_s5 + $0x20] ss:$16 sps:$4 sm:$0xff]   ;;  %v2707_v9 = vld [vmem:[%s3537_s5 + $0x28] ss:$16 sps:$4 sm:$0xff]  }
 0x111   : > { %v763_v16 = vpack.c.bf16 %v754_v15, %v754_v15  ;;  %v756_v17 = vsel %vm750_vm0, %v724_v7, %v741_v13  ;;  %v755_v52 = vsel %vm750_vm0, %v3112_v59, %v740_v47  ;;  %v766_v56 = vpack.c.bf16 %v757_v54, %v757_v54  ;;  %v2693_v59 = vld [vmem:[%s3535_s3 + $0x218] sm:$0xff]   ;;  %v2722_v20 = vld [vmem:[%s3537_s5 + $0x80] ss:$16 sps:$4 sm:$0xff]  }
 0x112   : > { %2311 = vmatmul.mubr.msk.bf16.vlgmr.msra.gmra.mrb[0].mxu1 %vm3119_vm3, %v2310_v14  ;;  %v765_v21 = vpack.c.bf16 %v756_v17, %v756_v17  ;;  %v764_v55 = vpack.c.bf16 %v755_v52, %v755_v52  ;;  %v759_v0 = vsel %vm750_vm0, %v3130_v10, %v3125_v3  ;;  %v2706_v3 = vld [vmem:[%s3537_s5 + $0x24] ss:$16 sps:$4 sm:$0xff]   ;;  %v2709_v7 = vld [vmem:[%s3537_s5 + $0x2c] ss:$16 sps:$4 sm:$0xff]   ;;  %v2713_v13 = vld [vmem:[%s3537_s5 + $0x48] ss:$16 sps:$4 sm:$0xff]  }
 0x113   : > { %2452 = vmatpush3.bf16.msra.mxu1 %v2659_v12  ;;  %1280 = vmatprep.mubr.bf16.mxu0 %v763_v16  ;;  %v768_v1 = vpack.c.bf16 %v759_v0, %v759_v0  ;;  %v2712_v10 = vld [vmem:[%s3537_s5 + $0x44] ss:$16 sps:$4 sm:$0xff]   ;;  %v2715_v11 = vld [vmem:[%s3537_s5 + $0x4c] ss:$16 sps:$4 sm:$0xff]   ;;  %v2710_v12 = vld [vmem:[%s3537_s5 + $0x40] ss:$16 sps:$4 sm:$0xff]  }
 0x114   : > { %1320 = vmatprep.mubr.bf16.mxu1 %v765_v21  ;;  %2316 = vmatmul.mubr.msk.bf16.vlgmr.msra.gmra.mrb[4].mxu0 %vm3119_vm3, %v2315_v22  ;;  %v2718_v14 = vld [vmem:[%s3537_s5 + $0x64] ss:$16 sps:$4 sm:$0xff]   ;;  %v2721_v15 = vld [vmem:[%s3537_s5 + $0x6c] ss:$16 sps:$4 sm:$0xff]   ;;  %v2716_v16 = vld [vmem:[%s3537_s5 + $0x60] ss:$16 sps:$4 sm:$0xff]  }
 0x115   : > { %2474 = vmatpush3.bf16.msra.mxu0 %v2661_v18  ;;  %2453 = vmatprep.subr.bf16.mxu1 %v2662_v19  ;;  %v2719_v17 = vld [vmem:[%s3537_s5 + $0x68] ss:$16 sps:$4 sm:$0xff]   ;;  %v2724_v18 = vld [vmem:[%s3537_s5 + $0x84] ss:$16 sps:$4 sm:$0xff]   ;;  %v2727_v19 = vld [vmem:[%s3537_s5 + $0x8c] ss:$16 sps:$4 sm:$0xff]  }
 0x116   : > { %1360 = vmatprep.mubr.bf16.mxu0 %v767_v25  ;;  %2475 = vmatprep.subr.bf16.mxu0 %v2664_v23  ;;  %v2725_v21 = vld [vmem:[%s3537_s5 + $0x88] ss:$16 sps:$4 sm:$0xff]   ;;  %v2730_v22 = vld [vmem:[%s3537_s5 + $0xa4] ss:$16 sps:$4 sm:$0xff]   ;;  %v2733_v23 = vld [vmem:[%s3537_s5 + $0xac] ss:$16 sps:$4 sm:$0xff]  }
 0x117   : > { %2454 = vmatpush3.bf16.msra.mxu1 %v2663_v24  ;;  %v2728_v24 = vld [vmem:[%s3537_s5 + $0xa0] ss:$16 sps:$4 sm:$0xff]   ;;  %v2731_v25 = vld [vmem:[%s3537_s5 + $0xa8] ss:$16 sps:$4 sm:$0xff]  }
 0x118   : > { %2455 = vmatprep.subr.bf16.mxu1 %v2666_v26  ;;  %v2736_v26 = vld [vmem:[%s3537_s5 + $0xc4] ss:$16 sps:$4 sm:$0xff]  }
 0x119   : > { %2476 = vmatpush3.bf16.msra.mxu0 %v2665_v27  ;;  %v2739_v27 = vld [vmem:[%s3537_s5 + $0xcc] ss:$16 sps:$4 sm:$0xff]  }
 0x11a   : > { %2477 = vmatprep.subr.bf16.mxu0 %v2668_v28  ;;  %v2734_v28 = vld [vmem:[%s3537_s5 + $0xc0] ss:$16 sps:$4 sm:$0xff]  }
 0x11b   : > { %2456 = vmatpush3.bf16.msra.mxu1 %v2667_v29  ;;  %v2737_v29 = vld [vmem:[%s3537_s5 + $0xc8] ss:$16 sps:$4 sm:$0xff]  }
 0x11c   : > { %2457 = vmatprep.subr.bf16.mxu1 %v2670_v30  ;;  %v2742_v30 = vld [vmem:[%s3537_s5 + $0xe4] ss:$16 sps:$4 sm:$0xff]  }
 0x11d   : > { %2478 = vmatpush3.bf16.msra.mxu0 %v2669_v31  ;;  %v2745_v31 = vld [vmem:[%s3537_s5 + $0xec] ss:$16 sps:$4 sm:$0xff]  }
 0x11e   : > { %2479 = vmatprep.subr.bf16.mxu0 %v2672_v32  ;;  %v2740_v32 = vld [vmem:[%s3537_s5 + $0xe0] ss:$16 sps:$4 sm:$0xff]  }
 0x11f   : > { %2458 = vmatpush3.bf16.msra.mxu1 %v2671_v33  ;;  %v2743_v33 = vld [vmem:[%s3537_s5 + $0xe8] ss:$16 sps:$4 sm:$0xff]  }
 0x120   : > { %2459 = vmatprep.subr.bf16.mxu1 %v2674_v34  ;;  %v2746_v34 = vld [vmem:[%s3541_s9 + $0x40] sm:$0xff]  }
 0x121   : > { %2480 = vmatpush3.bf16.msra.mxu0 %v2673_v35  ;;  %v2747_v35 = vld [vmem:[%s3541_s9 + $0xc0] sm:$0xff]  }
 0x122   : > { %2481 = vmatprep.subr.bf16.mxu0 %v2676_v36  ;;  %v2844_v36 = vmov 0  }
 0x123   : > { %2460 = vmatpush3.bf16.msra.mxu1 %v2675_v37 }
 0x124   : > { %2461 = vmatprep.subr.bf16.mxu1 %v2678_v38  ;;  %v2229_v38 = vld [vmem:[%s3536_s4] ss:$0 sm:$0xff] }
 0x125   : > { %2482 = vmatpush3.bf16.msra.mxu0 %v2677_v39 }
 0x126   : > { %2483 = vmatprep.subr.bf16.mxu0 %v2680_v40 }
 0x127   : > { %2462 = vmatpush3.bf16.msra.mxu1 %v2679_v41 }
 0x128   : > { %2463 = vmatprep.subr.bf16.mxu1 %v2682_v42 }
 0x129   : > { %2484 = vmatpush3.bf16.msra.mxu0 %v2681_v43 }
 0x12a   : > { %2485 = vmatprep.subr.bf16.mxu0 %v2684_v44 }
 0x12b   : > { %2464 = vmatpush3.bf16.msra.mxu1 %v2683_v45 }
 0x12c   : > { %2465 = vmatprep.subr.bf16.mxu1 %v2686_v46 }
 0x12d   : > { %2486 = vmatpush3.bf16.msra.mxu0 %v2685_v48 }
 0x12e   : > { %2487 = vmatprep.subr.bf16.mxu0 %v2688_v49 }
 0x12f   : > { %2466 = vmatpush3.bf16.msra.mxu1 %v2687_v50 }
 0x130   : > { %2548 = vmatprep.subr.bf16.mxu1 %v2842_v2 }
 0x131   : > { %2488 = vmatpush3.bf16.msra.mxu0 %v2689_v51 }
 0x132   : > { %1321 = vmatmul.mubr.bf16.vlgmr.msra.gmra.mrb[4].mxu1 %v764_v55  ;;  %1624 = vmatprep.subr.bf16.mxu0 %v2700_v5 }
 0x133   : > { %2549 = vmatpush3.bf16.msra.mxu1 %v2690_v53  ;;  %2564 = vmatprep.mubr.msk.bf16.mxu1 %vm2843_vm4, %v2842_v2 }
 0x134   : > { %1361 = vmatmul.mubr.bf16.vlgmr.msra.gmra.mrb[8].mxu0 %v766_v56  ;;  %2550 = vmatprep.subr.bf16.mxu1 %v2842_v2 }
 0x135   : > { %1625 = vmatpush1.bf16.msra.mxu0 %v2698_v4  ;;  %1656 = vmatprep.mubr.bf16.mxu0 %v2844_v36 }
 0x136   : > { %1626 = vmatprep.subr.bf16.mxu0 %v2706_v3 }
 0x137   : > { %2551 = vmatpush3.bf16.msra.mxu1 %v2691_v57 }
 0x138   : > { %2552 = vmatprep.subr.bf16.mxu1 %v2842_v2 }
 0x139   : > { %1627 = vmatpush1.bf16.msra.mxu0 %v2704_v8  ;;  %v2751_v8 = vld [vmem:[%s3541_s9 + $0xc8] sm:$0xff]  }
 0x13a   : > { %1628 = vmatprep.subr.bf16.mxu0 %v2712_v10  ;;  %v2753_v10 = vld [vmem:[%s3541_s9 + $0x88] sm:$0xff]  }
 0x13b   : > { %2553 = vmatpush3.bf16.msra.mxu1 %v2692_v58 }
 0x13c   : > { %2554 = vmatprep.subr.bf16.mxu1 %v2842_v2 }
 0x13d   : > { %1629 = vmatpush1.bf16.msra.mxu0 %v2710_v12  ;;  %v2755_v12 = vld [vmem:[%s3541_s9 + $0xd0] sm:$0xff]  }
 0x13e   : > { %1630 = vmatprep.subr.bf16.mxu0 %v2718_v14  ;;  %v2757_v14 = vld [vmem:[%s3541_s9 + $0x90] sm:$0xff]  }
 0x13f   : > { %2555 = vmatpush3.bf16.msra.mxu1 %v2693_v59 }
 0x140   : > { %2556 = vmatprep.subr.bf16.mxu1 %v2842_v2 }
 0x141   : > { %1631 = vmatpush1.bf16.msra.mxu0 %v2716_v16  ;;  %v2759_v16 = vld [vmem:[%s3541_s9 + $0xd8] sm:$0xff]  }
 0x142   : > { %1632 = vmatprep.subr.bf16.mxu0 %v2724_v18  ;;  %v2761_v18 = vld [vmem:[%s3541_s9 + $0x98] sm:$0xff]  }
 0x143   : > { %2557 = vmatpush3.bf16.msra.mxu1 %v2694_v60 }
 0x144   : > { %2558 = vmatprep.subr.bf16.mxu1 %v2842_v2 }
 0x145   : > { %1633 = vmatpush1.bf16.msra.mxu0 %v2722_v20  ;;  %v2763_v20 = vld [vmem:[%s3541_s9 + $0xe0] sm:$0xff]  }
 0x146   : > { %1634 = vmatprep.subr.bf16.mxu0 %v2730_v22  ;;  %v2765_v22 = vld [vmem:[%s3541_s9 + $0xa0] sm:$0xff]  }
 0x147   : > { %2559 = vmatpush3.bf16.msra.mxu1 %v2695_v61 }
 0x148   : > { %2560 = vmatprep.subr.bf16.mxu1 %v2842_v2 }
 0x149   : > { %1635 = vmatpush1.bf16.msra.mxu0 %v2728_v24  ;;  %v2767_v24 = vld [vmem:[%s3541_s9 + $0xe8] sm:$0xff]  }
 0x14a   : > { %1636 = vmatprep.subr.bf16.mxu0 %v2736_v26  ;;  %v2769_v26 = vld [vmem:[%s3541_s9 + $0xa8] sm:$0xff]  }
 0x14b   : > { %2561 = vmatpush3.bf16.msra.mxu1 %v2696_v62 }
 0x14c   : > { %2562 = vmatprep.subr.bf16.mxu1 %v2842_v2  ;;  %v2703_v2 = vld [vmem:[%s3537_s5 + $0xc] ss:$16 sps:$4 sm:$0xff]  }
 0x14d   : > { %1637 = vmatpush1.bf16.msra.mxu0 %v2734_v28  ;;  %v2771_v28 = vld [vmem:[%s3541_s9 + $0xf0] sm:$0xff]  }
 0x14e   : > { %1638 = vmatprep.subr.bf16.mxu0 %v2742_v30  ;;  %v2773_v30 = vld [vmem:[%s3541_s9 + $0xb0] sm:$0xff]  }
 0x14f   : > { %2563 = vmatpush3.bf16.msra.mxu1 %v2697_v63 }
 0x150   : > { %1665 = vmatprep.subr.bf16.mxu1 %v2703_v2  ;;  %v2749_v2 = vld [vmem:[%s3541_s9 + $0x80] sm:$0xff]  }
 0x151   : > { %1639 = vmatpush1.bf16.msra.mxu0 %v2740_v32  ;;  %v2775_v32 = vld [vmem:[%s3541_s9 + $0xf8] sm:$0xff]  }
 0x152   : > { %2565 = vmatmul.mubr.bf16.vlgmr.msra.gmra.mrb[8].mxu1 %v768_v1  ;;  %2504 = vmatprep.subr.bf16.mxu0 %v2746_v34  ;;  %v2777_v34 = vld [vmem:[%s3541_s9 + $0xb8] sm:$0xff]  }
 0x153   : > { %1666 = vmatpush1.bf16.msra.mxu1 %v2701_v6  ;;  %1697 = vmatprep.mubr.bf16.mxu1 %v2844_v36  ;;  %v2748_v6 = vld [vmem:[%s3541_s9] sm:$0xff]  }
 0x154   : > { %1667 = vmatprep.subr.bf16.mxu1 %v2709_v7  ;;  %v2750_v7 = vld [vmem:[%s3541_s9 + $0x48] sm:$0xff]  }
 0x157   : > { %1668 = vmatpush1.bf16.msra.mxu1 %v2707_v9  ;;  %v2752_v9 = vld [vmem:[%s3541_s9 + $0x8] sm:$0xff]  }
 0x158   : > { %1669 = vmatprep.subr.bf16.mxu1 %v2715_v11  ;;  %v2754_v11 = vld [vmem:[%s3541_s9 + $0x50] sm:$0xff]  }
 0x15b   : > { %1670 = vmatpush1.bf16.msra.mxu1 %v2713_v13  ;;  %v2756_v13 = vld [vmem:[%s3541_s9 + $0x10] sm:$0xff]  }
 0x15c   : > { %1671 = vmatprep.subr.bf16.mxu1 %v2721_v15  ;;  %v2758_v15 = vld [vmem:[%s3541_s9 + $0x58] sm:$0xff]  }
 0x15f   : > { %1672 = vmatpush1.bf16.msra.mxu1 %v2719_v17  ;;  %v2760_v17 = vld [vmem:[%s3541_s9 + $0x18] sm:$0xff]  }
 0x160   : > { %1673 = vmatprep.subr.bf16.mxu1 %v2727_v19  ;;  %v2762_v19 = vld [vmem:[%s3541_s9 + $0x60] sm:$0xff]  }
 0x163   : > { %1674 = vmatpush1.bf16.msra.mxu1 %v2725_v21  ;;  %v2764_v21 = vld [vmem:[%s3541_s9 + $0x20] sm:$0xff]  }
 0x164   : > { %1675 = vmatprep.subr.bf16.mxu1 %v2733_v23  ;;  %v2766_v23 = vld [vmem:[%s3541_s9 + $0x68] sm:$0xff]  }
 0x167   : > { %1676 = vmatpush1.bf16.msra.mxu1 %v2731_v25  ;;  %v2768_v25 = vld [vmem:[%s3541_s9 + $0x28] sm:$0xff]  }
 0x168   : > { %1677 = vmatprep.subr.bf16.mxu1 %v2739_v27  ;;  %v2770_v27 = vld [vmem:[%s3541_s9 + $0x70] sm:$0xff]  }
 0x16b   : > { %1678 = vmatpush1.bf16.msra.mxu1 %v2737_v29  ;;  %v2772_v29 = vld [vmem:[%s3541_s9 + $0x30] sm:$0xff]  }
 0x16c   : > { %1679 = vmatprep.subr.bf16.mxu1 %v2745_v31  ;;  %v2774_v31 = vld [vmem:[%s3541_s9 + $0x78] sm:$0xff]  }
 0x16f   : > { %1680 = vmatpush1.bf16.msra.mxu1 %v2743_v33  ;;  %v2776_v33 = vld [vmem:[%s3541_s9 + $0x38] sm:$0xff]  }
 0x170   : > { %2526 = vmatprep.subr.bf16.mxu1 %v2747_v35  ;;  %v1444_v35 = vlaneseq }
 0x172   : > { %v1445_v36 = vshrl.u32 %v1444_v35, 7 }
 0x1e5   : > { %v2423_v37 = vpop.f32.mrb[0].mxu1 }
 0x1e6   : > { %v2424_v39 = vpop.f32.mrb[1].mxu1 }
 0x1e7   : > { %v2425_v40 = vadd.f32 %v2424_v39, %v2423_v37  ;;  %v2426_v41 = vpop.f32.mrb[2].mxu1  ;;  %v2445_v42 = vpop.f32.mrb[4].mxu0  ;;  %v1446_v37 = vsub.s32 0, %v1445_v36  ;;  %v1442_v39 = vld [vmem:[%s3538_s6] sm:$0xf] }
 0x1e8   : > { %v2427_v43 = vpop.f32.mrb[3].mxu1  ;;  %v2446_v44 = vpop.f32.mrb[5].mxu0  ;;  %v1458_v41 = vsub.s32 3, %v1445_v36 }
 0x1e9   : > { %v1243_v45 = vadd.f32 %v2425_v40, %v2229_v38  ;;  %v2447_v46 = vadd.f32 %v2446_v44, %v2445_v42  ;;  %v2448_v47 = vpop.f32.mrb[6].mxu0  ;;  %v1454_v38 = vsub.s32 2, %v1445_v36  ;;  %v1450_v40 = vsub.s32 1, %v1445_v36  ;;  %v1710_v44 = vld [vmem:[%s3539_s7] sm:$0xf] }
 0x1ea   : > { %v2449_v48 = vpop.f32.mrb[7].mxu0  ;;  %v1447_v42 = vrot.slane %v1442_v39, %v1446_v37 }
 0x1eb   : > { %v1283_v49 = vadd.f32 %v2447_v46, %v1243_v45  ;;  %v1455_v43 = vrot.slane %v1442_v39, %v1454_v38  ;;  %v1451_v45 = vrot.slane %v1442_v39, %v1450_v40  ;;  %v1459_v46 = vrot.slane %v1442_v39, %v1458_v41  ;;  %v1736_v48 = vld [vmem:[%s3540_s8] sm:$0xf] }
 0x205   : > { %v2467_v50 = vpop.f32.mrb[4].mxu1 }
 0x206   : > { %v2468_v51 = vpop.f32.mrb[5].mxu1 }
 0x207   : > { %v2469_v52 = vadd.f32 %v2468_v51, %v2467_v50  ;;  %v2470_v53 = vpop.f32.mrb[6].mxu1  ;;  %v2489_v54 = vpop.f32.mrb[8].mxu0  ;;  %v1715_v51 = vrot.slane %v1710_v44, %v1446_v37 }
 0x208   : > { %v2471_v55 = vpop.f32.mrb[7].mxu1  ;;  %v2490_v56 = vpop.f32.mrb[9].mxu0  ;;  %v1723_v53 = vrot.slane %v1710_v44, %v1454_v38 }
 0x209   : > { %v1323_v57 = vadd.f32 %v2469_v52, %v1283_v49  ;;  %v2491_v58 = vadd.f32 %v2490_v56, %v2489_v54  ;;  %v2492_v59 = vpop.f32.mrb[10].mxu0 }
 0x20a   : > { %v2493_v60 = vpop.f32.mrb[11].mxu0  ;;  %v1727_v59 = vrot.slane %v1710_v44, %v1458_v41 }
 0x20b   : > { %v1363_v61 = vadd.f32 %v2491_v58, %v1323_v57  ;;  %v1719_v57 = vrot.slane %v1710_v44, %v1450_v40 }
 0x225   : > { %v1402_v62 = vpop.f32.mrb[8].mxu1 }
 0x226   : > { %v1403_v63 = vadd.f32 %v1402_v62, %v1363_v61  ;;  %v2566_v0 = vpop.f32.mrb[9].mxu1 }
 0x227   : > { %v1405_v1 = vpop.f32.mrb[10].mxu1 }
 0x228   : > { %v1408_v4 = vmax.f32 %v1403_v63, 0.0  ;;  %v2567_v5 = vpop.f32.mrb[11].mxu1  ;;  %v1741_v63 = vrot.slane %v1736_v48, %v1446_v37  ;;  %v1749_v1 = vrot.slane %v1736_v48, %v1454_v38 }
 0x22a   : > { %v1409_v3 = vpack.c.bf16 %v1408_v4, %v1408_v4 }
 0x22c   : > { %1657 = vmatmul.mubr.bf16.vlgmr.msra.gmra.mrb[12].mxu0 %v1409_v3  ;;  %1698 = vmatmul.mubr.bf16.vlgmr.msra.gmra.mrb[12].mxu1 %v1409_v3 }
 0x22d   : > { %2505 = vmatpush3.bf16.msra.mxu0 %v2748_v6  ;;  %2527 = vmatpush3.bf16.msra.mxu1 %v2749_v2  ;;  %v1745_v2 = vrot.slane %v1736_v48, %v1450_v40 }
 0x22e   : > { %2506 = vmatprep.subr.bf16.mxu0 %v2750_v7  ;;  %2528 = vmatprep.subr.bf16.mxu1 %v2751_v8  ;;  %v1753_v7 = vrot.slane %v1736_v48, %v1458_v41 }
 0x231   : > { %2507 = vmatpush3.bf16.msra.mxu0 %v2752_v9  ;;  %2529 = vmatpush3.bf16.msra.mxu1 %v2753_v10 }
 0x232   : > { %2508 = vmatprep.subr.bf16.mxu0 %v2754_v11  ;;  %2530 = vmatprep.subr.bf16.mxu1 %v2755_v12 }
 0x235   : > { %2509 = vmatpush3.bf16.msra.mxu0 %v2756_v13  ;;  %2531 = vmatpush3.bf16.msra.mxu1 %v2757_v14 }
 0x236   : > { %2510 = vmatprep.subr.bf16.mxu0 %v2758_v15  ;;  %2532 = vmatprep.subr.bf16.mxu1 %v2759_v16 }
 0x239   : > { %2511 = vmatpush3.bf16.msra.mxu0 %v2760_v17  ;;  %2533 = vmatpush3.bf16.msra.mxu1 %v2761_v18 }
 0x23a   : > { %2512 = vmatprep.subr.bf16.mxu0 %v2762_v19  ;;  %2534 = vmatprep.subr.bf16.mxu1 %v2763_v20 }
 0x23d   : > { %2513 = vmatpush3.bf16.msra.mxu0 %v2764_v21  ;;  %2535 = vmatpush3.bf16.msra.mxu1 %v2765_v22 }
 0x23e   : > { %2514 = vmatprep.subr.bf16.mxu0 %v2766_v23  ;;  %2536 = vmatprep.subr.bf16.mxu1 %v2767_v24 }
 0x241   : > { %2515 = vmatpush3.bf16.msra.mxu0 %v2768_v25  ;;  %2537 = vmatpush3.bf16.msra.mxu1 %v2769_v26 }
 0x242   : > { %2516 = vmatprep.subr.bf16.mxu0 %v2770_v27  ;;  %2538 = vmatprep.subr.bf16.mxu1 %v2771_v28 }
 0x245   : > { %2517 = vmatpush3.bf16.msra.mxu0 %v2772_v29  ;;  %2539 = vmatpush3.bf16.msra.mxu1 %v2773_v30 }
 0x246   : > { %2518 = vmatprep.subr.bf16.mxu0 %v2774_v31  ;;  %2540 = vmatprep.subr.bf16.mxu1 %v2775_v32 }
 0x249   : > { %2519 = vmatpush3.bf16.msra.mxu0 %v2776_v33  ;;  %2541 = vmatpush3.bf16.msra.mxu1 %v2777_v34 }
 0x2ff   : > { %v1658_v47 = vpop.f32.mrb[12].mxu0  ;;  %v1699_v49 = vpop.f32.mrb[12].mxu1 }
 0x300   : > { %v1659_v50 = vadd.f32 %v1658_v47, %v1447_v42  ;;  %v1700_v52 = vadd.f32 %v1699_v49, %v1455_v43  ;;  %v1660_v54 = vpop.f32.mrb[13].mxu0  ;;  %v1701_v55 = vpop.f32.mrb[13].mxu1 }
 0x301   : > { %v1661_v56 = vadd.f32 %v1660_v54, %v1451_v45  ;;  %v1702_v58 = vadd.f32 %v1701_v55, %v1459_v46  ;;  %v1662_v60 = vpop.f32.mrb[14].mxu0  ;;  %v1703_v61 = vpop.f32.mrb[14].mxu1  ;;  %v1863_v54 = vld [vmem:[%s3542_s10] sm:$0x1] }
 0x302   : > { %v1706_v62 = vmax.f32 %v1659_v50, 0.0  ;;  %v1708_v0 = vmax.f32 %v1700_v52, 0.0  ;;  %v1663_v4 = vpop.f32.mrb[15].mxu0  ;;  %v1704_v5 = vpop.f32.mrb[15].mxu1 }
 0x303   : > { %v1707_v6 = vmax.f32 %v1661_v56, 0.0  ;;  %v1709_v3 = vmax.f32 %v1702_v58, 0.0 }
 0x304   : > { %v1732_v8 = vmul.f32 %v1715_v51, %v1706_v62  ;;  %v1734_v9 = vmul.f32 %v1723_v53, %v1708_v0 }
 0x305   : > { %v1733_v10 = vmul.f32 %v1719_v57, %v1707_v6  ;;  %v1735_v11 = vmul.f32 %v1727_v59, %v1709_v3 }
 0x306   : > { %v1758_v12 = vadd.f32 %v1741_v63, %v1732_v8  ;;  %v1760_v13 = vadd.f32 %v1749_v1, %v1734_v9 }
 0x307   : > { %v1759_v14 = vadd.f32 %v1745_v2, %v1733_v10  ;;  %v1761_v15 = vadd.f32 %v1753_v7, %v1735_v11 }
 0x308   : > { %v1763_v16 = vsel %vm1762_vm5, %v1758_v12, 0.0  ;;  %v1777_v17 = vsel %vm1762_vm5, %v1760_v13, 0.0 }
 0x309   : > { %v1764_v18 = vrot.slane %v1763_v16, 4  ;;  %v1778_v19 = vrot.slane %v1777_v17, 4  ;;  %v1770_v20 = vsel %vm1762_vm5, %v1759_v14, 0.0  ;;  %v1784_v21 = vsel %vm1762_vm5, %v1761_v15, 0.0 }
 0x30a   : > { %v1771_v22 = vrot.slane %v1770_v20, 4  ;;  %v1785_v23 = vrot.slane %v1784_v21, 4 }
 0x30b   : > { %v1765_v24 = vadd.f32 %v1764_v18, %v1763_v16  ;;  %v1779_v25 = vadd.f32 %v1778_v19, %v1777_v17 }
 0x30c   : > { %v1772_v26 = vadd.f32 %v1771_v22, %v1770_v20  ;;  %v1786_v27 = vadd.f32 %v1785_v23, %v1784_v21 }
 0x30d   : > { %v1766_v28 = vrot.slane %v1765_v24, 2  ;;  %v1780_v29 = vrot.slane %v1779_v25, 2 }
 0x30e   : > { %v1773_v30 = vrot.slane %v1772_v26, 2  ;;  %v1787_v31 = vrot.slane %v1786_v27, 2 }
 0x30f   : > { %v1767_v32 = vadd.f32 %v1766_v28, %v1765_v24  ;;  %v1781_v33 = vadd.f32 %v1780_v29, %v1779_v25 }
 0x310   : > { %v1774_v34 = vadd.f32 %v1773_v30, %v1772_v26  ;;  %v1788_v35 = vadd.f32 %v1787_v31, %v1786_v27 }
 0x311   : > { %v1768_v36 = vrot.slane %v1767_v32, 1  ;;  %v1782_v37 = vrot.slane %v1781_v33, 1 }
 0x312   : > { %v1775_v38 = vrot.slane %v1774_v34, 1  ;;  %v1789_v39 = vrot.slane %v1788_v35, 1 }
 0x313   : > { %v1769_v40 = vadd.f32 %v1768_v36, %v1767_v32  ;;  %v1783_v41 = vadd.f32 %v1782_v37, %v1781_v33 }
 0x314   : > { %v1776_v42 = vadd.f32 %v1775_v38, %v1774_v34  ;;  %v1790_v43 = vadd.f32 %v1789_v39, %v1788_v35 }
 0x315   : > { %v1791_v44 = vmul.f32 0.25, %v1769_v40  ;;  %v1793_v45 = vmul.f32 0.25, %v1783_v41 }
 0x316   : > { %v1792_v46 = vmul.f32 0.25, %v1776_v42  ;;  %v1794_v47 = vmul.f32 0.25, %v1790_v43 }
 0x317   : > { %v1795_v50 = vpack.c.bf16 %v1791_v44, %v1791_v44  ;;  %v1797_v51 = vpack.c.bf16 %v1793_v45, %v1793_v45 }
 0x318   : > { %v1796_v48 = vpack.c.bf16 %v1792_v46, %v1792_v46  ;;  %v1798_v49 = vpack.c.bf16 %v1794_v47, %v1794_v47 }
 0x31a   : > { %2088 = vmatprep.mubr.bf16.mxu0 %v1796_v48  ;;  %2128 = vmatprep.mubr.bf16.mxu1 %v1798_v49 }
 0x31b   : > { %2089 = vmatmul.mubr.bf16.vlgmr.msra.gmra.mrb[16].mxu0 %v1795_v50  ;;  %2129 = vmatmul.mubr.bf16.vlgmr.msra.gmra.mrb[16].mxu1 %v1797_v51 }
 0x3ee   : > { %v2520_v52 = vpop.f32.mrb[16].mxu0  ;;  %v2542_v53 = vpop.f32.mrb[16].mxu1 }
 0x3ef   : > { %v2521_v55 = vpop.f32.mrb[17].mxu0  ;;  %v2543_v56 = vpop.f32.mrb[17].mxu1 }
 0x3f0   : > { %v2522_v57 = vadd.f32 %v2521_v55, %v2520_v52  ;;  %v2544_v58 = vadd.f32 %v2543_v56, %v2542_v53  ;;  %v2523_v59 = vpop.f32.mrb[18].mxu0  ;;  %v2545_v60 = vpop.f32.mrb[18].mxu1 }
 0x3f1   : > { %v2524_v61 = vpop.f32.mrb[19].mxu0  ;;  %v2546_v62 = vpop.f32.mrb[19].mxu1 }
 0x3f2   : > { %v2091_v63 = vadd.f32 %v2522_v57, %v1863_v54 }
 0x3f4   : > { %v2131_v0 = vadd.f32 %v2544_v58, %v2091_v63 }
 0x3f6   : > { %2136 = vst [vmem:[%s378_s12] sm:$0x1] %v2131_v0 }
 0x3f7   : > { %2791 = shalt.err (!%p2788_p3)
}
 0x3f8   : > { %s2792_s26 = scalar_lea.hbm %s3490_s16, 16  ;;  %s2796_s30 = scalar_lea.hbm %s3543_s11, 32 }
 0x3f9   : > { %p2793_p4 = scmp.ne.s32.totalorder %s3490_s16, %s2792_s26  ;;  %p2797_p9 = scmp.lt.u32.totalorder %s3490_s16, %s3543_s11 }
 0x3fa   : > { %p2798_p10 = scmp.lt.u32.totalorder %s2796_s30, %s2792_s26  ;;  %p2800_p12 = scmp.lt.u32.totalorder %s2792_s26, %s3490_s16 }
 0x3fb   : > { %p2794_p7 = pnand %p2793_p4, %p2944_p5 }
 0x3fc   : > { %p2799_p11 = por %p2798_p10, %p2797_p9 }
 0x3fd   : > { %p2795_p8 = pneg %p2794_p7 }
 0x3fe   : > { %p2801_p13 = por %p2800_p12, %p2799_p11 }
 0x400   : > { %p2802_p0 = pnand %p2801_p13, %p2795_p8 }
 0x402   : > { %2805 = shalt.err (!%p2802_p0)
}
 0x403   : > { %2568 = dma.vmem_to_hbm [thread:$0]  (%p2944_p5), %s3492_s29, 16, %s3490_s16, %s2138_s22  }
 0x404 PF: > { %p2574_p1 = scmp.ge.s32.totalorder %s2840_s20, 2  ;;  %s2162_s14 = sand.u32 1, %s2828_s17  }
 0x405   : > { %s2163_s24 = scalar_lea.sflag [#allocation3], %s2162_s14 }
 0x406   : > { %p2571_p2 = pnand %p2574_p1, %p2948_p6 }
 0x408   : > { %2823 = dma.done.wait (!%p2571_p2), %s2163_s24, 16  }
 0x409   : > { %2825 = vsyncadd (!%p2571_p2), %s2163_s24, 4294967280  ;;  %s3554_s20 = sld [smem:[#allocation6_spill]]  ;;  %s3555_s21 = sld [smem:[#allocation5_spill]] }
 0x40a   : > { %s3556_s19 = sld [smem:[#allocation7_spill]]  ;;  %s3557_s17 = smov %s2832_s18 }
 0x40f   : > { %p21_p3 = scmp.ge.s32.totalorder %s3554_s20, 4   ;;  %s3558_s18 = smov %s3555_s21 }
 0x411   :  { %23 = sbr.rel (!%p21_p3) target bundleno = 3 (0x3), region = 99 }
 0x418   :  { %2167 = vsyncpa [#allocation3], 1 }
 0x419   :  { %2169 = vsyncpa [#allocation3 + $0x1], 1 }

</bundles_post_ra>
